<compile_context>
chip_gen: v6e
topology: v6e:2x2x1
jax: 0.10.0
libtpu: 0.0.40
codegen_flags: <defaults>
</compile_context>

<pallas_src>
import functools

import jax
import jax.numpy as jnp
from jax.experimental import pallas as pl
from jax.experimental.pallas import tpu as pltpu


def _round_up(v, m):
    return ((v + m - 1) // m) * m


def _lstm_head_kernel(x_ref, *refs, num_layers, T_chunk, B_block, H, H_lane,
                      G_pad, O_pad):
    """One (batch block, time chunk) of the LSTM stack + head + sigmoid.

    refs = [w_ih_0, w_hh_0, b_0, ..., w_ih_{L-1}, w_hh_{L-1}, b_{L-1},
            w_head, b_head,            # inputs (bf16 weights, f32 biases)
            out_ref,                   # (T_chunk, B_block, O_pad) f32
            gates_ref,                 # (T_chunk, B_block, G_pad) f32 scratch
            h_seq_ref,                 # (T_chunk, B_block, H_lane) f32 scratch
            h_state_ref, c_state_ref]  # (L, B_block, H_lane) f32 carried state
    """
    n_w = 3 * num_layers + 2
    w_refs = refs[:n_w]
    out_ref = refs[n_w]
    gates_ref = refs[n_w + 1]
    h_seq_ref = refs[n_w + 2]
    h_state_ref = refs[n_w + 3]
    c_state_ref = refs[n_w + 4]

    # Reset the carried (h, c) state at the first time chunk of each batch block.
    @pl.when(pl.program_id(1) == 0)
    def _():
        h_state_ref[...] = jnp.zeros_like(h_state_ref)
        c_state_ref[...] = jnp.zeros_like(c_state_ref)

    # Loop-invariant lane masks (hoisted: JAX does not CSE broadcast_in_dim).
    lane = jax.lax.broadcasted_iota(jnp.int32, (B_block, G_pad), 1)
    g_mask = (lane >= 2 * H) & (lane < 3 * H)          # the tanh ("g") gate lanes
    h_lane_ids = jax.lax.broadcasted_iota(jnp.int32, (B_block, H_lane), 1)
    h_mask = h_lane_ids < H                             # valid hidden lanes

    for l in range(num_layers):
        w_ih_ref = w_refs[3 * l]
        w_hh_ref = w_refs[3 * l + 1]
        b_ref = w_refs[3 * l + 2]

        # --- hoisted input projection: one matmul for the whole chunk (bf16 MXU).
        if l == 0:
            x_in = x_ref[...].reshape(T_chunk * B_block, x_ref.shape[2])
        else:
            x_in = h_seq_ref[...].reshape(T_chunk * B_block, H_lane).astype(
                jnp.bfloat16)
        gates_in = (
            jnp.dot(x_in, w_ih_ref[...], preferred_element_type=jnp.float32)
            + b_ref[...]
        )
        gates_ref[...] = gates_in.reshape(T_chunk, B_block, G_pad)

        # --- serial recurrence: only h @ W_hh per step; gates packed in 4H lanes.
        def step(t, carry):
            h, c = carry
            pre = gates_ref[t] + jnp.dot(
                h.astype(jnp.bfloat16), w_hh_ref[...],
                preferred_element_type=jnp.float32)         # (B_block, G_pad)
            # Single EUP pass: sigmoid everywhere; tanh(x) = 2*sigmoid(2x) - 1
            # on the g-gate lanes (selects are cheap VALU work).
            scaled = jnp.where(g_mask, 2.0 * pre, pre)
            s = jax.nn.sigmoid(scaled)
            act = jnp.where(g_mask, 2.0 * s - 1.0, s)
            # Align gates to lanes [0, H) with XLU rotations (positive shifts).
            i_al = act[:, :H_lane]
            f_al = pltpu.roll(act, shift=G_pad - H, axis=1)[:, :H_lane]
            g_al = pltpu.roll(act, shift=G_pad - 2 * H, axis=1)[:, :H_lane]
            o_al = pltpu.roll(act, shift=G_pad - 3 * H, axis=1)[:, :H_lane]
            c_new = jnp.where(h_mask, f_al * c + i_al * g_al, 0.0)
            h_new = o_al * jnp.tanh(c_new)                   # zero beyond lane H
            h_seq_ref[t] = h_new
            return (h_new, c_new)

        h0 = h_state_ref[l]
        c0 = c_state_ref[l]
        h_f, c_f = jax.lax.fori_loop(0, T_chunk, step, (h0, c0),
                                     unroll=min(T_chunk, 8))
        h_state_ref[l] = h_f
        c_state_ref[l] = c_f

    # --- head: one matmul + sigmoid per chunk, lane-dense store.
    w_head_ref = w_refs[3 * num_layers]
    b_head_ref = w_refs[3 * num_layers + 1]
    h_flat = h_seq_ref[...].reshape(T_chunk * B_block, H_lane).astype(jnp.bfloat16)
    y = jax.nn.sigmoid(
        jnp.dot(h_flat, w_head_ref[...], preferred_element_type=jnp.float32)
        + b_head_ref[...])
    out_ref[...] = y.reshape(T_chunk, B_block, O_pad).astype(out_ref.dtype)


def _pack_gate_weight(w, in_size, in_lane, H, G_pad):
    """PyTorch (4H, in) gate-stacked weight -> (in_lane, G_pad) bf16, transposed,
    gates packed contiguously at lane offsets 0, H, 2H, 3H, zero padded."""
    out = jnp.zeros((in_lane, G_pad), jnp.float32)
    out = out.at[:in_size, :4 * H].set(jnp.transpose(w))
    return out.astype(jnp.bfloat16)


def _pack_gate_bias(b, H, G_pad):
    """(4H,) -> (1, G_pad) f32, gates packed at lane offsets 0, H, 2H, 3H."""
    return jnp.zeros((1, G_pad), jnp.float32).at[0, :4 * H].set(b)


def init_params(key, input_size, hidden_size, output_size, num_layers):
    """Deterministic parameter init with PyTorch-compatible shapes."""
    params = {"lstm": [], "head": None}
    bound = 1.0 / jnp.sqrt(jnp.float32(hidden_size))
    in_sz = input_size
    for _ in range(num_layers):
        key, k1, k2, k3, k4 = jax.random.split(key, 5)
        w_ih = jax.random.uniform(k1, (4 * hidden_size, in_sz), jnp.float32, -bound, bound)
        w_hh = jax.random.uniform(k2, (4 * hidden_size, hidden_size), jnp.float32, -bound, bound)
        b_ih = jax.random.uniform(k3, (4 * hidden_size,), jnp.float32, -bound, bound)
        b_hh = jax.random.uniform(k4, (4 * hidden_size,), jnp.float32, -bound, bound)
        params["lstm"].append((w_ih, w_hh, b_ih, b_hh))
        in_sz = hidden_size
    key, k1, k2 = jax.random.split(key, 3)
    w_head = jax.random.uniform(k1, (output_size, hidden_size), jnp.float32, -bound, bound)
    b_head = jax.random.uniform(k2, (output_size,), jnp.float32, -bound, bound)
    params["head"] = (w_head, b_head)
    return params


def stateless_lstm_forward(x, params, *, hidden_size, t_chunk=8):
    """x: (B, T, I) float32 -> (B, T, O) float32 (sigmoid activated)."""
    B, T, I = x.shape
    num_layers = len(params["lstm"])
    w_head, b_head = params["head"]
    O = w_head.shape[0]
    H = hidden_size

    # TPU layout: batch -> sublane multiple (8); feature dims -> lane multiples
    # (128).  Gates are packed into 4H lanes (padded to G_pad), not 4*H_lane.
    B_block = 8
    B_pad = _round_up(B, B_block)
    T_chunk = min(t_chunk, T)
    T_pad = _round_up(T, T_chunk)
    I_lane = _round_up(I, 128)
    H_lane = _round_up(H, 128)
    G_pad = _round_up(4 * H, 128)
    O_pad = _round_up(O, 128)

    # Time-major, padded, bf16 input (matmul operand).
    x_tm = jnp.transpose(x, (1, 0, 2))
    x_tm = jnp.pad(x_tm, ((0, T_pad - T), (0, B_pad - B), (0, I_lane - I)))
    x_tm = x_tm.astype(jnp.bfloat16)

    inputs = [x_tm]
    in_size, in_lane = I, I_lane
    for (w_ih, w_hh, b_ih, b_hh) in params["lstm"]:
        inputs.append(_pack_gate_weight(w_ih, in_size, in_lane, H, G_pad))  # (in_lane, G_pad) bf16
        inputs.append(_pack_gate_weight(w_hh, H, H_lane, H, G_pad))         # (H_lane, G_pad) bf16
        inputs.append(_pack_gate_bias(b_ih + b_hh, H, G_pad))               # (1, G_pad) f32
        in_size, in_lane = H, H_lane
    w_head_p = jnp.zeros((H_lane, O_pad), jnp.float32).at[:H, :O].set(
        jnp.transpose(w_head)).astype(jnp.bfloat16)
    b_head_p = jnp.zeros((1, O_pad), jnp.float32).at[0, :O].set(b_head)
    inputs += [w_head_p, b_head_p]

    # BlockSpecs: x / out pipelined per (batch block, time chunk); weights are
    # resident (constant block index -> no re-DMA across grid steps).
    in_specs = [pl.BlockSpec((T_chunk, B_block, I_lane), lambda b, t: (t, b, 0))]
    for arr in inputs[1:]:
        in_specs.append(
            pl.BlockSpec(arr.shape, lambda b, t, nd=arr.ndim: (0,) * nd))
    out_spec = pl.BlockSpec((T_chunk, B_block, O_pad), lambda b, t: (t, b, 0))

    scratch_shapes = [
        pltpu.VMEM((T_chunk, B_block, G_pad), jnp.float32),       # chunk gate pre-acts
        pltpu.VMEM((T_chunk, B_block, H_lane), jnp.float32),      # per-layer hidden seq
        pltpu.VMEM((num_layers, B_block, H_lane), jnp.float32),   # carried h per layer
        pltpu.VMEM((num_layers, B_block, H_lane), jnp.float32),   # carried c per layer
    ]

    # Explicit VMEM budget with headroom (matters on v5e 16 MiB / v7x 64 MiB).
    weight_bytes = sum(int(a.size) * a.dtype.itemsize for a in inputs[1:])
    block_bytes = 2 * (T_chunk * B_block * I_lane * 2 + T_chunk * B_block * O_pad * 4)
    scratch_bytes = 4 * (T_chunk * B_block * (G_pad + H_lane)
                         + 2 * num_layers * B_block * H_lane)
    vmem_limit = int(max(8 * 1024 * 1024,
                         4 * (weight_bytes + block_bytes + scratch_bytes)))

    kernel = functools.partial(
        _lstm_head_kernel,
        num_layers=num_layers, T_chunk=T_chunk, B_block=B_block,
        H=H, H_lane=H_lane, G_pad=G_pad, O_pad=O_pad,
    )
    out_tm = pl.pallas_call(
        kernel,
        out_shape=jax.ShapeDtypeStruct((T_pad, B_pad, O_pad), jnp.float32),
        grid=(B_pad // B_block, T_pad // T_chunk),
        in_specs=in_specs,
        out_specs=out_spec,
        scratch_shapes=scratch_shapes,
        compiler_params=pltpu.CompilerParams(
            dimension_semantics=("parallel", "arbitrary"),
            vmem_limit_bytes=vmem_limit),
    )(*inputs)

    return jnp.transpose(out_tm[:T, :B, :O], (1, 0, 2))  # back to (B, T, O)


def reference_forward(x, params):
    """Pure-JAX f32 reference replicating torch.nn.LSTM + Linear + sigmoid."""
    B, T, _ = x.shape
    h_seq = x
    for (w_ih, w_hh, b_ih, b_hh) in params["lstm"]:
        H = w_hh.shape[1]
        h = jnp.zeros((B, H), jnp.float32)
        c = jnp.zeros((B, H), jnp.float32)
        outs = []
        for t in range(T):
            gates = h_seq[:, t] @ w_ih.T + h @ w_hh.T + b_ih + b_hh
            i_g = jax.nn.sigmoid(gates[:, :H])
            f_g = jax.nn.sigmoid(gates[:, H:2 * H])
            g_g = jnp.tanh(gates[:, 2 * H:3 * H])
            o_g = jax.nn.sigmoid(gates[:, 3 * H:])
            c = f_g * c + i_g * g_g
            h = o_g * jnp.tanh(c)
            outs.append(h)
        h_seq = jnp.stack(outs, axis=1)
    w_head, b_head = params["head"]
    return jax.nn.sigmoid(h_seq @ w_head.T + b_head)


if __name__ == "__main__":
    # Small, LSTM-consistent shapes: batch=2, seq=8, input=4, hidden=32, out=4, layers=2.
    batch, seq = 2, 8
    input_size, hidden_size, output_size, num_layers = 4, 32, 4, 2

    key = jax.random.PRNGKey(0)
    key, kx = jax.random.split(key)
    x = jax.random.normal(kx, (batch, seq, input_size), jnp.float32)
    params = init_params(key, input_size, hidden_size, output_size, num_layers)

    out = stateless_lstm_forward(x, params, hidden_size=hidden_size)
    out = jax.block_until_ready(out)

    ref = reference_forward(x, params)
    assert out.shape == (batch, seq, output_size)
    # bf16 MXU operands (f32 accumulate / f32 elementwise) vs f32 reference:
    # 1e-2 tolerance still flags any real bug (outputs are O(0.5)).
    assert jnp.allclose(out, ref, atol=1e-2, rtol=1e-2), "mismatch vs reference"

    print("KERNEL_OK")
</pallas_src>

<mosaic_0001>
module attributes {stable_mosaic.version = 11 : i64} {
  func.func @_lstm_head_kernel(%arg0: i32, %arg1: i32, %arg2: memref<8x8x128xbf16, #tpu.memory_space<vmem>>, %arg3: memref<128x128xbf16, #tpu.memory_space<vmem>>, %arg4: memref<128x128xbf16, #tpu.memory_space<vmem>>, %arg5: memref<1x128xf32, #tpu.memory_space<vmem>>, %arg6: memref<128x128xbf16, #tpu.memory_space<vmem>>, %arg7: memref<128x128xbf16, #tpu.memory_space<vmem>>, %arg8: memref<1x128xf32, #tpu.memory_space<vmem>>, %arg9: memref<128x128xbf16, #tpu.memory_space<vmem>>, %arg10: memref<1x128xf32, #tpu.memory_space<vmem>>, %arg11: memref<8x8x128xf32, #tpu.memory_space<vmem>>, %arg12: memref<8x8x128xf32, #tpu.memory_space<vmem>>, %arg13: memref<8x8x128xf32, #tpu.memory_space<vmem>>, %arg14: memref<2x8x128xf32, #tpu.memory_space<vmem>>, %arg15: memref<2x8x128xf32, #tpu.memory_space<vmem>>) attributes {dimension_semantics = [#tpu.dimension_semantics<parallel>, #tpu.dimension_semantics<arbitrary>], iteration_bounds = array<i64: 1, 1>, scalar_prefetch = 0 : i64, scratch_operands = 4 : i64, tpu.core_type = #tpu.core_type<tc>, window_params = [{transform_indices = @transform_0, window_bounds = array<i64: 8, 8, 128>}, {pipeline_mode = #tpu.pipeline_mode<synchronous>, transform_indices = @transform_1, window_bounds = array<i64: 128, 128>}, {pipeline_mode = #tpu.pipeline_mode<synchronous>, transform_indices = @transform_2, window_bounds = array<i64: 128, 128>}, {pipeline_mode = #tpu.pipeline_mode<synchronous>, transform_indices = @transform_3, window_bounds = array<i64: 1, 128>}, {pipeline_mode = #tpu.pipeline_mode<synchronous>, transform_indices = @transform_4, window_bounds = array<i64: 128, 128>}, {pipeline_mode = #tpu.pipeline_mode<synchronous>, transform_indices = @transform_5, window_bounds = array<i64: 128, 128>}, {pipeline_mode = #tpu.pipeline_mode<synchronous>, transform_indices = @transform_6, window_bounds = array<i64: 1, 128>}, {pipeline_mode = #tpu.pipeline_mode<synchronous>, transform_indices = @transform_7, window_bounds = array<i64: 128, 128>}, {pipeline_mode = #tpu.pipeline_mode<synchronous>, transform_indices = @transform_8, window_bounds = array<i64: 1, 128>}, {transform_indices = @transform_9, window_bounds = array<i64: 8, 8, 128>}]} {
    %c0_i32 = arith.constant 0 : i32
    %0 = arith.cmpi eq, %arg1, %c0_i32 : i32
    %1 = arith.extui %0 : i1 to i32
    %c0_i32_0 = arith.constant 0 : i32
    %2 = arith.cmpi ne, %1, %c0_i32_0 : i32
    scf.if %2 {
      %cst_306 = arith.constant 0.000000e+00 : f32
      %610 = vector.broadcast %cst_306 : f32 to vector<2x8x128xf32>
      %c0_307 = arith.constant 0 : index
      %c0_308 = arith.constant 0 : index
      %c0_309 = arith.constant 0 : index
      %611 = vector.load %arg14[%c0_307, %c0_308, %c0_309] : memref<2x8x128xf32, #tpu.memory_space<vmem>>, vector<2x8x128xf32>
      tpu.vector_store %arg14[%c0_307, %c0_308, %c0_309], %610 {strides = array<i32>} : memref<2x8x128xf32, #tpu.memory_space<vmem>>, vector<2x8x128xf32>,
      %cst_310 = arith.constant 0.000000e+00 : f32
      %612 = vector.broadcast %cst_310 : f32 to vector<2x8x128xf32>
      %c0_311 = arith.constant 0 : index
      %c0_312 = arith.constant 0 : index
      %c0_313 = arith.constant 0 : index
      %613 = vector.load %arg15[%c0_311, %c0_312, %c0_313] : memref<2x8x128xf32, #tpu.memory_space<vmem>>, vector<2x8x128xf32>
      tpu.vector_store %arg15[%c0_311, %c0_312, %c0_313], %612 {strides = array<i32>} : memref<2x8x128xf32, #tpu.memory_space<vmem>>, vector<2x8x128xf32>,
    } else {
    }
    %3 = tpu.iota {dimensions = array<i32: 1>} : vector<8x128xi32>
    %c64_i32 = arith.constant 64 : i32
    %4 = vector.broadcast %c64_i32 : i32 to vector<8x128xi32>
    %5 = arith.cmpi sge, %3, %4 : vector<8x128xi32>
    %c96_i32 = arith.constant 96 : i32
    %6 = vector.broadcast %c96_i32 : i32 to vector<8x128xi32>
    %7 = arith.cmpi slt, %3, %6 : vector<8x128xi32>
    %8 = arith.andi %5, %7 : vector<8x128xi1>
    %9 = tpu.iota {dimensions = array<i32: 1>} : vector<8x128xi32>
    %c32_i32 = arith.constant 32 : i32
    %10 = vector.broadcast %c32_i32 : i32 to vector<8x128xi32>
    %11 = arith.cmpi slt, %9, %10 : vector<8x128xi32>
    %c0 = arith.constant 0 : index
    %c0_1 = arith.constant 0 : index
    %c0_2 = arith.constant 0 : index
    %12 = vector.load %arg2[%c0, %c0_1, %c0_2] : memref<8x8x128xbf16, #tpu.memory_space<vmem>>, vector<8x8x128xbf16>
    %13 = vector.shape_cast %12 : vector<8x8x128xbf16> to vector<64x128xbf16>
    %c0_3 = arith.constant 0 : index
    %c0_4 = arith.constant 0 : index
    %14 = vector.load %arg3[%c0_3, %c0_4] : memref<128x128xbf16, #tpu.memory_space<vmem>>, vector<128x128xbf16>
    %cst = arith.constant dense<0.000000e+00> : vector<64x128xf32>
    %15 = tpu.matmul %13, %14, %cst {dimension_numbers = #tpu.dot_dimension_numbers<[1], [0], [0], [1], [0, 0, 1, 1], [], []>} : vector<64x128xbf16>, vector<128x128xbf16>, vector<64x128xf32> -> vector<64x128xf32>
    %c0_5 = arith.constant 0 : index
    %c0_6 = arith.constant 0 : index
    %16 = vector.load %arg5[%c0_5, %c0_6] : memref<1x128xf32, #tpu.memory_space<vmem>>, vector<1x128xf32>
    %17 = vector.broadcast %16 : vector<1x128xf32> to vector<64x128xf32>
    %18 = arith.addf %15, %17 : vector<64x128xf32>
    %19 = vector.shape_cast %18 : vector<64x128xf32> to vector<8x8x128xf32>
    %c0_7 = arith.constant 0 : index
    %c0_8 = arith.constant 0 : index
    %c0_9 = arith.constant 0 : index
    %20 = vector.load %arg12[%c0_7, %c0_8, %c0_9] : memref<8x8x128xf32, #tpu.memory_space<vmem>>, vector<8x8x128xf32>
    tpu.vector_store %arg12[%c0_7, %c0_8, %c0_9], %19 {strides = array<i32>} : memref<8x8x128xf32, #tpu.memory_space<vmem>>, vector<8x8x128xf32>,
    %c0_10 = arith.constant 0 : index
    %c0_11 = arith.constant 0 : index
    %c0_12 = arith.constant 0 : index
    %21 = vector.load %arg14[%c0_10, %c0_11, %c0_12] : memref<2x8x128xf32, #tpu.memory_space<vmem>>, vector<1x8x128xf32>
    %22 = vector.shape_cast %21 : vector<1x8x128xf32> to vector<8x128xf32>
    %c0_13 = arith.constant 0 : index
    %c0_14 = arith.constant 0 : index
    %c0_15 = arith.constant 0 : index
    %23 = vector.load %arg15[%c0_13, %c0_14, %c0_15] : memref<2x8x128xf32, #tpu.memory_space<vmem>>, vector<1x8x128xf32>
    %24 = vector.shape_cast %23 : vector<1x8x128xf32> to vector<8x128xf32>
    %c0_i32_16 = arith.constant 0 : i32
    %25 = arith.index_cast %c0_i32_16 : i32 to index
    %c0_17 = arith.constant 0 : index
    %c0_18 = arith.constant 0 : index
    %26 = vector.load %arg12[%25, %c0_17, %c0_18] : memref<8x8x128xf32, #tpu.memory_space<vmem>>, vector<1x8x128xf32>
    %27 = vector.shape_cast %26 : vector<1x8x128xf32> to vector<8x128xf32>
    %28 = arith.truncf %22 : vector<8x128xf32> to vector<8x128xbf16>
    %c0_19 = arith.constant 0 : index
    %c0_20 = arith.constant 0 : index
    %29 = vector.load %arg4[%c0_19, %c0_20] : memref<128x128xbf16, #tpu.memory_space<vmem>>, vector<128x128xbf16>
    %cst_21 = arith.constant dense<0.000000e+00> : vector<8x128xf32>
    %30 = tpu.matmul %28, %29, %cst_21 {dimension_numbers = #tpu.dot_dimension_numbers<[1], [0], [0], [1], [0, 0, 1, 1], [], []>} : vector<8x128xbf16>, vector<128x128xbf16>, vector<8x128xf32> -> vector<8x128xf32>
    %31 = arith.addf %27, %30 : vector<8x128xf32>
    %cst_22 = arith.constant 2.000000e+00 : f32
    %32 = vector.broadcast %cst_22 : f32 to vector<8x128xf32>
    %33 = arith.mulf %32, %31 : vector<8x128xf32>
    %34 = arith.select %8, %33, %31 : vector<8x128xi1>, vector<8x128xf32>
    %35 = arith.negf %34 : vector<8x128xf32>
    %36 = math.exp %35 : vector<8x128xf32>
    %cst_23 = arith.constant 1.000000e+00 : f32
    %37 = vector.broadcast %cst_23 : f32 to vector<8x128xf32>
    %38 = arith.addf %37, %36 : vector<8x128xf32>
    %39 = arith.divf %37, %38 : vector<8x128xf32>
    %cst_24 = arith.constant 2.000000e+00 : f32
    %40 = vector.broadcast %cst_24 : f32 to vector<8x128xf32>
    %41 = arith.mulf %40, %39 : vector<8x128xf32>
    %cst_25 = arith.constant 1.000000e+00 : f32
    %42 = vector.broadcast %cst_25 : f32 to vector<8x128xf32>
    %43 = arith.subf %41, %42 : vector<8x128xf32>
    %44 = arith.select %8, %43, %39 : vector<8x128xi1>, vector<8x128xf32>
    %c96_i32_26 = arith.constant 96 : i32
    %45 = tpu.dynamic_rotate %44 by %c96_i32_26 dim 1 : vector<8x128xf32>, i32 -> vector<8x128xf32>
    %c64_i32_27 = arith.constant 64 : i32
    %46 = tpu.dynamic_rotate %44 by %c64_i32_27 dim 1 : vector<8x128xf32>, i32 -> vector<8x128xf32>
    %c32_i32_28 = arith.constant 32 : i32
    %47 = tpu.dynamic_rotate %44 by %c32_i32_28 dim 1 : vector<8x128xf32>, i32 -> vector<8x128xf32>
    %48 = arith.mulf %45, %24 : vector<8x128xf32>
    %49 = arith.mulf %44, %46 : vector<8x128xf32>
    %50 = arith.addf %48, %49 : vector<8x128xf32>
    %cst_29 = arith.constant 0.000000e+00 : f32
    %51 = vector.broadcast %cst_29 : f32 to vector<8x128xf32>
    %52 = arith.select %11, %50, %51 : vector<8x128xi1>, vector<8x128xf32>
    %53 = math.tanh %52 : vector<8x128xf32>
    %54 = arith.mulf %47, %53 : vector<8x128xf32>
    %55 = arith.index_cast %c0_i32_16 : i32 to index
    %c0_30 = arith.constant 0 : index
    %c0_31 = arith.constant 0 : index
    %56 = vector.load %arg13[%55, %c0_30, %c0_31] : memref<8x8x128xf32, #tpu.memory_space<vmem>>, vector<1x8x128xf32>
    %57 = vector.shape_cast %56 : vector<1x8x128xf32> to vector<8x128xf32>
    %58 = vector.shape_cast %54 : vector<8x128xf32> to vector<1x8x128xf32>
    tpu.vector_store %arg13[%55, %c0_30, %c0_31], %58 {strides = array<i32>} : memref<8x8x128xf32, #tpu.memory_space<vmem>>, vector<1x8x128xf32>,
    %c1_i32 = arith.constant 1 : i32
    %59 = arith.index_cast %c1_i32 : i32 to index
    %c0_32 = arith.constant 0 : index
    %c0_33 = arith.constant 0 : index
    %60 = vector.load %arg12[%59, %c0_32, %c0_33] : memref<8x8x128xf32, #tpu.memory_space<vmem>>, vector<1x8x128xf32>
    %61 = vector.shape_cast %60 : vector<1x8x128xf32> to vector<8x128xf32>
    %62 = arith.truncf %54 : vector<8x128xf32> to vector<8x128xbf16>
    %c0_34 = arith.constant 0 : index
    %c0_35 = arith.constant 0 : index
    %63 = vector.load %arg4[%c0_34, %c0_35] : memref<128x128xbf16, #tpu.memory_space<vmem>>, vector<128x128xbf16>
    %cst_36 = arith.constant dense<0.000000e+00> : vector<8x128xf32>
    %64 = tpu.matmul %62, %63, %cst_36 {dimension_numbers = #tpu.dot_dimension_numbers<[1], [0], [0], [1], [0, 0, 1, 1], [], []>} : vector<8x128xbf16>, vector<128x128xbf16>, vector<8x128xf32> -> vector<8x128xf32>
    %65 = arith.addf %61, %64 : vector<8x128xf32>
    %cst_37 = arith.constant 2.000000e+00 : f32
    %66 = vector.broadcast %cst_37 : f32 to vector<8x128xf32>
    %67 = arith.mulf %66, %65 : vector<8x128xf32>
    %68 = arith.select %8, %67, %65 : vector<8x128xi1>, vector<8x128xf32>
    %69 = arith.negf %68 : vector<8x128xf32>
    %70 = math.exp %69 : vector<8x128xf32>
    %cst_38 = arith.constant 1.000000e+00 : f32
    %71 = vector.broadcast %cst_38 : f32 to vector<8x128xf32>
    %72 = arith.addf %71, %70 : vector<8x128xf32>
    %73 = arith.divf %71, %72 : vector<8x128xf32>
    %cst_39 = arith.constant 2.000000e+00 : f32
    %74 = vector.broadcast %cst_39 : f32 to vector<8x128xf32>
    %75 = arith.mulf %74, %73 : vector<8x128xf32>
    %cst_40 = arith.constant 1.000000e+00 : f32
    %76 = vector.broadcast %cst_40 : f32 to vector<8x128xf32>
    %77 = arith.subf %75, %76 : vector<8x128xf32>
    %78 = arith.select %8, %77, %73 : vector<8x128xi1>, vector<8x128xf32>
    %c96_i32_41 = arith.constant 96 : i32
    %79 = tpu.dynamic_rotate %78 by %c96_i32_41 dim 1 : vector<8x128xf32>, i32 -> vector<8x128xf32>
    %c64_i32_42 = arith.constant 64 : i32
    %80 = tpu.dynamic_rotate %78 by %c64_i32_42 dim 1 : vector<8x128xf32>, i32 -> vector<8x128xf32>
    %c32_i32_43 = arith.constant 32 : i32
    %81 = tpu.dynamic_rotate %78 by %c32_i32_43 dim 1 : vector<8x128xf32>, i32 -> vector<8x128xf32>
    %82 = arith.mulf %79, %52 : vector<8x128xf32>
    %83 = arith.mulf %78, %80 : vector<8x128xf32>
    %84 = arith.addf %82, %83 : vector<8x128xf32>
    %cst_44 = arith.constant 0.000000e+00 : f32
    %85 = vector.broadcast %cst_44 : f32 to vector<8x128xf32>
    %86 = arith.select %11, %84, %85 : vector<8x128xi1>, vector<8x128xf32>
    %87 = math.tanh %86 : vector<8x128xf32>
    %88 = arith.mulf %81, %87 : vector<8x128xf32>
    %89 = arith.index_cast %c1_i32 : i32 to index
    %c0_45 = arith.constant 0 : index
    %c0_46 = arith.constant 0 : index
    %90 = vector.load %arg13[%89, %c0_45, %c0_46] : memref<8x8x128xf32, #tpu.memory_space<vmem>>, vector<1x8x128xf32>
    %91 = vector.shape_cast %90 : vector<1x8x128xf32> to vector<8x128xf32>
    %92 = vector.shape_cast %88 : vector<8x128xf32> to vector<1x8x128xf32>
    tpu.vector_store %arg13[%89, %c0_45, %c0_46], %92 {strides = array<i32>} : memref<8x8x128xf32, #tpu.memory_space<vmem>>, vector<1x8x128xf32>,
    %c2_i32 = arith.constant 2 : i32
    %93 = arith.index_cast %c2_i32 : i32 to index
    %c0_47 = arith.constant 0 : index
    %c0_48 = arith.constant 0 : index
    %94 = vector.load %arg12[%93, %c0_47, %c0_48] : memref<8x8x128xf32, #tpu.memory_space<vmem>>, vector<1x8x128xf32>
    %95 = vector.shape_cast %94 : vector<1x8x128xf32> to vector<8x128xf32>
    %96 = arith.truncf %88 : vector<8x128xf32> to vector<8x128xbf16>
    %c0_49 = arith.constant 0 : index
    %c0_50 = arith.constant 0 : index
    %97 = vector.load %arg4[%c0_49, %c0_50] : memref<128x128xbf16, #tpu.memory_space<vmem>>, vector<128x128xbf16>
    %cst_51 = arith.constant dense<0.000000e+00> : vector<8x128xf32>
    %98 = tpu.matmul %96, %97, %cst_51 {dimension_numbers = #tpu.dot_dimension_numbers<[1], [0], [0], [1], [0, 0, 1, 1], [], []>} : vector<8x128xbf16>, vector<128x128xbf16>, vector<8x128xf32> -> vector<8x128xf32>
    %99 = arith.addf %95, %98 : vector<8x128xf32>
    %cst_52 = arith.constant 2.000000e+00 : f32
    %100 = vector.broadcast %cst_52 : f32 to vector<8x128xf32>
    %101 = arith.mulf %100, %99 : vector<8x128xf32>
    %102 = arith.select %8, %101, %99 : vector<8x128xi1>, vector<8x128xf32>
    %103 = arith.negf %102 : vector<8x128xf32>
    %104 = math.exp %103 : vector<8x128xf32>
    %cst_53 = arith.constant 1.000000e+00 : f32
    %105 = vector.broadcast %cst_53 : f32 to vector<8x128xf32>
    %106 = arith.addf %105, %104 : vector<8x128xf32>
    %107 = arith.divf %105, %106 : vector<8x128xf32>
    %cst_54 = arith.constant 2.000000e+00 : f32
    %108 = vector.broadcast %cst_54 : f32 to vector<8x128xf32>
    %109 = arith.mulf %108, %107 : vector<8x128xf32>
    %cst_55 = arith.constant 1.000000e+00 : f32
    %110 = vector.broadcast %cst_55 : f32 to vector<8x128xf32>
    %111 = arith.subf %109, %110 : vector<8x128xf32>
    %112 = arith.select %8, %111, %107 : vector<8x128xi1>, vector<8x128xf32>
    %c96_i32_56 = arith.constant 96 : i32
    %113 = tpu.dynamic_rotate %112 by %c96_i32_56 dim 1 : vector<8x128xf32>, i32 -> vector<8x128xf32>
    %c64_i32_57 = arith.constant 64 : i32
    %114 = tpu.dynamic_rotate %112 by %c64_i32_57 dim 1 : vector<8x128xf32>, i32 -> vector<8x128xf32>
    %c32_i32_58 = arith.constant 32 : i32
    %115 = tpu.dynamic_rotate %112 by %c32_i32_58 dim 1 : vector<8x128xf32>, i32 -> vector<8x128xf32>
    %116 = arith.mulf %113, %86 : vector<8x128xf32>
    %117 = arith.mulf %112, %114 : vector<8x128xf32>
    %118 = arith.addf %116, %117 : vector<8x128xf32>
    %cst_59 = arith.constant 0.000000e+00 : f32
    %119 = vector.broadcast %cst_59 : f32 to vector<8x128xf32>
    %120 = arith.select %11, %118, %119 : vector<8x128xi1>, vector<8x128xf32>
    %121 = math.tanh %120 : vector<8x128xf32>
    %122 = arith.mulf %115, %121 : vector<8x128xf32>
    %123 = arith.index_cast %c2_i32 : i32 to index
    %c0_60 = arith.constant 0 : index
    %c0_61 = arith.constant 0 : index
    %124 = vector.load %arg13[%123, %c0_60, %c0_61] : memref<8x8x128xf32, #tpu.memory_space<vmem>>, vector<1x8x128xf32>
    %125 = vector.shape_cast %124 : vector<1x8x128xf32> to vector<8x128xf32>
    %126 = vector.shape_cast %122 : vector<8x128xf32> to vector<1x8x128xf32>
    tpu.vector_store %arg13[%123, %c0_60, %c0_61], %126 {strides = array<i32>} : memref<8x8x128xf32, #tpu.memory_space<vmem>>, vector<1x8x128xf32>,
    %c3_i32 = arith.constant 3 : i32
    %127 = arith.index_cast %c3_i32 : i32 to index
    %c0_62 = arith.constant 0 : index
    %c0_63 = arith.constant 0 : index
    %128 = vector.load %arg12[%127, %c0_62, %c0_63] : memref<8x8x128xf32, #tpu.memory_space<vmem>>, vector<1x8x128xf32>
    %129 = vector.shape_cast %128 : vector<1x8x128xf32> to vector<8x128xf32>
    %130 = arith.truncf %122 : vector<8x128xf32> to vector<8x128xbf16>
    %c0_64 = arith.constant 0 : index
    %c0_65 = arith.constant 0 : index
    %131 = vector.load %arg4[%c0_64, %c0_65] : memref<128x128xbf16, #tpu.memory_space<vmem>>, vector<128x128xbf16>
    %cst_66 = arith.constant dense<0.000000e+00> : vector<8x128xf32>
    %132 = tpu.matmul %130, %131, %cst_66 {dimension_numbers = #tpu.dot_dimension_numbers<[1], [0], [0], [1], [0, 0, 1, 1], [], []>} : vector<8x128xbf16>, vector<128x128xbf16>, vector<8x128xf32> -> vector<8x128xf32>
    %133 = arith.addf %129, %132 : vector<8x128xf32>
    %cst_67 = arith.constant 2.000000e+00 : f32
    %134 = vector.broadcast %cst_67 : f32 to vector<8x128xf32>
    %135 = arith.mulf %134, %133 : vector<8x128xf32>
    %136 = arith.select %8, %135, %133 : vector<8x128xi1>, vector<8x128xf32>
    %137 = arith.negf %136 : vector<8x128xf32>
    %138 = math.exp %137 : vector<8x128xf32>
    %cst_68 = arith.constant 1.000000e+00 : f32
    %139 = vector.broadcast %cst_68 : f32 to vector<8x128xf32>
    %140 = arith.addf %139, %138 : vector<8x128xf32>
    %141 = arith.divf %139, %140 : vector<8x128xf32>
    %cst_69 = arith.constant 2.000000e+00 : f32
    %142 = vector.broadcast %cst_69 : f32 to vector<8x128xf32>
    %143 = arith.mulf %142, %141 : vector<8x128xf32>
    %cst_70 = arith.constant 1.000000e+00 : f32
    %144 = vector.broadcast %cst_70 : f32 to vector<8x128xf32>
    %145 = arith.subf %143, %144 : vector<8x128xf32>
    %146 = arith.select %8, %145, %141 : vector<8x128xi1>, vector<8x128xf32>
    %c96_i32_71 = arith.constant 96 : i32
    %147 = tpu.dynamic_rotate %146 by %c96_i32_71 dim 1 : vector<8x128xf32>, i32 -> vector<8x128xf32>
    %c64_i32_72 = arith.constant 64 : i32
    %148 = tpu.dynamic_rotate %146 by %c64_i32_72 dim 1 : vector<8x128xf32>, i32 -> vector<8x128xf32>
    %c32_i32_73 = arith.constant 32 : i32
    %149 = tpu.dynamic_rotate %146 by %c32_i32_73 dim 1 : vector<8x128xf32>, i32 -> vector<8x128xf32>
    %150 = arith.mulf %147, %120 : vector<8x128xf32>
    %151 = arith.mulf %146, %148 : vector<8x128xf32>
    %152 = arith.addf %150, %151 : vector<8x128xf32>
    %cst_74 = arith.constant 0.000000e+00 : f32
    %153 = vector.broadcast %cst_74 : f32 to vector<8x128xf32>
    %154 = arith.select %11, %152, %153 : vector<8x128xi1>, vector<8x128xf32>
    %155 = math.tanh %154 : vector<8x128xf32>
    %156 = arith.mulf %149, %155 : vector<8x128xf32>
    %157 = arith.index_cast %c3_i32 : i32 to index
    %c0_75 = arith.constant 0 : index
    %c0_76 = arith.constant 0 : index
    %158 = vector.load %arg13[%157, %c0_75, %c0_76] : memref<8x8x128xf32, #tpu.memory_space<vmem>>, vector<1x8x128xf32>
    %159 = vector.shape_cast %158 : vector<1x8x128xf32> to vector<8x128xf32>
    %160 = vector.shape_cast %156 : vector<8x128xf32> to vector<1x8x128xf32>
    tpu.vector_store %arg13[%157, %c0_75, %c0_76], %160 {strides = array<i32>} : memref<8x8x128xf32, #tpu.memory_space<vmem>>, vector<1x8x128xf32>,
    %c4_i32 = arith.constant 4 : i32
    %161 = arith.index_cast %c4_i32 : i32 to index
    %c0_77 = arith.constant 0 : index
    %c0_78 = arith.constant 0 : index
    %162 = vector.load %arg12[%161, %c0_77, %c0_78] : memref<8x8x128xf32, #tpu.memory_space<vmem>>, vector<1x8x128xf32>
    %163 = vector.shape_cast %162 : vector<1x8x128xf32> to vector<8x128xf32>
    %164 = arith.truncf %156 : vector<8x128xf32> to vector<8x128xbf16>
    %c0_79 = arith.constant 0 : index
    %c0_80 = arith.constant 0 : index
    %165 = vector.load %arg4[%c0_79, %c0_80] : memref<128x128xbf16, #tpu.memory_space<vmem>>, vector<128x128xbf16>
    %cst_81 = arith.constant dense<0.000000e+00> : vector<8x128xf32>
    %166 = tpu.matmul %164, %165, %cst_81 {dimension_numbers = #tpu.dot_dimension_numbers<[1], [0], [0], [1], [0, 0, 1, 1], [], []>} : vector<8x128xbf16>, vector<128x128xbf16>, vector<8x128xf32> -> vector<8x128xf32>
    %167 = arith.addf %163, %166 : vector<8x128xf32>
    %cst_82 = arith.constant 2.000000e+00 : f32
    %168 = vector.broadcast %cst_82 : f32 to vector<8x128xf32>
    %169 = arith.mulf %168, %167 : vector<8x128xf32>
    %170 = arith.select %8, %169, %167 : vector<8x128xi1>, vector<8x128xf32>
    %171 = arith.negf %170 : vector<8x128xf32>
    %172 = math.exp %171 : vector<8x128xf32>
    %cst_83 = arith.constant 1.000000e+00 : f32
    %173 = vector.broadcast %cst_83 : f32 to vector<8x128xf32>
    %174 = arith.addf %173, %172 : vector<8x128xf32>
    %175 = arith.divf %173, %174 : vector<8x128xf32>
    %cst_84 = arith.constant 2.000000e+00 : f32
    %176 = vector.broadcast %cst_84 : f32 to vector<8x128xf32>
    %177 = arith.mulf %176, %175 : vector<8x128xf32>
    %cst_85 = arith.constant 1.000000e+00 : f32
    %178 = vector.broadcast %cst_85 : f32 to vector<8x128xf32>
    %179 = arith.subf %177, %178 : vector<8x128xf32>
    %180 = arith.select %8, %179, %175 : vector<8x128xi1>, vector<8x128xf32>
    %c96_i32_86 = arith.constant 96 : i32
    %181 = tpu.dynamic_rotate %180 by %c96_i32_86 dim 1 : vector<8x128xf32>, i32 -> vector<8x128xf32>
    %c64_i32_87 = arith.constant 64 : i32
    %182 = tpu.dynamic_rotate %180 by %c64_i32_87 dim 1 : vector<8x128xf32>, i32 -> vector<8x128xf32>
    %c32_i32_88 = arith.constant 32 : i32
    %183 = tpu.dynamic_rotate %180 by %c32_i32_88 dim 1 : vector<8x128xf32>, i32 -> vector<8x128xf32>
    %184 = arith.mulf %181, %154 : vector<8x128xf32>
    %185 = arith.mulf %180, %182 : vector<8x128xf32>
    %186 = arith.addf %184, %185 : vector<8x128xf32>
    %cst_89 = arith.constant 0.000000e+00 : f32
    %187 = vector.broadcast %cst_89 : f32 to vector<8x128xf32>
    %188 = arith.select %11, %186, %187 : vector<8x128xi1>, vector<8x128xf32>
    %189 = math.tanh %188 : vector<8x128xf32>
    %190 = arith.mulf %183, %189 : vector<8x128xf32>
    %191 = arith.index_cast %c4_i32 : i32 to index
    %c0_90 = arith.constant 0 : index
    %c0_91 = arith.constant 0 : index
    %192 = vector.load %arg13[%191, %c0_90, %c0_91] : memref<8x8x128xf32, #tpu.memory_space<vmem>>, vector<1x8x128xf32>
    %193 = vector.shape_cast %192 : vector<1x8x128xf32> to vector<8x128xf32>
    %194 = vector.shape_cast %190 : vector<8x128xf32> to vector<1x8x128xf32>
    tpu.vector_store %arg13[%191, %c0_90, %c0_91], %194 {strides = array<i32>} : memref<8x8x128xf32, #tpu.memory_space<vmem>>, vector<1x8x128xf32>,
    %c5_i32 = arith.constant 5 : i32
    %195 = arith.index_cast %c5_i32 : i32 to index
    %c0_92 = arith.constant 0 : index
    %c0_93 = arith.constant 0 : index
    %196 = vector.load %arg12[%195, %c0_92, %c0_93] : memref<8x8x128xf32, #tpu.memory_space<vmem>>, vector<1x8x128xf32>
    %197 = vector.shape_cast %196 : vector<1x8x128xf32> to vector<8x128xf32>
    %198 = arith.truncf %190 : vector<8x128xf32> to vector<8x128xbf16>
    %c0_94 = arith.constant 0 : index
    %c0_95 = arith.constant 0 : index
    %199 = vector.load %arg4[%c0_94, %c0_95] : memref<128x128xbf16, #tpu.memory_space<vmem>>, vector<128x128xbf16>
    %cst_96 = arith.constant dense<0.000000e+00> : vector<8x128xf32>
    %200 = tpu.matmul %198, %199, %cst_96 {dimension_numbers = #tpu.dot_dimension_numbers<[1], [0], [0], [1], [0, 0, 1, 1], [], []>} : vector<8x128xbf16>, vector<128x128xbf16>, vector<8x128xf32> -> vector<8x128xf32>
    %201 = arith.addf %197, %200 : vector<8x128xf32>
    %cst_97 = arith.constant 2.000000e+00 : f32
    %202 = vector.broadcast %cst_97 : f32 to vector<8x128xf32>
    %203 = arith.mulf %202, %201 : vector<8x128xf32>
    %204 = arith.select %8, %203, %201 : vector<8x128xi1>, vector<8x128xf32>
    %205 = arith.negf %204 : vector<8x128xf32>
    %206 = math.exp %205 : vector<8x128xf32>
    %cst_98 = arith.constant 1.000000e+00 : f32
    %207 = vector.broadcast %cst_98 : f32 to vector<8x128xf32>
    %208 = arith.addf %207, %206 : vector<8x128xf32>
    %209 = arith.divf %207, %208 : vector<8x128xf32>
    %cst_99 = arith.constant 2.000000e+00 : f32
    %210 = vector.broadcast %cst_99 : f32 to vector<8x128xf32>
    %211 = arith.mulf %210, %209 : vector<8x128xf32>
    %cst_100 = arith.constant 1.000000e+00 : f32
    %212 = vector.broadcast %cst_100 : f32 to vector<8x128xf32>
    %213 = arith.subf %211, %212 : vector<8x128xf32>
    %214 = arith.select %8, %213, %209 : vector<8x128xi1>, vector<8x128xf32>
    %c96_i32_101 = arith.constant 96 : i32
    %215 = tpu.dynamic_rotate %214 by %c96_i32_101 dim 1 : vector<8x128xf32>, i32 -> vector<8x128xf32>
    %c64_i32_102 = arith.constant 64 : i32
    %216 = tpu.dynamic_rotate %214 by %c64_i32_102 dim 1 : vector<8x128xf32>, i32 -> vector<8x128xf32>
    %c32_i32_103 = arith.constant 32 : i32
    %217 = tpu.dynamic_rotate %214 by %c32_i32_103 dim 1 : vector<8x128xf32>, i32 -> vector<8x128xf32>
    %218 = arith.mulf %215, %188 : vector<8x128xf32>
    %219 = arith.mulf %214, %216 : vector<8x128xf32>
    %220 = arith.addf %218, %219 : vector<8x128xf32>
    %cst_104 = arith.constant 0.000000e+00 : f32
    %221 = vector.broadcast %cst_104 : f32 to vector<8x128xf32>
    %222 = arith.select %11, %220, %221 : vector<8x128xi1>, vector<8x128xf32>
    %223 = math.tanh %222 : vector<8x128xf32>
    %224 = arith.mulf %217, %223 : vector<8x128xf32>
    %225 = arith.index_cast %c5_i32 : i32 to index
    %c0_105 = arith.constant 0 : index
    %c0_106 = arith.constant 0 : index
    %226 = vector.load %arg13[%225, %c0_105, %c0_106] : memref<8x8x128xf32, #tpu.memory_space<vmem>>, vector<1x8x128xf32>
    %227 = vector.shape_cast %226 : vector<1x8x128xf32> to vector<8x128xf32>
    %228 = vector.shape_cast %224 : vector<8x128xf32> to vector<1x8x128xf32>
    tpu.vector_store %arg13[%225, %c0_105, %c0_106], %228 {strides = array<i32>} : memref<8x8x128xf32, #tpu.memory_space<vmem>>, vector<1x8x128xf32>,
    %c6_i32 = arith.constant 6 : i32
    %229 = arith.index_cast %c6_i32 : i32 to index
    %c0_107 = arith.constant 0 : index
    %c0_108 = arith.constant 0 : index
    %230 = vector.load %arg12[%229, %c0_107, %c0_108] : memref<8x8x128xf32, #tpu.memory_space<vmem>>, vector<1x8x128xf32>
    %231 = vector.shape_cast %230 : vector<1x8x128xf32> to vector<8x128xf32>
    %232 = arith.truncf %224 : vector<8x128xf32> to vector<8x128xbf16>
    %c0_109 = arith.constant 0 : index
    %c0_110 = arith.constant 0 : index
    %233 = vector.load %arg4[%c0_109, %c0_110] : memref<128x128xbf16, #tpu.memory_space<vmem>>, vector<128x128xbf16>
    %cst_111 = arith.constant dense<0.000000e+00> : vector<8x128xf32>
    %234 = tpu.matmul %232, %233, %cst_111 {dimension_numbers = #tpu.dot_dimension_numbers<[1], [0], [0], [1], [0, 0, 1, 1], [], []>} : vector<8x128xbf16>, vector<128x128xbf16>, vector<8x128xf32> -> vector<8x128xf32>
    %235 = arith.addf %231, %234 : vector<8x128xf32>
    %cst_112 = arith.constant 2.000000e+00 : f32
    %236 = vector.broadcast %cst_112 : f32 to vector<8x128xf32>
    %237 = arith.mulf %236, %235 : vector<8x128xf32>
    %238 = arith.select %8, %237, %235 : vector<8x128xi1>, vector<8x128xf32>
    %239 = arith.negf %238 : vector<8x128xf32>
    %240 = math.exp %239 : vector<8x128xf32>
    %cst_113 = arith.constant 1.000000e+00 : f32
    %241 = vector.broadcast %cst_113 : f32 to vector<8x128xf32>
    %242 = arith.addf %241, %240 : vector<8x128xf32>
    %243 = arith.divf %241, %242 : vector<8x128xf32>
    %cst_114 = arith.constant 2.000000e+00 : f32
    %244 = vector.broadcast %cst_114 : f32 to vector<8x128xf32>
    %245 = arith.mulf %244, %243 : vector<8x128xf32>
    %cst_115 = arith.constant 1.000000e+00 : f32
    %246 = vector.broadcast %cst_115 : f32 to vector<8x128xf32>
    %247 = arith.subf %245, %246 : vector<8x128xf32>
    %248 = arith.select %8, %247, %243 : vector<8x128xi1>, vector<8x128xf32>
    %c96_i32_116 = arith.constant 96 : i32
    %249 = tpu.dynamic_rotate %248 by %c96_i32_116 dim 1 : vector<8x128xf32>, i32 -> vector<8x128xf32>
    %c64_i32_117 = arith.constant 64 : i32
    %250 = tpu.dynamic_rotate %248 by %c64_i32_117 dim 1 : vector<8x128xf32>, i32 -> vector<8x128xf32>
    %c32_i32_118 = arith.constant 32 : i32
    %251 = tpu.dynamic_rotate %248 by %c32_i32_118 dim 1 : vector<8x128xf32>, i32 -> vector<8x128xf32>
    %252 = arith.mulf %249, %222 : vector<8x128xf32>
    %253 = arith.mulf %248, %250 : vector<8x128xf32>
    %254 = arith.addf %252, %253 : vector<8x128xf32>
    %cst_119 = arith.constant 0.000000e+00 : f32
    %255 = vector.broadcast %cst_119 : f32 to vector<8x128xf32>
    %256 = arith.select %11, %254, %255 : vector<8x128xi1>, vector<8x128xf32>
    %257 = math.tanh %256 : vector<8x128xf32>
    %258 = arith.mulf %251, %257 : vector<8x128xf32>
    %259 = arith.index_cast %c6_i32 : i32 to index
    %c0_120 = arith.constant 0 : index
    %c0_121 = arith.constant 0 : index
    %260 = vector.load %arg13[%259, %c0_120, %c0_121] : memref<8x8x128xf32, #tpu.memory_space<vmem>>, vector<1x8x128xf32>
    %261 = vector.shape_cast %260 : vector<1x8x128xf32> to vector<8x128xf32>
    %262 = vector.shape_cast %258 : vector<8x128xf32> to vector<1x8x128xf32>
    tpu.vector_store %arg13[%259, %c0_120, %c0_121], %262 {strides = array<i32>} : memref<8x8x128xf32, #tpu.memory_space<vmem>>, vector<1x8x128xf32>,
    %c7_i32 = arith.constant 7 : i32
    %263 = arith.index_cast %c7_i32 : i32 to index
    %c0_122 = arith.constant 0 : index
    %c0_123 = arith.constant 0 : index
    %264 = vector.load %arg12[%263, %c0_122, %c0_123] : memref<8x8x128xf32, #tpu.memory_space<vmem>>, vector<1x8x128xf32>
    %265 = vector.shape_cast %264 : vector<1x8x128xf32> to vector<8x128xf32>
    %266 = arith.truncf %258 : vector<8x128xf32> to vector<8x128xbf16>
    %c0_124 = arith.constant 0 : index
    %c0_125 = arith.constant 0 : index
    %267 = vector.load %arg4[%c0_124, %c0_125] : memref<128x128xbf16, #tpu.memory_space<vmem>>, vector<128x128xbf16>
    %cst_126 = arith.constant dense<0.000000e+00> : vector<8x128xf32>
    %268 = tpu.matmul %266, %267, %cst_126 {dimension_numbers = #tpu.dot_dimension_numbers<[1], [0], [0], [1], [0, 0, 1, 1], [], []>} : vector<8x128xbf16>, vector<128x128xbf16>, vector<8x128xf32> -> vector<8x128xf32>
    %269 = arith.addf %265, %268 : vector<8x128xf32>
    %cst_127 = arith.constant 2.000000e+00 : f32
    %270 = vector.broadcast %cst_127 : f32 to vector<8x128xf32>
    %271 = arith.mulf %270, %269 : vector<8x128xf32>
    %272 = arith.select %8, %271, %269 : vector<8x128xi1>, vector<8x128xf32>
    %273 = arith.negf %272 : vector<8x128xf32>
    %274 = math.exp %273 : vector<8x128xf32>
    %cst_128 = arith.constant 1.000000e+00 : f32
    %275 = vector.broadcast %cst_128 : f32 to vector<8x128xf32>
    %276 = arith.addf %275, %274 : vector<8x128xf32>
    %277 = arith.divf %275, %276 : vector<8x128xf32>
    %cst_129 = arith.constant 2.000000e+00 : f32
    %278 = vector.broadcast %cst_129 : f32 to vector<8x128xf32>
    %279 = arith.mulf %278, %277 : vector<8x128xf32>
    %cst_130 = arith.constant 1.000000e+00 : f32
    %280 = vector.broadcast %cst_130 : f32 to vector<8x128xf32>
    %281 = arith.subf %279, %280 : vector<8x128xf32>
    %282 = arith.select %8, %281, %277 : vector<8x128xi1>, vector<8x128xf32>
    %c96_i32_131 = arith.constant 96 : i32
    %283 = tpu.dynamic_rotate %282 by %c96_i32_131 dim 1 : vector<8x128xf32>, i32 -> vector<8x128xf32>
    %c64_i32_132 = arith.constant 64 : i32
    %284 = tpu.dynamic_rotate %282 by %c64_i32_132 dim 1 : vector<8x128xf32>, i32 -> vector<8x128xf32>
    %c32_i32_133 = arith.constant 32 : i32
    %285 = tpu.dynamic_rotate %282 by %c32_i32_133 dim 1 : vector<8x128xf32>, i32 -> vector<8x128xf32>
    %286 = arith.mulf %283, %256 : vector<8x128xf32>
    %287 = arith.mulf %282, %284 : vector<8x128xf32>
    %288 = arith.addf %286, %287 : vector<8x128xf32>
    %cst_134 = arith.constant 0.000000e+00 : f32
    %289 = vector.broadcast %cst_134 : f32 to vector<8x128xf32>
    %290 = arith.select %11, %288, %289 : vector<8x128xi1>, vector<8x128xf32>
    %291 = math.tanh %290 : vector<8x128xf32>
    %292 = arith.mulf %285, %291 : vector<8x128xf32>
    %293 = arith.index_cast %c7_i32 : i32 to index
    %c0_135 = arith.constant 0 : index
    %c0_136 = arith.constant 0 : index
    %294 = vector.load %arg13[%293, %c0_135, %c0_136] : memref<8x8x128xf32, #tpu.memory_space<vmem>>, vector<1x8x128xf32>
    %295 = vector.shape_cast %294 : vector<1x8x128xf32> to vector<8x128xf32>
    %296 = vector.shape_cast %292 : vector<8x128xf32> to vector<1x8x128xf32>
    tpu.vector_store %arg13[%293, %c0_135, %c0_136], %296 {strides = array<i32>} : memref<8x8x128xf32, #tpu.memory_space<vmem>>, vector<1x8x128xf32>,
    %c8_i32 = arith.constant 8 : i32
    %c0_137 = arith.constant 0 : index
    %c0_138 = arith.constant 0 : index
    %c0_139 = arith.constant 0 : index
    %297 = vector.load %arg14[%c0_137, %c0_138, %c0_139] : memref<2x8x128xf32, #tpu.memory_space<vmem>>, vector<1x8x128xf32>
    %298 = vector.shape_cast %297 : vector<1x8x128xf32> to vector<8x128xf32>
    %299 = vector.shape_cast %292 : vector<8x128xf32> to vector<1x8x128xf32>
    tpu.vector_store %arg14[%c0_137, %c0_138, %c0_139], %299 {strides = array<i32>} : memref<2x8x128xf32, #tpu.memory_space<vmem>>, vector<1x8x128xf32>,
    %c0_140 = arith.constant 0 : index
    %c0_141 = arith.constant 0 : index
    %c0_142 = arith.constant 0 : index
    %300 = vector.load %arg15[%c0_140, %c0_141, %c0_142] : memref<2x8x128xf32, #tpu.memory_space<vmem>>, vector<1x8x128xf32>
    %301 = vector.shape_cast %300 : vector<1x8x128xf32> to vector<8x128xf32>
    %302 = vector.shape_cast %290 : vector<8x128xf32> to vector<1x8x128xf32>
    tpu.vector_store %arg15[%c0_140, %c0_141, %c0_142], %302 {strides = array<i32>} : memref<2x8x128xf32, #tpu.memory_space<vmem>>, vector<1x8x128xf32>,
    %c0_143 = arith.constant 0 : index
    %c0_144 = arith.constant 0 : index
    %c0_145 = arith.constant 0 : index
    %303 = vector.load %arg13[%c0_143, %c0_144, %c0_145] : memref<8x8x128xf32, #tpu.memory_space<vmem>>, vector<8x8x128xf32>
    %304 = vector.shape_cast %303 : vector<8x8x128xf32> to vector<64x128xf32>
    %305 = arith.truncf %304 : vector<64x128xf32> to vector<64x128xbf16>
    %c0_146 = arith.constant 0 : index
    %c0_147 = arith.constant 0 : index
    %306 = vector.load %arg6[%c0_146, %c0_147] : memref<128x128xbf16, #tpu.memory_space<vmem>>, vector<128x128xbf16>
    %cst_148 = arith.constant dense<0.000000e+00> : vector<64x128xf32>
    %307 = tpu.matmul %305, %306, %cst_148 {dimension_numbers = #tpu.dot_dimension_numbers<[1], [0], [0], [1], [0, 0, 1, 1], [], []>} : vector<64x128xbf16>, vector<128x128xbf16>, vector<64x128xf32> -> vector<64x128xf32>
    %c0_149 = arith.constant 0 : index
    %c0_150 = arith.constant 0 : index
    %308 = vector.load %arg8[%c0_149, %c0_150] : memref<1x128xf32, #tpu.memory_space<vmem>>, vector<1x128xf32>
    %309 = vector.broadcast %308 : vector<1x128xf32> to vector<64x128xf32>
    %310 = arith.addf %307, %309 : vector<64x128xf32>
    %311 = vector.shape_cast %310 : vector<64x128xf32> to vector<8x8x128xf32>
    %c0_151 = arith.constant 0 : index
    %c0_152 = arith.constant 0 : index
    %c0_153 = arith.constant 0 : index
    %312 = vector.load %arg12[%c0_151, %c0_152, %c0_153] : memref<8x8x128xf32, #tpu.memory_space<vmem>>, vector<8x8x128xf32>
    tpu.vector_store %arg12[%c0_151, %c0_152, %c0_153], %311 {strides = array<i32>} : memref<8x8x128xf32, #tpu.memory_space<vmem>>, vector<8x8x128xf32>,
    %c1 = arith.constant 1 : index
    %c0_154 = arith.constant 0 : index
    %c0_155 = arith.constant 0 : index
    %313 = vector.load %arg14[%c1, %c0_154, %c0_155] : memref<2x8x128xf32, #tpu.memory_space<vmem>>, vector<1x8x128xf32>
    %314 = vector.shape_cast %313 : vector<1x8x128xf32> to vector<8x128xf32>
    %c1_156 = arith.constant 1 : index
    %c0_157 = arith.constant 0 : index
    %c0_158 = arith.constant 0 : index
    %315 = vector.load %arg15[%c1_156, %c0_157, %c0_158] : memref<2x8x128xf32, #tpu.memory_space<vmem>>, vector<1x8x128xf32>
    %316 = vector.shape_cast %315 : vector<1x8x128xf32> to vector<8x128xf32>
    %c0_i32_159 = arith.constant 0 : i32
    %317 = arith.index_cast %c0_i32_159 : i32 to index
    %c0_160 = arith.constant 0 : index
    %c0_161 = arith.constant 0 : index
    %318 = vector.load %arg12[%317, %c0_160, %c0_161] : memref<8x8x128xf32, #tpu.memory_space<vmem>>, vector<1x8x128xf32>
    %319 = vector.shape_cast %318 : vector<1x8x128xf32> to vector<8x128xf32>
    %320 = arith.truncf %314 : vector<8x128xf32> to vector<8x128xbf16>
    %c0_162 = arith.constant 0 : index
    %c0_163 = arith.constant 0 : index
    %321 = vector.load %arg7[%c0_162, %c0_163] : memref<128x128xbf16, #tpu.memory_space<vmem>>, vector<128x128xbf16>
    %cst_164 = arith.constant dense<0.000000e+00> : vector<8x128xf32>
    %322 = tpu.matmul %320, %321, %cst_164 {dimension_numbers = #tpu.dot_dimension_numbers<[1], [0], [0], [1], [0, 0, 1, 1], [], []>} : vector<8x128xbf16>, vector<128x128xbf16>, vector<8x128xf32> -> vector<8x128xf32>
    %323 = arith.addf %319, %322 : vector<8x128xf32>
    %cst_165 = arith.constant 2.000000e+00 : f32
    %324 = vector.broadcast %cst_165 : f32 to vector<8x128xf32>
    %325 = arith.mulf %324, %323 : vector<8x128xf32>
    %326 = arith.select %8, %325, %323 : vector<8x128xi1>, vector<8x128xf32>
    %327 = arith.negf %326 : vector<8x128xf32>
    %328 = math.exp %327 : vector<8x128xf32>
    %cst_166 = arith.constant 1.000000e+00 : f32
    %329 = vector.broadcast %cst_166 : f32 to vector<8x128xf32>
    %330 = arith.addf %329, %328 : vector<8x128xf32>
    %331 = arith.divf %329, %330 : vector<8x128xf32>
    %cst_167 = arith.constant 2.000000e+00 : f32
    %332 = vector.broadcast %cst_167 : f32 to vector<8x128xf32>
    %333 = arith.mulf %332, %331 : vector<8x128xf32>
    %cst_168 = arith.constant 1.000000e+00 : f32
    %334 = vector.broadcast %cst_168 : f32 to vector<8x128xf32>
    %335 = arith.subf %333, %334 : vector<8x128xf32>
    %336 = arith.select %8, %335, %331 : vector<8x128xi1>, vector<8x128xf32>
    %c96_i32_169 = arith.constant 96 : i32
    %337 = tpu.dynamic_rotate %336 by %c96_i32_169 dim 1 : vector<8x128xf32>, i32 -> vector<8x128xf32>
    %c64_i32_170 = arith.constant 64 : i32
    %338 = tpu.dynamic_rotate %336 by %c64_i32_170 dim 1 : vector<8x128xf32>, i32 -> vector<8x128xf32>
    %c32_i32_171 = arith.constant 32 : i32
    %339 = tpu.dynamic_rotate %336 by %c32_i32_171 dim 1 : vector<8x128xf32>, i32 -> vector<8x128xf32>
    %340 = arith.mulf %337, %316 : vector<8x128xf32>
    %341 = arith.mulf %336, %338 : vector<8x128xf32>
    %342 = arith.addf %340, %341 : vector<8x128xf32>
    %cst_172 = arith.constant 0.000000e+00 : f32
    %343 = vector.broadcast %cst_172 : f32 to vector<8x128xf32>
    %344 = arith.select %11, %342, %343 : vector<8x128xi1>, vector<8x128xf32>
    %345 = math.tanh %344 : vector<8x128xf32>
    %346 = arith.mulf %339, %345 : vector<8x128xf32>
    %347 = arith.index_cast %c0_i32_159 : i32 to index
    %c0_173 = arith.constant 0 : index
    %c0_174 = arith.constant 0 : index
    %348 = vector.load %arg13[%347, %c0_173, %c0_174] : memref<8x8x128xf32, #tpu.memory_space<vmem>>, vector<1x8x128xf32>
    %349 = vector.shape_cast %348 : vector<1x8x128xf32> to vector<8x128xf32>
    %350 = vector.shape_cast %346 : vector<8x128xf32> to vector<1x8x128xf32>
    tpu.vector_store %arg13[%347, %c0_173, %c0_174], %350 {strides = array<i32>} : memref<8x8x128xf32, #tpu.memory_space<vmem>>, vector<1x8x128xf32>,
    %c1_i32_175 = arith.constant 1 : i32
    %351 = arith.index_cast %c1_i32_175 : i32 to index
    %c0_176 = arith.constant 0 : index
    %c0_177 = arith.constant 0 : index
    %352 = vector.load %arg12[%351, %c0_176, %c0_177] : memref<8x8x128xf32, #tpu.memory_space<vmem>>, vector<1x8x128xf32>
    %353 = vector.shape_cast %352 : vector<1x8x128xf32> to vector<8x128xf32>
    %354 = arith.truncf %346 : vector<8x128xf32> to vector<8x128xbf16>
    %c0_178 = arith.constant 0 : index
    %c0_179 = arith.constant 0 : index
    %355 = vector.load %arg7[%c0_178, %c0_179] : memref<128x128xbf16, #tpu.memory_space<vmem>>, vector<128x128xbf16>
    %cst_180 = arith.constant dense<0.000000e+00> : vector<8x128xf32>
    %356 = tpu.matmul %354, %355, %cst_180 {dimension_numbers = #tpu.dot_dimension_numbers<[1], [0], [0], [1], [0, 0, 1, 1], [], []>} : vector<8x128xbf16>, vector<128x128xbf16>, vector<8x128xf32> -> vector<8x128xf32>
    %357 = arith.addf %353, %356 : vector<8x128xf32>
    %cst_181 = arith.constant 2.000000e+00 : f32
    %358 = vector.broadcast %cst_181 : f32 to vector<8x128xf32>
    %359 = arith.mulf %358, %357 : vector<8x128xf32>
    %360 = arith.select %8, %359, %357 : vector<8x128xi1>, vector<8x128xf32>
    %361 = arith.negf %360 : vector<8x128xf32>
    %362 = math.exp %361 : vector<8x128xf32>
    %cst_182 = arith.constant 1.000000e+00 : f32
    %363 = vector.broadcast %cst_182 : f32 to vector<8x128xf32>
    %364 = arith.addf %363, %362 : vector<8x128xf32>
    %365 = arith.divf %363, %364 : vector<8x128xf32>
    %cst_183 = arith.constant 2.000000e+00 : f32
    %366 = vector.broadcast %cst_183 : f32 to vector<8x128xf32>
    %367 = arith.mulf %366, %365 : vector<8x128xf32>
    %cst_184 = arith.constant 1.000000e+00 : f32
    %368 = vector.broadcast %cst_184 : f32 to vector<8x128xf32>
    %369 = arith.subf %367, %368 : vector<8x128xf32>
    %370 = arith.select %8, %369, %365 : vector<8x128xi1>, vector<8x128xf32>
    %c96_i32_185 = arith.constant 96 : i32
    %371 = tpu.dynamic_rotate %370 by %c96_i32_185 dim 1 : vector<8x128xf32>, i32 -> vector<8x128xf32>
    %c64_i32_186 = arith.constant 64 : i32
    %372 = tpu.dynamic_rotate %370 by %c64_i32_186 dim 1 : vector<8x128xf32>, i32 -> vector<8x128xf32>
    %c32_i32_187 = arith.constant 32 : i32
    %373 = tpu.dynamic_rotate %370 by %c32_i32_187 dim 1 : vector<8x128xf32>, i32 -> vector<8x128xf32>
    %374 = arith.mulf %371, %344 : vector<8x128xf32>
    %375 = arith.mulf %370, %372 : vector<8x128xf32>
    %376 = arith.addf %374, %375 : vector<8x128xf32>
    %cst_188 = arith.constant 0.000000e+00 : f32
    %377 = vector.broadcast %cst_188 : f32 to vector<8x128xf32>
    %378 = arith.select %11, %376, %377 : vector<8x128xi1>, vector<8x128xf32>
    %379 = math.tanh %378 : vector<8x128xf32>
    %380 = arith.mulf %373, %379 : vector<8x128xf32>
    %381 = arith.index_cast %c1_i32_175 : i32 to index
    %c0_189 = arith.constant 0 : index
    %c0_190 = arith.constant 0 : index
    %382 = vector.load %arg13[%381, %c0_189, %c0_190] : memref<8x8x128xf32, #tpu.memory_space<vmem>>, vector<1x8x128xf32>
    %383 = vector.shape_cast %382 : vector<1x8x128xf32> to vector<8x128xf32>
    %384 = vector.shape_cast %380 : vector<8x128xf32> to vector<1x8x128xf32>
    tpu.vector_store %arg13[%381, %c0_189, %c0_190], %384 {strides = array<i32>} : memref<8x8x128xf32, #tpu.memory_space<vmem>>, vector<1x8x128xf32>,
    %c2_i32_191 = arith.constant 2 : i32
    %385 = arith.index_cast %c2_i32_191 : i32 to index
    %c0_192 = arith.constant 0 : index
    %c0_193 = arith.constant 0 : index
    %386 = vector.load %arg12[%385, %c0_192, %c0_193] : memref<8x8x128xf32, #tpu.memory_space<vmem>>, vector<1x8x128xf32>
    %387 = vector.shape_cast %386 : vector<1x8x128xf32> to vector<8x128xf32>
    %388 = arith.truncf %380 : vector<8x128xf32> to vector<8x128xbf16>
    %c0_194 = arith.constant 0 : index
    %c0_195 = arith.constant 0 : index
    %389 = vector.load %arg7[%c0_194, %c0_195] : memref<128x128xbf16, #tpu.memory_space<vmem>>, vector<128x128xbf16>
    %cst_196 = arith.constant dense<0.000000e+00> : vector<8x128xf32>
    %390 = tpu.matmul %388, %389, %cst_196 {dimension_numbers = #tpu.dot_dimension_numbers<[1], [0], [0], [1], [0, 0, 1, 1], [], []>} : vector<8x128xbf16>, vector<128x128xbf16>, vector<8x128xf32> -> vector<8x128xf32>
    %391 = arith.addf %387, %390 : vector<8x128xf32>
    %cst_197 = arith.constant 2.000000e+00 : f32
    %392 = vector.broadcast %cst_197 : f32 to vector<8x128xf32>
    %393 = arith.mulf %392, %391 : vector<8x128xf32>
    %394 = arith.select %8, %393, %391 : vector<8x128xi1>, vector<8x128xf32>
    %395 = arith.negf %394 : vector<8x128xf32>
    %396 = math.exp %395 : vector<8x128xf32>
    %cst_198 = arith.constant 1.000000e+00 : f32
    %397 = vector.broadcast %cst_198 : f32 to vector<8x128xf32>
    %398 = arith.addf %397, %396 : vector<8x128xf32>
    %399 = arith.divf %397, %398 : vector<8x128xf32>
    %cst_199 = arith.constant 2.000000e+00 : f32
    %400 = vector.broadcast %cst_199 : f32 to vector<8x128xf32>
    %401 = arith.mulf %400, %399 : vector<8x128xf32>
    %cst_200 = arith.constant 1.000000e+00 : f32
    %402 = vector.broadcast %cst_200 : f32 to vector<8x128xf32>
    %403 = arith.subf %401, %402 : vector<8x128xf32>
    %404 = arith.select %8, %403, %399 : vector<8x128xi1>, vector<8x128xf32>
    %c96_i32_201 = arith.constant 96 : i32
    %405 = tpu.dynamic_rotate %404 by %c96_i32_201 dim 1 : vector<8x128xf32>, i32 -> vector<8x128xf32>
    %c64_i32_202 = arith.constant 64 : i32
    %406 = tpu.dynamic_rotate %404 by %c64_i32_202 dim 1 : vector<8x128xf32>, i32 -> vector<8x128xf32>
    %c32_i32_203 = arith.constant 32 : i32
    %407 = tpu.dynamic_rotate %404 by %c32_i32_203 dim 1 : vector<8x128xf32>, i32 -> vector<8x128xf32>
    %408 = arith.mulf %405, %378 : vector<8x128xf32>
    %409 = arith.mulf %404, %406 : vector<8x128xf32>
    %410 = arith.addf %408, %409 : vector<8x128xf32>
    %cst_204 = arith.constant 0.000000e+00 : f32
    %411 = vector.broadcast %cst_204 : f32 to vector<8x128xf32>
    %412 = arith.select %11, %410, %411 : vector<8x128xi1>, vector<8x128xf32>
    %413 = math.tanh %412 : vector<8x128xf32>
    %414 = arith.mulf %407, %413 : vector<8x128xf32>
    %415 = arith.index_cast %c2_i32_191 : i32 to index
    %c0_205 = arith.constant 0 : index
    %c0_206 = arith.constant 0 : index
    %416 = vector.load %arg13[%415, %c0_205, %c0_206] : memref<8x8x128xf32, #tpu.memory_space<vmem>>, vector<1x8x128xf32>
    %417 = vector.shape_cast %416 : vector<1x8x128xf32> to vector<8x128xf32>
    %418 = vector.shape_cast %414 : vector<8x128xf32> to vector<1x8x128xf32>
    tpu.vector_store %arg13[%415, %c0_205, %c0_206], %418 {strides = array<i32>} : memref<8x8x128xf32, #tpu.memory_space<vmem>>, vector<1x8x128xf32>,
    %c3_i32_207 = arith.constant 3 : i32
    %419 = arith.index_cast %c3_i32_207 : i32 to index
    %c0_208 = arith.constant 0 : index
    %c0_209 = arith.constant 0 : index
    %420 = vector.load %arg12[%419, %c0_208, %c0_209] : memref<8x8x128xf32, #tpu.memory_space<vmem>>, vector<1x8x128xf32>
    %421 = vector.shape_cast %420 : vector<1x8x128xf32> to vector<8x128xf32>
    %422 = arith.truncf %414 : vector<8x128xf32> to vector<8x128xbf16>
    %c0_210 = arith.constant 0 : index
    %c0_211 = arith.constant 0 : index
    %423 = vector.load %arg7[%c0_210, %c0_211] : memref<128x128xbf16, #tpu.memory_space<vmem>>, vector<128x128xbf16>
    %cst_212 = arith.constant dense<0.000000e+00> : vector<8x128xf32>
    %424 = tpu.matmul %422, %423, %cst_212 {dimension_numbers = #tpu.dot_dimension_numbers<[1], [0], [0], [1], [0, 0, 1, 1], [], []>} : vector<8x128xbf16>, vector<128x128xbf16>, vector<8x128xf32> -> vector<8x128xf32>
    %425 = arith.addf %421, %424 : vector<8x128xf32>
    %cst_213 = arith.constant 2.000000e+00 : f32
    %426 = vector.broadcast %cst_213 : f32 to vector<8x128xf32>
    %427 = arith.mulf %426, %425 : vector<8x128xf32>
    %428 = arith.select %8, %427, %425 : vector<8x128xi1>, vector<8x128xf32>
    %429 = arith.negf %428 : vector<8x128xf32>
    %430 = math.exp %429 : vector<8x128xf32>
    %cst_214 = arith.constant 1.000000e+00 : f32
    %431 = vector.broadcast %cst_214 : f32 to vector<8x128xf32>
    %432 = arith.addf %431, %430 : vector<8x128xf32>
    %433 = arith.divf %431, %432 : vector<8x128xf32>
    %cst_215 = arith.constant 2.000000e+00 : f32
    %434 = vector.broadcast %cst_215 : f32 to vector<8x128xf32>
    %435 = arith.mulf %434, %433 : vector<8x128xf32>
    %cst_216 = arith.constant 1.000000e+00 : f32
    %436 = vector.broadcast %cst_216 : f32 to vector<8x128xf32>
    %437 = arith.subf %435, %436 : vector<8x128xf32>
    %438 = arith.select %8, %437, %433 : vector<8x128xi1>, vector<8x128xf32>
    %c96_i32_217 = arith.constant 96 : i32
    %439 = tpu.dynamic_rotate %438 by %c96_i32_217 dim 1 : vector<8x128xf32>, i32 -> vector<8x128xf32>
    %c64_i32_218 = arith.constant 64 : i32
    %440 = tpu.dynamic_rotate %438 by %c64_i32_218 dim 1 : vector<8x128xf32>, i32 -> vector<8x128xf32>
    %c32_i32_219 = arith.constant 32 : i32
    %441 = tpu.dynamic_rotate %438 by %c32_i32_219 dim 1 : vector<8x128xf32>, i32 -> vector<8x128xf32>
    %442 = arith.mulf %439, %412 : vector<8x128xf32>
    %443 = arith.mulf %438, %440 : vector<8x128xf32>
    %444 = arith.addf %442, %443 : vector<8x128xf32>
    %cst_220 = arith.constant 0.000000e+00 : f32
    %445 = vector.broadcast %cst_220 : f32 to vector<8x128xf32>
    %446 = arith.select %11, %444, %445 : vector<8x128xi1>, vector<8x128xf32>
    %447 = math.tanh %446 : vector<8x128xf32>
    %448 = arith.mulf %441, %447 : vector<8x128xf32>
    %449 = arith.index_cast %c3_i32_207 : i32 to index
    %c0_221 = arith.constant 0 : index
    %c0_222 = arith.constant 0 : index
    %450 = vector.load %arg13[%449, %c0_221, %c0_222] : memref<8x8x128xf32, #tpu.memory_space<vmem>>, vector<1x8x128xf32>
    %451 = vector.shape_cast %450 : vector<1x8x128xf32> to vector<8x128xf32>
    %452 = vector.shape_cast %448 : vector<8x128xf32> to vector<1x8x128xf32>
    tpu.vector_store %arg13[%449, %c0_221, %c0_222], %452 {strides = array<i32>} : memref<8x8x128xf32, #tpu.memory_space<vmem>>, vector<1x8x128xf32>,
    %c4_i32_223 = arith.constant 4 : i32
    %453 = arith.index_cast %c4_i32_223 : i32 to index
    %c0_224 = arith.constant 0 : index
    %c0_225 = arith.constant 0 : index
    %454 = vector.load %arg12[%453, %c0_224, %c0_225] : memref<8x8x128xf32, #tpu.memory_space<vmem>>, vector<1x8x128xf32>
    %455 = vector.shape_cast %454 : vector<1x8x128xf32> to vector<8x128xf32>
    %456 = arith.truncf %448 : vector<8x128xf32> to vector<8x128xbf16>
    %c0_226 = arith.constant 0 : index
    %c0_227 = arith.constant 0 : index
    %457 = vector.load %arg7[%c0_226, %c0_227] : memref<128x128xbf16, #tpu.memory_space<vmem>>, vector<128x128xbf16>
    %cst_228 = arith.constant dense<0.000000e+00> : vector<8x128xf32>
    %458 = tpu.matmul %456, %457, %cst_228 {dimension_numbers = #tpu.dot_dimension_numbers<[1], [0], [0], [1], [0, 0, 1, 1], [], []>} : vector<8x128xbf16>, vector<128x128xbf16>, vector<8x128xf32> -> vector<8x128xf32>
    %459 = arith.addf %455, %458 : vector<8x128xf32>
    %cst_229 = arith.constant 2.000000e+00 : f32
    %460 = vector.broadcast %cst_229 : f32 to vector<8x128xf32>
    %461 = arith.mulf %460, %459 : vector<8x128xf32>
    %462 = arith.select %8, %461, %459 : vector<8x128xi1>, vector<8x128xf32>
    %463 = arith.negf %462 : vector<8x128xf32>
    %464 = math.exp %463 : vector<8x128xf32>
    %cst_230 = arith.constant 1.000000e+00 : f32
    %465 = vector.broadcast %cst_230 : f32 to vector<8x128xf32>
    %466 = arith.addf %465, %464 : vector<8x128xf32>
    %467 = arith.divf %465, %466 : vector<8x128xf32>
    %cst_231 = arith.constant 2.000000e+00 : f32
    %468 = vector.broadcast %cst_231 : f32 to vector<8x128xf32>
    %469 = arith.mulf %468, %467 : vector<8x128xf32>
    %cst_232 = arith.constant 1.000000e+00 : f32
    %470 = vector.broadcast %cst_232 : f32 to vector<8x128xf32>
    %471 = arith.subf %469, %470 : vector<8x128xf32>
    %472 = arith.select %8, %471, %467 : vector<8x128xi1>, vector<8x128xf32>
    %c96_i32_233 = arith.constant 96 : i32
    %473 = tpu.dynamic_rotate %472 by %c96_i32_233 dim 1 : vector<8x128xf32>, i32 -> vector<8x128xf32>
    %c64_i32_234 = arith.constant 64 : i32
    %474 = tpu.dynamic_rotate %472 by %c64_i32_234 dim 1 : vector<8x128xf32>, i32 -> vector<8x128xf32>
    %c32_i32_235 = arith.constant 32 : i32
    %475 = tpu.dynamic_rotate %472 by %c32_i32_235 dim 1 : vector<8x128xf32>, i32 -> vector<8x128xf32>
    %476 = arith.mulf %473, %446 : vector<8x128xf32>
    %477 = arith.mulf %472, %474 : vector<8x128xf32>
    %478 = arith.addf %476, %477 : vector<8x128xf32>
    %cst_236 = arith.constant 0.000000e+00 : f32
    %479 = vector.broadcast %cst_236 : f32 to vector<8x128xf32>
    %480 = arith.select %11, %478, %479 : vector<8x128xi1>, vector<8x128xf32>
    %481 = math.tanh %480 : vector<8x128xf32>
    %482 = arith.mulf %475, %481 : vector<8x128xf32>
    %483 = arith.index_cast %c4_i32_223 : i32 to index
    %c0_237 = arith.constant 0 : index
    %c0_238 = arith.constant 0 : index
    %484 = vector.load %arg13[%483, %c0_237, %c0_238] : memref<8x8x128xf32, #tpu.memory_space<vmem>>, vector<1x8x128xf32>
    %485 = vector.shape_cast %484 : vector<1x8x128xf32> to vector<8x128xf32>
    %486 = vector.shape_cast %482 : vector<8x128xf32> to vector<1x8x128xf32>
    tpu.vector_store %arg13[%483, %c0_237, %c0_238], %486 {strides = array<i32>} : memref<8x8x128xf32, #tpu.memory_space<vmem>>, vector<1x8x128xf32>,
    %c5_i32_239 = arith.constant 5 : i32
    %487 = arith.index_cast %c5_i32_239 : i32 to index
    %c0_240 = arith.constant 0 : index
    %c0_241 = arith.constant 0 : index
    %488 = vector.load %arg12[%487, %c0_240, %c0_241] : memref<8x8x128xf32, #tpu.memory_space<vmem>>, vector<1x8x128xf32>
    %489 = vector.shape_cast %488 : vector<1x8x128xf32> to vector<8x128xf32>
    %490 = arith.truncf %482 : vector<8x128xf32> to vector<8x128xbf16>
    %c0_242 = arith.constant 0 : index
    %c0_243 = arith.constant 0 : index
    %491 = vector.load %arg7[%c0_242, %c0_243] : memref<128x128xbf16, #tpu.memory_space<vmem>>, vector<128x128xbf16>
    %cst_244 = arith.constant dense<0.000000e+00> : vector<8x128xf32>
    %492 = tpu.matmul %490, %491, %cst_244 {dimension_numbers = #tpu.dot_dimension_numbers<[1], [0], [0], [1], [0, 0, 1, 1], [], []>} : vector<8x128xbf16>, vector<128x128xbf16>, vector<8x128xf32> -> vector<8x128xf32>
    %493 = arith.addf %489, %492 : vector<8x128xf32>
    %cst_245 = arith.constant 2.000000e+00 : f32
    %494 = vector.broadcast %cst_245 : f32 to vector<8x128xf32>
    %495 = arith.mulf %494, %493 : vector<8x128xf32>
    %496 = arith.select %8, %495, %493 : vector<8x128xi1>, vector<8x128xf32>
    %497 = arith.negf %496 : vector<8x128xf32>
    %498 = math.exp %497 : vector<8x128xf32>
    %cst_246 = arith.constant 1.000000e+00 : f32
    %499 = vector.broadcast %cst_246 : f32 to vector<8x128xf32>
    %500 = arith.addf %499, %498 : vector<8x128xf32>
    %501 = arith.divf %499, %500 : vector<8x128xf32>
    %cst_247 = arith.constant 2.000000e+00 : f32
    %502 = vector.broadcast %cst_247 : f32 to vector<8x128xf32>
    %503 = arith.mulf %502, %501 : vector<8x128xf32>
    %cst_248 = arith.constant 1.000000e+00 : f32
    %504 = vector.broadcast %cst_248 : f32 to vector<8x128xf32>
    %505 = arith.subf %503, %504 : vector<8x128xf32>
    %506 = arith.select %8, %505, %501 : vector<8x128xi1>, vector<8x128xf32>
    %c96_i32_249 = arith.constant 96 : i32
    %507 = tpu.dynamic_rotate %506 by %c96_i32_249 dim 1 : vector<8x128xf32>, i32 -> vector<8x128xf32>
    %c64_i32_250 = arith.constant 64 : i32
    %508 = tpu.dynamic_rotate %506 by %c64_i32_250 dim 1 : vector<8x128xf32>, i32 -> vector<8x128xf32>
    %c32_i32_251 = arith.constant 32 : i32
    %509 = tpu.dynamic_rotate %506 by %c32_i32_251 dim 1 : vector<8x128xf32>, i32 -> vector<8x128xf32>
    %510 = arith.mulf %507, %480 : vector<8x128xf32>
    %511 = arith.mulf %506, %508 : vector<8x128xf32>
    %512 = arith.addf %510, %511 : vector<8x128xf32>
    %cst_252 = arith.constant 0.000000e+00 : f32
    %513 = vector.broadcast %cst_252 : f32 to vector<8x128xf32>
    %514 = arith.select %11, %512, %513 : vector<8x128xi1>, vector<8x128xf32>
    %515 = math.tanh %514 : vector<8x128xf32>
    %516 = arith.mulf %509, %515 : vector<8x128xf32>
    %517 = arith.index_cast %c5_i32_239 : i32 to index
    %c0_253 = arith.constant 0 : index
    %c0_254 = arith.constant 0 : index
    %518 = vector.load %arg13[%517, %c0_253, %c0_254] : memref<8x8x128xf32, #tpu.memory_space<vmem>>, vector<1x8x128xf32>
    %519 = vector.shape_cast %518 : vector<1x8x128xf32> to vector<8x128xf32>
    %520 = vector.shape_cast %516 : vector<8x128xf32> to vector<1x8x128xf32>
    tpu.vector_store %arg13[%517, %c0_253, %c0_254], %520 {strides = array<i32>} : memref<8x8x128xf32, #tpu.memory_space<vmem>>, vector<1x8x128xf32>,
    %c6_i32_255 = arith.constant 6 : i32
    %521 = arith.index_cast %c6_i32_255 : i32 to index
    %c0_256 = arith.constant 0 : index
    %c0_257 = arith.constant 0 : index
    %522 = vector.load %arg12[%521, %c0_256, %c0_257] : memref<8x8x128xf32, #tpu.memory_space<vmem>>, vector<1x8x128xf32>
    %523 = vector.shape_cast %522 : vector<1x8x128xf32> to vector<8x128xf32>
    %524 = arith.truncf %516 : vector<8x128xf32> to vector<8x128xbf16>
    %c0_258 = arith.constant 0 : index
    %c0_259 = arith.constant 0 : index
    %525 = vector.load %arg7[%c0_258, %c0_259] : memref<128x128xbf16, #tpu.memory_space<vmem>>, vector<128x128xbf16>
    %cst_260 = arith.constant dense<0.000000e+00> : vector<8x128xf32>
    %526 = tpu.matmul %524, %525, %cst_260 {dimension_numbers = #tpu.dot_dimension_numbers<[1], [0], [0], [1], [0, 0, 1, 1], [], []>} : vector<8x128xbf16>, vector<128x128xbf16>, vector<8x128xf32> -> vector<8x128xf32>
    %527 = arith.addf %523, %526 : vector<8x128xf32>
    %cst_261 = arith.constant 2.000000e+00 : f32
    %528 = vector.broadcast %cst_261 : f32 to vector<8x128xf32>
    %529 = arith.mulf %528, %527 : vector<8x128xf32>
    %530 = arith.select %8, %529, %527 : vector<8x128xi1>, vector<8x128xf32>
    %531 = arith.negf %530 : vector<8x128xf32>
    %532 = math.exp %531 : vector<8x128xf32>
    %cst_262 = arith.constant 1.000000e+00 : f32
    %533 = vector.broadcast %cst_262 : f32 to vector<8x128xf32>
    %534 = arith.addf %533, %532 : vector<8x128xf32>
    %535 = arith.divf %533, %534 : vector<8x128xf32>
    %cst_263 = arith.constant 2.000000e+00 : f32
    %536 = vector.broadcast %cst_263 : f32 to vector<8x128xf32>
    %537 = arith.mulf %536, %535 : vector<8x128xf32>
    %cst_264 = arith.constant 1.000000e+00 : f32
    %538 = vector.broadcast %cst_264 : f32 to vector<8x128xf32>
    %539 = arith.subf %537, %538 : vector<8x128xf32>
    %540 = arith.select %8, %539, %535 : vector<8x128xi1>, vector<8x128xf32>
    %c96_i32_265 = arith.constant 96 : i32
    %541 = tpu.dynamic_rotate %540 by %c96_i32_265 dim 1 : vector<8x128xf32>, i32 -> vector<8x128xf32>
    %c64_i32_266 = arith.constant 64 : i32
    %542 = tpu.dynamic_rotate %540 by %c64_i32_266 dim 1 : vector<8x128xf32>, i32 -> vector<8x128xf32>
    %c32_i32_267 = arith.constant 32 : i32
    %543 = tpu.dynamic_rotate %540 by %c32_i32_267 dim 1 : vector<8x128xf32>, i32 -> vector<8x128xf32>
    %544 = arith.mulf %541, %514 : vector<8x128xf32>
    %545 = arith.mulf %540, %542 : vector<8x128xf32>
    %546 = arith.addf %544, %545 : vector<8x128xf32>
    %cst_268 = arith.constant 0.000000e+00 : f32
    %547 = vector.broadcast %cst_268 : f32 to vector<8x128xf32>
    %548 = arith.select %11, %546, %547 : vector<8x128xi1>, vector<8x128xf32>
    %549 = math.tanh %548 : vector<8x128xf32>
    %550 = arith.mulf %543, %549 : vector<8x128xf32>
    %551 = arith.index_cast %c6_i32_255 : i32 to index
    %c0_269 = arith.constant 0 : index
    %c0_270 = arith.constant 0 : index
    %552 = vector.load %arg13[%551, %c0_269, %c0_270] : memref<8x8x128xf32, #tpu.memory_space<vmem>>, vector<1x8x128xf32>
    %553 = vector.shape_cast %552 : vector<1x8x128xf32> to vector<8x128xf32>
    %554 = vector.shape_cast %550 : vector<8x128xf32> to vector<1x8x128xf32>
    tpu.vector_store %arg13[%551, %c0_269, %c0_270], %554 {strides = array<i32>} : memref<8x8x128xf32, #tpu.memory_space<vmem>>, vector<1x8x128xf32>,
    %c7_i32_271 = arith.constant 7 : i32
    %555 = arith.index_cast %c7_i32_271 : i32 to index
    %c0_272 = arith.constant 0 : index
    %c0_273 = arith.constant 0 : index
    %556 = vector.load %arg12[%555, %c0_272, %c0_273] : memref<8x8x128xf32, #tpu.memory_space<vmem>>, vector<1x8x128xf32>
    %557 = vector.shape_cast %556 : vector<1x8x128xf32> to vector<8x128xf32>
    %558 = arith.truncf %550 : vector<8x128xf32> to vector<8x128xbf16>
    %c0_274 = arith.constant 0 : index
    %c0_275 = arith.constant 0 : index
    %559 = vector.load %arg7[%c0_274, %c0_275] : memref<128x128xbf16, #tpu.memory_space<vmem>>, vector<128x128xbf16>
    %cst_276 = arith.constant dense<0.000000e+00> : vector<8x128xf32>
    %560 = tpu.matmul %558, %559, %cst_276 {dimension_numbers = #tpu.dot_dimension_numbers<[1], [0], [0], [1], [0, 0, 1, 1], [], []>} : vector<8x128xbf16>, vector<128x128xbf16>, vector<8x128xf32> -> vector<8x128xf32>
    %561 = arith.addf %557, %560 : vector<8x128xf32>
    %cst_277 = arith.constant 2.000000e+00 : f32
    %562 = vector.broadcast %cst_277 : f32 to vector<8x128xf32>
    %563 = arith.mulf %562, %561 : vector<8x128xf32>
    %564 = arith.select %8, %563, %561 : vector<8x128xi1>, vector<8x128xf32>
    %565 = arith.negf %564 : vector<8x128xf32>
    %566 = math.exp %565 : vector<8x128xf32>
    %cst_278 = arith.constant 1.000000e+00 : f32
    %567 = vector.broadcast %cst_278 : f32 to vector<8x128xf32>
    %568 = arith.addf %567, %566 : vector<8x128xf32>
    %569 = arith.divf %567, %568 : vector<8x128xf32>
    %cst_279 = arith.constant 2.000000e+00 : f32
    %570 = vector.broadcast %cst_279 : f32 to vector<8x128xf32>
    %571 = arith.mulf %570, %569 : vector<8x128xf32>
    %cst_280 = arith.constant 1.000000e+00 : f32
    %572 = vector.broadcast %cst_280 : f32 to vector<8x128xf32>
    %573 = arith.subf %571, %572 : vector<8x128xf32>
    %574 = arith.select %8, %573, %569 : vector<8x128xi1>, vector<8x128xf32>
    %c96_i32_281 = arith.constant 96 : i32
    %575 = tpu.dynamic_rotate %574 by %c96_i32_281 dim 1 : vector<8x128xf32>, i32 -> vector<8x128xf32>
    %c64_i32_282 = arith.constant 64 : i32
    %576 = tpu.dynamic_rotate %574 by %c64_i32_282 dim 1 : vector<8x128xf32>, i32 -> vector<8x128xf32>
    %c32_i32_283 = arith.constant 32 : i32
    %577 = tpu.dynamic_rotate %574 by %c32_i32_283 dim 1 : vector<8x128xf32>, i32 -> vector<8x128xf32>
    %578 = arith.mulf %575, %548 : vector<8x128xf32>
    %579 = arith.mulf %574, %576 : vector<8x128xf32>
    %580 = arith.addf %578, %579 : vector<8x128xf32>
    %cst_284 = arith.constant 0.000000e+00 : f32
    %581 = vector.broadcast %cst_284 : f32 to vector<8x128xf32>
    %582 = arith.select %11, %580, %581 : vector<8x128xi1>, vector<8x128xf32>
    %583 = math.tanh %582 : vector<8x128xf32>
    %584 = arith.mulf %577, %583 : vector<8x128xf32>
    %585 = arith.index_cast %c7_i32_271 : i32 to index
    %c0_285 = arith.constant 0 : index
    %c0_286 = arith.constant 0 : index
    %586 = vector.load %arg13[%585, %c0_285, %c0_286] : memref<8x8x128xf32, #tpu.memory_space<vmem>>, vector<1x8x128xf32>
    %587 = vector.shape_cast %586 : vector<1x8x128xf32> to vector<8x128xf32>
    %588 = vector.shape_cast %584 : vector<8x128xf32> to vector<1x8x128xf32>
    tpu.vector_store %arg13[%585, %c0_285, %c0_286], %588 {strides = array<i32>} : memref<8x8x128xf32, #tpu.memory_space<vmem>>, vector<1x8x128xf32>,
    %c8_i32_287 = arith.constant 8 : i32
    %c1_288 = arith.constant 1 : index
    %c0_289 = arith.constant 0 : index
    %c0_290 = arith.constant 0 : index
    %589 = vector.load %arg14[%c1_288, %c0_289, %c0_290] : memref<2x8x128xf32, #tpu.memory_space<vmem>>, vector<1x8x128xf32>
    %590 = vector.shape_cast %589 : vector<1x8x128xf32> to vector<8x128xf32>
    %591 = vector.shape_cast %584 : vector<8x128xf32> to vector<1x8x128xf32>
    tpu.vector_store %arg14[%c1_288, %c0_289, %c0_290], %591 {strides = array<i32>} : memref<2x8x128xf32, #tpu.memory_space<vmem>>, vector<1x8x128xf32>,
    %c1_291 = arith.constant 1 : index
    %c0_292 = arith.constant 0 : index
    %c0_293 = arith.constant 0 : index
    %592 = vector.load %arg15[%c1_291, %c0_292, %c0_293] : memref<2x8x128xf32, #tpu.memory_space<vmem>>, vector<1x8x128xf32>
    %593 = vector.shape_cast %592 : vector<1x8x128xf32> to vector<8x128xf32>
    %594 = vector.shape_cast %582 : vector<8x128xf32> to vector<1x8x128xf32>
    tpu.vector_store %arg15[%c1_291, %c0_292, %c0_293], %594 {strides = array<i32>} : memref<2x8x128xf32, #tpu.memory_space<vmem>>, vector<1x8x128xf32>,
    %c0_294 = arith.constant 0 : index
    %c0_295 = arith.constant 0 : index
    %c0_296 = arith.constant 0 : index
    %595 = vector.load %arg13[%c0_294, %c0_295, %c0_296] : memref<8x8x128xf32, #tpu.memory_space<vmem>>, vector<8x8x128xf32>
    %596 = vector.shape_cast %595 : vector<8x8x128xf32> to vector<64x128xf32>
    %597 = arith.truncf %596 : vector<64x128xf32> to vector<64x128xbf16>
    %c0_297 = arith.constant 0 : index
    %c0_298 = arith.constant 0 : index
    %598 = vector.load %arg9[%c0_297, %c0_298] : memref<128x128xbf16, #tpu.memory_space<vmem>>, vector<128x128xbf16>
    %cst_299 = arith.constant dense<0.000000e+00> : vector<64x128xf32>
    %599 = tpu.matmul %597, %598, %cst_299 {dimension_numbers = #tpu.dot_dimension_numbers<[1], [0], [0], [1], [0, 0, 1, 1], [], []>} : vector<64x128xbf16>, vector<128x128xbf16>, vector<64x128xf32> -> vector<64x128xf32>
    %c0_300 = arith.constant 0 : index
    %c0_301 = arith.constant 0 : index
    %600 = vector.load %arg10[%c0_300, %c0_301] : memref<1x128xf32, #tpu.memory_space<vmem>>, vector<1x128xf32>
    %601 = vector.broadcast %600 : vector<1x128xf32> to vector<64x128xf32>
    %602 = arith.addf %599, %601 : vector<64x128xf32>
    %603 = arith.negf %602 : vector<64x128xf32>
    %604 = math.exp %603 : vector<64x128xf32>
    %cst_302 = arith.constant 1.000000e+00 : f32
    %605 = vector.broadcast %cst_302 : f32 to vector<64x128xf32>
    %606 = arith.addf %605, %604 : vector<64x128xf32>
    %607 = arith.divf %605, %606 : vector<64x128xf32>
    %608 = vector.shape_cast %607 : vector<64x128xf32> to vector<8x8x128xf32>
    %c0_303 = arith.constant 0 : index
    %c0_304 = arith.constant 0 : index
    %c0_305 = arith.constant 0 : index
    %609 = vector.load %arg11[%c0_303, %c0_304, %c0_305] : memref<8x8x128xf32, #tpu.memory_space<vmem>>, vector<8x8x128xf32>
    tpu.vector_store %arg11[%c0_303, %c0_304, %c0_305], %608 {strides = array<i32>} : memref<8x8x128xf32, #tpu.memory_space<vmem>>, vector<8x8x128xf32>,
    return
  }
  func.func @transform_0(%arg0: i32, %arg1: i32) -> (i32, i32, i32) {
    %c0_i32 = arith.constant 0 : i32
    %c0_i32_0 = arith.constant 0 : i32
    return %arg1, %arg0, %c0_i32 : i32, i32, i32
  }
  func.func @transform_1(%arg0: i32, %arg1: i32) -> (i32, i32) {
    %c0_i32 = arith.constant 0 : i32
    %c0_i32_0 = arith.constant 0 : i32
    %c0_i32_1 = arith.constant 0 : i32
    return %c0_i32, %c0_i32_0 : i32, i32
  }
  func.func @transform_2(%arg0: i32, %arg1: i32) -> (i32, i32) {
    %c0_i32 = arith.constant 0 : i32
    %c0_i32_0 = arith.constant 0 : i32
    %c0_i32_1 = arith.constant 0 : i32
    return %c0_i32, %c0_i32_0 : i32, i32
  }
  func.func @transform_3(%arg0: i32, %arg1: i32) -> (i32, i32) {
    %c0_i32 = arith.constant 0 : i32
    %c0_i32_0 = arith.constant 0 : i32
    %c0_i32_1 = arith.constant 0 : i32
    return %c0_i32, %c0_i32_0 : i32, i32
  }
  func.func @transform_4(%arg0: i32, %arg1: i32) -> (i32, i32) {
    %c0_i32 = arith.constant 0 : i32
    %c0_i32_0 = arith.constant 0 : i32
    %c0_i32_1 = arith.constant 0 : i32
    return %c0_i32, %c0_i32_0 : i32, i32
  }
  func.func @transform_5(%arg0: i32, %arg1: i32) -> (i32, i32) {
    %c0_i32 = arith.constant 0 : i32
    %c0_i32_0 = arith.constant 0 : i32
    %c0_i32_1 = arith.constant 0 : i32
    return %c0_i32, %c0_i32_0 : i32, i32
  }
  func.func @transform_6(%arg0: i32, %arg1: i32) -> (i32, i32) {
    %c0_i32 = arith.constant 0 : i32
    %c0_i32_0 = arith.constant 0 : i32
    %c0_i32_1 = arith.constant 0 : i32
    return %c0_i32, %c0_i32_0 : i32, i32
  }
  func.func @transform_7(%arg0: i32, %arg1: i32) -> (i32, i32) {
    %c0_i32 = arith.constant 0 : i32
    %c0_i32_0 = arith.constant 0 : i32
    %c0_i32_1 = arith.constant 0 : i32
    return %c0_i32, %c0_i32_0 : i32, i32
  }
  func.func @transform_8(%arg0: i32, %arg1: i32) -> (i32, i32) {
    %c0_i32 = arith.constant 0 : i32
    %c0_i32_0 = arith.constant 0 : i32
    %c0_i32_1 = arith.constant 0 : i32
    return %c0_i32, %c0_i32_0 : i32, i32
  }
  func.func @transform_9(%arg0: i32, %arg1: i32) -> (i32, i32, i32) {
    %c0_i32 = arith.constant 0 : i32
    %c0_i32_0 = arith.constant 0 : i32
    return %arg1, %arg0, %c0_i32 : i32, i32, i32
  }
}

</mosaic_0001>

<bundles_post_ra>
// kernel: tpu_custom_call.1
= control target key start
LH: loop header
LB: loop body
LE: loop exit
PB: predicated region body
PF: predicated region fallthrough
CT: control target
= control target key end

     0   :  { %14 = vsyncpa [#allocation7], 0  ;;  %s4586_s0 = inlined_call_operand.hbm [shape: bf16[8,8,128], index: 0, kind: input, shape index: {}]   ;;  %s4587_s1 = inlined_call_operand.hbm [shape: bf16[128,128], index: 1, kind: input, shape index: {}]   ;;  %s4588_s2 = inlined_call_operand.hbm [shape: bf16[128,128], index: 2, kind: input, shape index: {}]   ;;  %s4589_s3 = inlined_call_operand.vmem [shape: f32[1,128], index: 3, kind: input, shape index: {}]   ;;  %s4590_s4 = inlined_call_operand.hbm [shape: bf16[128,128], index: 4, kind: input, shape index: {}]   ;;  %s4591_s5 = inlined_call_operand.hbm [shape: bf16[128,128], index: 5, kind: input, shape index: {}]   ;;  %s4592_s6 = inlined_call_operand.vmem [shape: f32[1,128], index: 6, kind: input, shape index: {}]   ;;  %s4593_s7 = inlined_call_operand.hbm [shape: bf16[128,128], index: 7, kind: input, shape index: {}]   ;;  %s4594_s8 = inlined_call_operand.vmem [shape: f32[1,128], index: 8, kind: input, shape index: {}]   ;;  %s4595_s9 = inlined_call_operand.hbm [shape: f32[8,8,128], index: 9, kind: output, shape index: {}]  }
   0x1   :  { %15 = vsyncpa [#allocation10], 0 }
   0x2   :  { %16 = vsyncpa [#allocation13], 0 }
   0x3   :  { %17 = vsyncpa [#allocation16], 0 }
   0x4   :  { %18 = vsyncpa [#allocation8], 0  ;;  %s4027_s30 = smov [#allocation9]   ;;  %s4028_s11 = smov [#allocation12]  }
   0x5   :  { %s36_s10 = sshll.u32 %s4027_s30, 4  ;;  %s62_s12 = sshll.u32 %s4028_s11, 4  ;;  %s37_s10 = int_to_ptr.vmem [resolvable:$true] %s36_s10  ;;  %s63_s12 = int_to_ptr.vmem [resolvable:$true] %s62_s12 }
   0x6   :  { %s3885_s13 = scalar_lea.vmem %s37_s10, 1024  ;;  %p3890_p1 = scmp.lt.s32.totalorder %s37_s10, %s37_s10 }
   0x7   :  { %p3886_p0 = scmp.ne.s32.totalorder %s37_s10, %s3885_s13  ;;  %p3891_p2 = scmp.lt.s32.totalorder %s3885_s13, %s3885_s13 }
   0x9   :  { %p3892_p3 = por %p3891_p2, %p3890_p1 }
   0xb   :  { %p3893_p4 = pnand %p3892_p3, %p3886_p0 }
   0xd   :  { %3896 = shalt.err (!%p3893_p4)
}
   0xe   :  { %s4029_s14 = smov 64   ;;  %s4030_s15 = smov 4  }
   0xf   :  { %42 = dma.hbm_to_vmem [thread:$0]  %s4587_s1, 1024, %s37_s10, [#allocation10], %s4029_s14, %s4029_s14, %s4030_s15  }
  0x10   :  { %s3905_s18 = scalar_lea.vmem %s63_s12, 1024  ;;  %p3910_p6 = scmp.lt.s32.totalorder %s63_s12, %s63_s12 }
  0x11   :  { %p3906_p5 = scmp.ne.s32.totalorder %s63_s12, %s3905_s18  ;;  %p3911_p7 = scmp.lt.s32.totalorder %s3905_s18, %s3905_s18 }
  0x13   :  { %p3912_p8 = por %p3911_p7, %p3910_p6 }
  0x15   :  { %p3913_p9 = pnand %p3912_p8, %p3906_p5 }
  0x17   :  { %3916 = shalt.err (!%p3913_p9)
}
  0x18   :  { %68 = dma.hbm_to_vmem [thread:$0]  %s4590_s4, 1024, %s63_s12, [#allocation13], %s4029_s14, %s4029_s14, %s4030_s15  }
  0x19   :  { %s4031_s21 = smov [#allocation6]   ;;  %s4032_s23 = smov [#allocation11]  }
  0x1a   :  { %s24_s22 = sshll.u32 %s4031_s21, 4  ;;  %s48_s24 = sshll.u32 %s4032_s23, 4  ;;  %s25_s22 = int_to_ptr.vmem [resolvable:$true] %s24_s22  ;;  %s49_s24 = int_to_ptr.vmem [resolvable:$true] %s48_s24 }
  0x1b   :  { %s3925_s1 = scalar_lea.vmem %s25_s22, 512  ;;  %p3930_p11 = scmp.lt.s32.totalorder %s25_s22, %s25_s22 }
  0x1c   :  { %p3926_p10 = scmp.ne.s32.totalorder %s25_s22, %s3925_s1  ;;  %p3931_p12 = scmp.lt.s32.totalorder %s3925_s1, %s3925_s1 }
  0x1e   :  { %p3932_p13 = por %p3931_p12, %p3930_p11 }
  0x20   :  { %p3933_p0 = pnand %p3932_p13, %p3926_p10 }
  0x22   :  { %3936 = shalt.err (!%p3933_p0)
}
  0x23   :  { %30 = dma.hbm_to_vmem [thread:$0]  %s4586_s0, 512, %s25_s22, [#allocation7], %s4029_s14, %s4029_s14, %s4030_s15  }
  0x24   :  { %s3945_s4 = scalar_lea.vmem %s49_s24, 1024  ;;  %p3950_p2 = scmp.lt.s32.totalorder %s49_s24, %s49_s24 }
  0x25   :  { %p3946_p1 = scmp.ne.s32.totalorder %s49_s24, %s3945_s4  ;;  %p3951_p3 = scmp.lt.s32.totalorder %s3945_s4, %s3945_s4 }
  0x27   :  { %p3952_p4 = por %p3951_p3, %p3950_p2 }
  0x29   :  { %p3953_p5 = pnand %p3952_p4, %p3946_p1 }
  0x2b   :  { %3956 = shalt.err (!%p3953_p5)
}
  0x2c   :  { %54 = dma.hbm_to_vmem [thread:$0]  %s4588_s2, 1024, %s49_s24, [#allocation10], %s4029_s14, %s4029_s14, %s4030_s15  }
  0x2d   :  { %s4033_s29 = smov [#allocation14]   ;;  %s4034_s10 = smov [#allocation15]  }
  0x2e   :  { %s74_s30 = sshll.u32 %s4033_s29, 4  ;;  %s88_s11 = sshll.u32 %s4034_s10, 4  ;;  %s75_s30 = int_to_ptr.vmem [resolvable:$true] %s74_s30  ;;  %s89_s11 = int_to_ptr.vmem [resolvable:$true] %s88_s11 }
  0x2f   :  { %s3965_s0 = scalar_lea.vmem %s75_s30, 1024  ;;  %p3970_p7 = scmp.lt.s32.totalorder %s75_s30, %s75_s30 }
  0x30   :  { %p3966_p6 = scmp.ne.s32.totalorder %s75_s30, %s3965_s0  ;;  %p3971_p8 = scmp.lt.s32.totalorder %s3965_s0, %s3965_s0 }
  0x32   :  { %p3972_p9 = por %p3971_p8, %p3970_p7 }
  0x34   :  { %p3973_p10 = pnand %p3972_p9, %p3966_p6 }
  0x36   :  { %3976 = shalt.err (!%p3973_p10)
}
  0x37   :  { %80 = dma.hbm_to_vmem [thread:$0]  %s4591_s5, 1024, %s75_s30, [#allocation13], %s4029_s14, %s4029_s14, %s4030_s15  }
  0x38   :  { %s3985_s2 = scalar_lea.vmem %s89_s11, 1024  ;;  %p3990_p12 = scmp.lt.s32.totalorder %s89_s11, %s89_s11 }
  0x39   :  { %p3986_p11 = scmp.ne.s32.totalorder %s89_s11, %s3985_s2  ;;  %p3991_p13 = scmp.lt.s32.totalorder %s3985_s2, %s3985_s2 }
  0x3b   :  { %p3992_p0 = por %p3991_p13, %p3990_p12 }
  0x3d   :  { %p3993_p1 = pnand %p3992_p0, %p3986_p11 }
  0x3f   :  { %3996 = shalt.err (!%p3993_p1)
}
  0x40   :  { %94 = dma.hbm_to_vmem [thread:$0]  %s4593_s7, 1024, %s89_s11, [#allocation16], %s4029_s14, %s4029_s14, %s4030_s15  }
  0x41   :  { %4017 = dma.done.wait [#allocation7], 512  }
  0x42   :  { %4018 = vsyncadd [#allocation7], 4294966784 }
  0x43   :  { %4019 = dma.done.wait [#allocation10], 2048  }
  0x44   :  { %4020 = vsyncadd [#allocation10], 4294965248 }
  0x45   :  { %4021 = dma.done.wait [#allocation13], 2048  }
  0x46   :  { %4022 = vsyncadd [#allocation13], 4294965248 }
  0x47   :  { %4023 = dma.done.wait [#allocation16], 1024  }
  0x48   :  { %4024 = vsyncadd [#allocation16], 4294966272  ;;  %v4035_v0 = vmov 0.0   ;;  %vm4036_vm0 = vmmov 0   ;;  %v3593_v1 = vld [vmem:[#allocation9 + $0x38] sm:$0xff]   ;;  %v3594_v2 = vld [vmem:[#allocation9 + $0x30] sm:$0xff]   ;;  %v124_v39 = vlaneseq }
  0x49   :  { %3229 = vmatprep.subr.bf16.mxu0 %v4035_v0  ;;  %3245 = vmatprep.mubr.msk.bf16.mxu0 %vm4036_vm0, %v4035_v0  ;;  %v3595_v3 = vld [vmem:[#allocation9 + $0x28] sm:$0xff]   ;;  %v3596_v4 = vld [vmem:[#allocation9 + $0x20] sm:$0xff]   ;;  %v3597_v6 = vld [vmem:[#allocation9 + $0x18] sm:$0xff]   ;;  %v4037_v21 = vmov 0.0|0.0   ;;  %s4039_s15 = smov 96  }
  0x4a   :  { %3185 = vmatprep.subr.bf16.mxu1 %v3593_v1  ;;  %v3601_v5 = vld [vmem:[#allocation6] sm:$0xff]   ;;  %v3598_v7 = vld [vmem:[#allocation9 + $0x10] sm:$0xff]   ;;  %v3599_v8 = vld [vmem:[#allocation9 + $0x8] sm:$0xff]   ;;  %v4164_v40 = vand.u32 127, %v124_v39 }
  0x4b   :  { %3186 = vmatpush3.bf16.msra.mxu1 %v3593_v1  ;;  %3201 = vmatprep.mubr.bf16.mxu1 %v3601_v5  ;;  %v3600_v9 = vld [vmem:[#allocation9] sm:$0xff]   ;;  %v3602_v10 = vld [vmem:[#allocation6 + $0x8] sm:$0xff]   ;;  %v3603_v11 = vld [vmem:[#allocation11 + $0x38] sm:$0xff]  }
  0x4c   :  { %3187 = vmatprep.subr.bf16.mxu1 %v3594_v2  ;;  %v3607_v12 = vld [vmem:[#allocation6 + $0x10] sm:$0xff]   ;;  %v3609_v14 = vld [vmem:[#allocation6 + $0x18] sm:$0xff]   ;;  %v3605_v15 = vld [vmem:[#allocation11 + $0x28] sm:$0xff]   ;;  %vm126_vm1 = vcmp.ge.s32.totalorder %v4164_v40, 64  ;;  %vm127_vm2 = vcmp.lt.s32.totalorder %v4164_v40, 96  ;;  %vm129_vm4 = vcmp.lt.s32.totalorder %v4164_v40, 32 }
  0x4d   :  { %v3604_v13 = vld [vmem:[#allocation11 + $0x30] sm:$0xff]   ;;  %v3606_v16 = vld [vmem:[#allocation11 + $0x20] sm:$0xff]   ;;  %v3608_v17 = vld [vmem:[#allocation11 + $0x18] sm:$0xff]  }
  0x4e   :  { %v3610_v18 = vld [vmem:[#allocation11 + $0x10] sm:$0xff]   ;;  %v3611_v19 = vld [vmem:[#allocation11 + $0x8] sm:$0xff]   ;;  %v3612_v20 = vld [vmem:[#allocation11] sm:$0xff]  }
  0x4f   :  { %3188 = vmatpush3.bf16.msra.mxu1 %v3594_v2  ;;  %v3613_v22 = vld [vmem:[#allocation11 + $0x38] sm:$0xff]   ;;  %v2806_v23 = vld [vmem:[%s4589_s3] ss:$0 sm:$0xff]  ;;  %vm4168_vm3 = vmand %vm126_vm1, %vm127_vm2  ;;  %s4038_s3 = smov 32  }
  0x50   :  { %3189 = vmatprep.subr.bf16.mxu1 %v3595_v3  ;;  %3230 = vmatpush3.bf16.msra.mxu0 %v3613_v22  ;;  %v3614_v53 = vld [vmem:[#allocation11 + $0x30] sm:$0xff]   ;;  %v3615_v54 = vld [vmem:[#allocation11 + $0x28] sm:$0xff]   ;;  %v3616_v55 = vld [vmem:[#allocation11 + $0x20] sm:$0xff]  }
  0x51   :  { %3231 = vmatprep.subr.bf16.mxu0 %v4035_v0  ;;  %v3617_v58 = vld [vmem:[#allocation11 + $0x18] sm:$0xff]   ;;  %v3618_v61 = vld [vmem:[#allocation11 + $0x10] sm:$0xff]   ;;  %v3619_v62 = vld [vmem:[#allocation11 + $0x8] sm:$0xff]  }
  0x52   :  { %v3620_v63 = vld [vmem:[#allocation11] sm:$0xff]  }
  0x53   :  { %3190 = vmatpush3.bf16.msra.mxu1 %v3595_v3  ;;  %v3628_v39 = vld [vmem:[#allocation11] sm:$0xff]  }
  0x54   :  { %3191 = vmatprep.subr.bf16.mxu1 %v3596_v4  ;;  %3232 = vmatpush3.bf16.msra.mxu0 %v3614_v53  ;;  %v3630_v53 = vld [vmem:[#allocation11 + $0x30] sm:$0xff]  }
  0x55   :  { %3233 = vmatprep.subr.bf16.mxu0 %v4035_v0 }
  0x57   :  { %3192 = vmatpush3.bf16.msra.mxu1 %v3596_v4 }
  0x58   :  { %3193 = vmatprep.subr.bf16.mxu1 %v3597_v6  ;;  %3234 = vmatpush3.bf16.msra.mxu0 %v3615_v54 }
  0x59   :  { %3235 = vmatprep.subr.bf16.mxu0 %v4035_v0 }
  0x5b   :  { %3194 = vmatpush3.bf16.msra.mxu1 %v3597_v6 }
  0x5c   :  { %3195 = vmatprep.subr.bf16.mxu1 %v3598_v7  ;;  %3236 = vmatpush3.bf16.msra.mxu0 %v3616_v55 }
  0x5d   :  { %3237 = vmatprep.subr.bf16.mxu0 %v4035_v0 }
  0x5f   :  { %3196 = vmatpush3.bf16.msra.mxu1 %v3598_v7 }
  0x60   :  { %3197 = vmatprep.subr.bf16.mxu1 %v3599_v8  ;;  %3238 = vmatpush3.bf16.msra.mxu0 %v3617_v58 }
  0x61   :  { %3239 = vmatprep.subr.bf16.mxu0 %v4035_v0 }
  0x63   :  { %3198 = vmatpush3.bf16.msra.mxu1 %v3599_v8 }
  0x64   :  { %3199 = vmatprep.subr.bf16.mxu1 %v3600_v9  ;;  %3240 = vmatpush3.bf16.msra.mxu0 %v3618_v61 }
  0x65   :  { %3241 = vmatprep.subr.bf16.mxu0 %v4035_v0 }
  0x67   :  { %3200 = vmatpush3.bf16.msra.mxu1 %v3600_v9 }
  0x68   :  { %3209 = vmatprep.subr.bf16.mxu1 %v4035_v0  ;;  %3242 = vmatpush3.bf16.msra.mxu0 %v3619_v62 }
  0x69   :  { %3243 = vmatprep.subr.bf16.mxu0 %v4035_v0 }
  0x6a   :  { %3202 = vmatmul.mubr.bf16.vlgmr.msra.gmra.mxu1 %v3602_v10 }
  0x6b   :  { %3210 = vmatpush3.bf16.msra.mxu1 %v3603_v11  ;;  %3205 = vmatprep.mubr.bf16.mxu1 %v3607_v12  ;;  %v3621_v11 = vld [vmem:[#allocation11 + $0x38] sm:$0xff]   ;;  %v3622_v12 = vld [vmem:[#allocation11 + $0x30] sm:$0xff]  }
  0x6c   :  { %3211 = vmatprep.subr.bf16.mxu1 %v4035_v0  ;;  %3244 = vmatpush3.bf16.msra.mxu0 %v3620_v63 }
  0x6d   :  { %3269 = vmatprep.subr.bf16.mxu0 %v4035_v0 }
  0x6f   :  { %3212 = vmatpush3.bf16.msra.mxu1 %v3604_v13 }
  0x70   :  { %3213 = vmatprep.subr.bf16.mxu1 %v4035_v0 }
  0x72   :  { %3206 = vmatmul.mubr.bf16.gmra.mxu1 %v3609_v14 }
  0x73   :  { %3214 = vmatpush3.bf16.msra.mxu1 %v3605_v15  ;;  %3225 = vmatprep.mubr.msk.bf16.mxu1 %vm4036_vm0, %v4035_v0 }
  0x74   :  { %3215 = vmatprep.subr.bf16.mxu1 %v4035_v0 }
  0x77   :  { %3216 = vmatpush3.bf16.msra.mxu1 %v3606_v16 }
  0x78   :  { %3217 = vmatprep.subr.bf16.mxu1 %v4035_v0 }
  0x7b   :  { %3218 = vmatpush3.bf16.msra.mxu1 %v3608_v17 }
  0x7c   :  { %3219 = vmatprep.subr.bf16.mxu1 %v4035_v0 }
  0x7f   :  { %3220 = vmatpush3.bf16.msra.mxu1 %v3610_v18 }
  0x80   :  { %3221 = vmatprep.subr.bf16.mxu1 %v4035_v0 }
  0x83   :  { %3222 = vmatpush3.bf16.msra.mxu1 %v3611_v19 }
  0x84   :  { %3223 = vmatprep.subr.bf16.mxu1 %v4035_v0 }
  0x87   :  { %3224 = vmatpush3.bf16.msra.mxu1 %v3612_v20 }
  0x88   :  { %3249 = vmatprep.subr.bf16.mxu1 %v4035_v0 }
  0x8a   :  { %3226 = vmatmul.mubr.bf16.vlgmr.msra.gmra.mxu1 %v4037_v21 }
  0x8b   :  { %3265 = vmatprep.mubr.msk.bf16.mxu1 %vm4036_vm0, %v4035_v0  ;;  %3250 = vmatpush3.bf16.msra.mxu1 %v3621_v11 }
  0x8c   :  { %3251 = vmatprep.subr.bf16.mxu1 %v4035_v0 }
  0x8f   :  { %3252 = vmatpush3.bf16.msra.mxu1 %v3622_v12 }
  0x90   :  { %3253 = vmatprep.subr.bf16.mxu1 %v4035_v0 }
 0x12a   :  { %v3203_v24 = vpop.f32.mrf.mxu1 }
 0x12b   :  { %v4150_v25 = vadd.f32 %v3203_v24, %v2806_v23  ;;  %v3623_v24 = vld [vmem:[#allocation11 + $0x28] sm:$0xff]  }
 0x12c   :  { %v267_v26 = vpop.f32.mrf.mxu1  ;;  %3254 = vmatpush3.bf16.msra.mxu1 %v3623_v24 }
 0x12d   :  { %v268_v41 = vadd.f32 %v2806_v23, %v267_v26  ;;  %3255 = vmatprep.subr.bf16.mxu1 %v4035_v0  ;;  %v3624_v26 = vld [vmem:[#allocation11 + $0x20] sm:$0xff]  }
 0x12e   :  { %v3204_v27 = vpop.f32.mrf.mxu1 }
 0x12f   :  { %v4152_v28 = vadd.f32 %v3204_v27, %v2806_v23  ;;  %v3625_v27 = vld [vmem:[#allocation11 + $0x18] sm:$0xff]  }
 0x130   :  { %v270_v29 = vpop.f32.mrf.mxu1  ;;  %3256 = vmatpush3.bf16.msra.mxu1 %v3624_v26 }
 0x131   :  { %v4154_v30 = vadd.f32 %v2806_v23, %v270_v29  ;;  %3257 = vmatprep.subr.bf16.mxu1 %v4035_v0 }
 0x132   :  { %v3207_v31 = vpop.f32.mrf.mxu1 }
 0x133   :  { %v4156_v32 = vadd.f32 %v3207_v31, %v2806_v23 }
 0x134   :  { %v283_v33 = vpop.f32.mrf.mxu1  ;;  %3258 = vmatpush3.bf16.msra.mxu1 %v3625_v27 }
 0x135   :  { %v4158_v34 = vadd.f32 %v2806_v23, %v283_v33  ;;  %3259 = vmatprep.subr.bf16.mxu1 %v4035_v0  ;;  %v3626_v33 = vld [vmem:[#allocation11 + $0x10] sm:$0xff]  }
 0x136   :  { %v3208_v35 = vpop.f32.mrf.mxu1 }
 0x137   :  { %v4160_v36 = vadd.f32 %v3208_v35, %v2806_v23 }
 0x138   :  { %v286_v37 = vpop.f32.mrf.mxu1  ;;  %3260 = vmatpush3.bf16.msra.mxu1 %v3626_v33 }
 0x139   :  { %v4162_v38 = vadd.f32 %v2806_v23, %v286_v37  ;;  %3261 = vmatprep.subr.bf16.mxu1 %v4035_v0  ;;  %v3627_v37 = vld [vmem:[#allocation11 + $0x8] sm:$0xff]  }
 0x13c   :  { %3262 = vmatpush3.bf16.msra.mxu1 %v3627_v37 }
 0x13d   :  { %3263 = vmatprep.subr.bf16.mxu1 %v4035_v0 }
 0x140   :  { %3264 = vmatpush3.bf16.msra.mxu1 %v3628_v39 }
 0x141   :  { %3289 = vmatprep.subr.bf16.mxu1 %v4035_v0 }
 0x14a   :  { %v408_v42 = vpop.f32.mrf.mxu1 }
 0x14b   :  { %v414_v43 = vadd.f32 %v408_v42, %v268_v41 }
 0x14c   :  { %v3227_v45 = vpop.f32.mrf.mxu1 }
 0x14d   :  { %v415_v46 = vmul.f32 2.0, %v414_v43 }
 0x14e   :  { %v411_v47 = vpop.f32.mrf.mxu1 }
 0x14f   :  { %v416_v48 = vsel %vm4168_vm3, %v415_v46, %v414_v43 }
 0x150   :  { %v2827_v49 = vmul.f32 -1.442695, %v416_v48  ;;  %v3228_v50 = vpop.f32.mrf.mxu1 }
 0x152   :  { %3749 = vpow2.f32 %v2827_v49 }
 0x15f   :  { %v3750_v51 = vpop.eup %3749 }
 0x160   :  { %v420_v52 = vadd.f32 1.0, %v3750_v51 }
 0x162   :  { %3751 = vrcp.f32 %v420_v52  ;;  %v3629_v52 = vld [vmem:[#allocation11 + $0x38] sm:$0xff]  }
 0x16f   :  { %v3752_v56 = vpop.eup %3751 }
 0x170   :  { %v423_v57 = vmul.f32 2.0, %v3752_v56 }
 0x172   :  { %v2828_v59 = vadd.f32 -1.0, %v423_v57 }
 0x174   :  { %v425_v60 = vsel %vm4168_vm3, %v2828_v59, %v3752_v56 }
 0x175   :  { %430 = vrot.lane.b32.xlu1 %v425_v60, %s4038_s3  ;;  %426 = vrot.lane.b32.xlu0 %v425_v60, %s4039_s15 }
 0x179   :  { %428 = vrot.lane.b32.xlu0 %v425_v60, %s4029_s14 }
 0x1e7   :  { %v427_v1 = vpop.permute.xlu0 %426  ;;  %v431_v8 = vpop.permute.xlu1 %430 }
 0x1e8   :  { %v432_v3 = vmul.f32 0.0, %v427_v1  ;;  %v3631_v1 = vld [vmem:[#allocation11 + $0x28] sm:$0xff]  }
 0x1eb   :  { %v429_v2 = vpop.permute.xlu0 %428 }
 0x1ec   :  { %v433_v4 = vmul.f32 %v429_v2, %v425_v60  ;;  %v3632_v2 = vld [vmem:[#allocation11 + $0x20] sm:$0xff]  }
 0x1ee   :  { %v434_v5 = vadd.f32 %v433_v4, %v432_v3 }
 0x1f0   :  { %v435_v6 = vsel %vm129_vm4, %v434_v5, 0.0 }
 0x1f1   :  { %3753 = vtanh.f32 %v435_v6 }
 0x1fe   :  { %v3754_v7 = vpop.eup %3753 }
 0x1ff   :  { %v4189_v9 = vmul.f32 %v3754_v7, %v431_v8  ;;  %v3635_v8 = vld [vmem:[#allocation11 + $0x8] sm:$0xff]  }
 0x201   :  { %v441_v10 = vpack.c.bf16 %v4189_v9, %v4189_v9 }
 0x203   :  { %3246 = vmatmul.mubr.bf16.vlgmr.msra.gmra.mxu0 %v441_v10  ;;  %v3636_v10 = vld [vmem:[#allocation11] sm:$0xff]  }
 0x204   :  { %3285 = vmatprep.mubr.msk.bf16.mxu0 %vm4036_vm0, %v4035_v0  ;;  %3270 = vmatpush3.bf16.msra.mxu0 %v3629_v52 }
 0x205   :  { %3271 = vmatprep.subr.bf16.mxu0 %v4035_v0 }
 0x208   :  { %3272 = vmatpush3.bf16.msra.mxu0 %v3630_v53 }
 0x209   :  { %3273 = vmatprep.subr.bf16.mxu0 %v4035_v0 }
 0x20c   :  { %3274 = vmatpush3.bf16.msra.mxu0 %v3631_v1 }
 0x20d   :  { %3275 = vmatprep.subr.bf16.mxu0 %v4035_v0 }
 0x210   :  { %3276 = vmatpush3.bf16.msra.mxu0 %v3632_v2 }
 0x211   :  { %3277 = vmatprep.subr.bf16.mxu0 %v4035_v0 }
 0x2c3   :  { %v540_v13 = vpop.f32.mrf.mxu0 }
 0x2c4   :  { %v546_v14 = vadd.f32 %v540_v13, %v4154_v30 }
 0x2c5   :  { %v3247_v15 = vpop.f32.mrf.mxu0 }
 0x2c6   :  { %v547_v16 = vmul.f32 2.0, %v546_v14 }
 0x2c7   :  { %v543_v17 = vpop.f32.mrf.mxu0 }
 0x2c8   :  { %v548_v18 = vsel %vm4168_vm3, %v547_v16, %v546_v14 }
 0x2c9   :  { %v2837_v19 = vmul.f32 -1.442695, %v548_v18  ;;  %v3248_v20 = vpop.f32.mrf.mxu0 }
 0x2cb   :  { %3755 = vpow2.f32 %v2837_v19 }
 0x2d8   :  { %v3756_v22 = vpop.eup %3755 }
 0x2d9   :  { %v552_v23 = vadd.f32 1.0, %v3756_v22  ;;  %v3637_v22 = vld [vmem:[#allocation11 + $0x38] sm:$0xff]  }
 0x2db   :  { %3757 = vrcp.f32 %v552_v23  ;;  %v3638_v23 = vld [vmem:[#allocation11 + $0x30] sm:$0xff]  }
 0x2e8   :  { %v3758_v29 = vpop.eup %3757 }
 0x2e9   :  { %v555_v30 = vmul.f32 2.0, %v3758_v29 }
 0x2eb   :  { %v2838_v31 = vadd.f32 -1.0, %v555_v30 }
 0x2ed   :  { %v557_v35 = vsel %vm4168_vm3, %v2838_v31, %v3758_v29 }
 0x2ee   :  { %560 = vrot.lane.b32.xlu0 %v557_v35, %s4029_s14  ;;  %558 = vrot.lane.b32.xlu1 %v557_v35, %s4039_s15 }
 0x2f2   :  { %562 = vrot.lane.b32.xlu1 %v557_v35, %s4038_s3 }
 0x360   :  { %v561_v41 = vpop.permute.xlu0 %560  ;;  %v559_v42 = vpop.permute.xlu1 %558 }
 0x361   :  { %v565_v43 = vmul.f32 %v561_v41, %v557_v35  ;;  %v564_v45 = vmul.f32 %v559_v42, %v435_v6  ;;  %v3634_v6 = vld [vmem:[#allocation11 + $0x10] sm:$0xff]   ;;  %v3639_v41 = vld [vmem:[#allocation11 + $0x28] sm:$0xff]   ;;  %v3640_v42 = vld [vmem:[#allocation11 + $0x20] sm:$0xff]  }
 0x363   :  { %v566_v46 = vadd.f32 %v565_v43, %v564_v45 }
 0x364   :  { %v563_v49 = vpop.permute.xlu1 %562 }
 0x365   :  { %v567_v47 = vsel %vm129_vm4, %v566_v46, 0.0 }
 0x366   :  { %3759 = vtanh.f32 %v567_v47 }
 0x373   :  { %v3760_v48 = vpop.eup %3759 }
 0x374   :  { %v4213_v50 = vmul.f32 %v3760_v48, %v563_v49  ;;  %v3643_v49 = vld [vmem:[#allocation11 + $0x8] sm:$0xff]  }
 0x376   :  { %v574_v51 = vpack.c.bf16 %v4213_v50, %v4213_v50 }
 0x378   :  { %3266 = vmatmul.mubr.bf16.vlgmr.msra.gmra.mxu1 %v574_v51  ;;  %v3644_v51 = vld [vmem:[#allocation11] sm:$0xff]  }
 0x379   :  { %3305 = vmatprep.mubr.msk.bf16.mxu1 %vm4036_vm0, %v4035_v0  ;;  %3290 = vmatpush3.bf16.msra.mxu1 %v3637_v22 }
 0x37a   :  { %3291 = vmatprep.subr.bf16.mxu1 %v4035_v0 }
 0x37d   :  { %3292 = vmatpush3.bf16.msra.mxu1 %v3638_v23 }
 0x37e   :  { %3293 = vmatprep.subr.bf16.mxu1 %v4035_v0 }
 0x381   :  { %3294 = vmatpush3.bf16.msra.mxu1 %v3639_v41  ;;  %v3655_v41 = vld [vmem:[#allocation11 + $0x28] sm:$0xff]  }
 0x382   :  { %3295 = vmatprep.subr.bf16.mxu1 %v4035_v0 }
 0x385   :  { %3296 = vmatpush3.bf16.msra.mxu1 %v3640_v42 }
 0x386   :  { %3297 = vmatprep.subr.bf16.mxu1 %v4035_v0 }
 0x438   :  { %v673_v54 = vpop.f32.mrf.mxu1 }
 0x439   :  { %v679_v55 = vadd.f32 %v673_v54, %v4150_v25  ;;  %v3633_v25 = vld [vmem:[#allocation11 + $0x18] sm:$0xff]  }
 0x43a   :  { %v3267_v56 = vpop.f32.mrf.mxu1  ;;  %3278 = vmatpush3.bf16.msra.mxu0 %v3633_v25 }
 0x43b   :  { %v680_v57 = vmul.f32 2.0, %v679_v55  ;;  %3279 = vmatprep.subr.bf16.mxu0 %v4035_v0 }
 0x43c   :  { %v676_v58 = vpop.f32.mrf.mxu1 }
 0x43d   :  { %v681_v59 = vsel %vm4168_vm3, %v680_v57, %v679_v55 }
 0x43e   :  { %v2847_v60 = vmul.f32 -1.442695, %v681_v59  ;;  %v3268_v61 = vpop.f32.mrf.mxu1  ;;  %3280 = vmatpush3.bf16.msra.mxu0 %v3634_v6 }
 0x43f   :  { %3281 = vmatprep.subr.bf16.mxu0 %v4035_v0 }
 0x440   :  { %3761 = vpow2.f32 %v2847_v60 }
 0x442   :  { %3282 = vmatpush3.bf16.msra.mxu0 %v3635_v8 }
 0x443   :  { %3283 = vmatprep.subr.bf16.mxu0 %v4035_v0 }
 0x446   :  { %3284 = vmatpush3.bf16.msra.mxu0 %v3636_v10 }
 0x447   :  { %3309 = vmatprep.subr.bf16.mxu0 %v4035_v0 }
 0x44d   :  { %v3762_v62 = vpop.eup %3761 }
 0x44e   :  { %v685_v63 = vadd.f32 1.0, %v3762_v62  ;;  %v3645_v62 = vld [vmem:[#allocation11 + $0x38] sm:$0xff]  }
 0x450   :  { %3763 = vrcp.f32 %v685_v63  ;;  %v3646_v63 = vld [vmem:[#allocation11 + $0x30] sm:$0xff]  }
 0x45d   :  { %v3764_v3 = vpop.eup %3763 }
 0x45e   :  { %v688_v4 = vmul.f32 2.0, %v3764_v3 }
 0x460   :  { %v2848_v5 = vadd.f32 -1.0, %v688_v4 }
 0x462   :  { %v690_v7 = vsel %vm4168_vm3, %v2848_v5, %v3764_v3 }
 0x463   :  { %693 = vrot.lane.b32.xlu1 %v690_v7, %s4029_s14  ;;  %691 = vrot.lane.b32.xlu0 %v690_v7, %s4039_s15 }
 0x467   :  { %695 = vrot.lane.b32.xlu0 %v690_v7, %s4038_s3 }
 0x4d5   :  { %v694_v11 = vpop.permute.xlu1 %693  ;;  %v692_v12 = vpop.permute.xlu0 %691 }
 0x4d6   :  { %v698_v13 = vmul.f32 %v694_v11, %v690_v7  ;;  %v697_v14 = vmul.f32 %v692_v12, %v567_v47  ;;  %v3642_v47 = vld [vmem:[#allocation11 + $0x10] sm:$0xff]   ;;  %v3647_v11 = vld [vmem:[#allocation11 + $0x28] sm:$0xff]   ;;  %v3648_v12 = vld [vmem:[#allocation11 + $0x20] sm:$0xff]  }
 0x4d8   :  { %v699_v15 = vadd.f32 %v698_v13, %v697_v14 }
 0x4d9   :  { %v696_v18 = vpop.permute.xlu0 %695 }
 0x4da   :  { %v700_v16 = vsel %vm129_vm4, %v699_v15, 0.0 }
 0x4db   :  { %3765 = vtanh.f32 %v700_v16 }
 0x4e8   :  { %v3766_v17 = vpop.eup %3765 }
 0x4e9   :  { %v4237_v19 = vmul.f32 %v3766_v17, %v696_v18  ;;  %v3651_v18 = vld [vmem:[#allocation11 + $0x8] sm:$0xff]  }
 0x4eb   :  { %v707_v20 = vpack.c.bf16 %v4237_v19, %v4237_v19 }
 0x4ed   :  { %3286 = vmatmul.mubr.bf16.vlgmr.msra.gmra.mxu0 %v707_v20  ;;  %v3652_v20 = vld [vmem:[#allocation11] sm:$0xff]  }
 0x4ee   :  { %3325 = vmatprep.mubr.msk.bf16.mxu0 %vm4036_vm0, %v4035_v0  ;;  %3310 = vmatpush3.bf16.msra.mxu0 %v3645_v62  ;;  %v3661_v62 = vld [vmem:[#allocation12 + $0x38] sm:$0xff]  }
 0x4ef   :  { %3311 = vmatprep.subr.bf16.mxu0 %v4035_v0 }
 0x4f2   :  { %3312 = vmatpush3.bf16.msra.mxu0 %v3646_v63 }
 0x4f3   :  { %3313 = vmatprep.subr.bf16.mxu0 %v4035_v0 }
 0x4f6   :  { %3314 = vmatpush3.bf16.msra.mxu0 %v3647_v11  ;;  %v1380_v11 = vpack.c.bf16 %v4213_v50, %v4189_v9  ;;  %v3668_v9 = vld [vmem:[#allocation12] sm:$0xff]  }
 0x4f7   :  { %3315 = vmatprep.subr.bf16.mxu0 %v4035_v0 }
 0x4fa   :  { %3316 = vmatpush3.bf16.msra.mxu0 %v3648_v12  ;;  %v3663_v12 = vld [vmem:[#allocation12 + $0x28] sm:$0xff]  }
 0x4fb   :  { %3317 = vmatprep.subr.bf16.mxu0 %v4035_v0 }
 0x5ad   :  { %v806_v24 = vpop.f32.mrf.mxu0 }
 0x5ae   :  { %v812_v26 = vadd.f32 %v806_v24, %v4152_v28  ;;  %v3641_v28 = vld [vmem:[#allocation11 + $0x18] sm:$0xff]  }
 0x5af   :  { %v3287_v27 = vpop.f32.mrf.mxu0  ;;  %3298 = vmatpush3.bf16.msra.mxu1 %v3641_v28 }
 0x5b0   :  { %v813_v29 = vmul.f32 2.0, %v812_v26  ;;  %3299 = vmatprep.subr.bf16.mxu1 %v4035_v0 }
 0x5b1   :  { %v809_v30 = vpop.f32.mrf.mxu0 }
 0x5b2   :  { %v814_v31 = vsel %vm4168_vm3, %v813_v29, %v812_v26 }
 0x5b3   :  { %v2857_v33 = vmul.f32 -1.442695, %v814_v31  ;;  %v3288_v35 = vpop.f32.mrf.mxu0  ;;  %3300 = vmatpush3.bf16.msra.mxu1 %v3642_v47 }
 0x5b4   :  { %3301 = vmatprep.subr.bf16.mxu1 %v4035_v0 }
 0x5b5   :  { %3767 = vpow2.f32 %v2857_v33 }
 0x5b7   :  { %3302 = vmatpush3.bf16.msra.mxu1 %v3643_v49 }
 0x5b8   :  { %3303 = vmatprep.subr.bf16.mxu1 %v4035_v0 }
 0x5bb   :  { %3304 = vmatpush3.bf16.msra.mxu1 %v3644_v51 }
 0x5bc   :  { %3329 = vmatprep.subr.bf16.mxu1 %v4035_v0 }
 0x5c2   :  { %v3768_v37 = vpop.eup %3767 }
 0x5c3   :  { %v818_v39 = vadd.f32 1.0, %v3768_v37  ;;  %v3653_v37 = vld [vmem:[#allocation11 + $0x38] sm:$0xff]  }
 0x5c5   :  { %3769 = vrcp.f32 %v818_v39  ;;  %v3654_v39 = vld [vmem:[#allocation11 + $0x30] sm:$0xff]  }
 0x5d2   :  { %v3770_v43 = vpop.eup %3769 }
 0x5d3   :  { %v821_v45 = vmul.f32 2.0, %v3770_v43 }
 0x5d5   :  { %v2858_v46 = vadd.f32 -1.0, %v821_v45 }
 0x5d7   :  { %v823_v48 = vsel %vm4168_vm3, %v2858_v46, %v3770_v43 }
 0x5d8   :  { %826 = vrot.lane.b32.xlu0 %v823_v48, %s4029_s14  ;;  %824 = vrot.lane.b32.xlu1 %v823_v48, %s4039_s15 }
 0x5dc   :  { %828 = vrot.lane.b32.xlu1 %v823_v48, %s4038_s3 }
 0x64a   :  { %v827_v52 = vpop.permute.xlu0 %826  ;;  %v825_v53 = vpop.permute.xlu1 %824 }
 0x64b   :  { %v831_v54 = vmul.f32 %v827_v52, %v823_v48  ;;  %v830_v55 = vmul.f32 %v825_v53, %v700_v16  ;;  %v3650_v16 = vld [vmem:[#allocation11 + $0x10] sm:$0xff]   ;;  %v3656_v53 = vld [vmem:[#allocation11 + $0x20] sm:$0xff]  }
 0x64d   :  { %v832_v56 = vadd.f32 %v831_v54, %v830_v55  ;;  %v3657_v54 = vld [vmem:[#allocation11 + $0x18] sm:$0xff]  }
 0x64e   :  { %v829_v59 = vpop.permute.xlu1 %828 }
 0x64f   :  { %v833_v57 = vsel %vm129_vm4, %v832_v56, 0.0  ;;  %v3658_v56 = vld [vmem:[#allocation11 + $0x10] sm:$0xff]  }
 0x650   :  { %3771 = vtanh.f32 %v833_v57 }
 0x65d   :  { %v3772_v58 = vpop.eup %3771 }
 0x65e   :  { %v4261_v60 = vmul.f32 %v3772_v58, %v829_v59  ;;  %v3659_v59 = vld [vmem:[#allocation11 + $0x8] sm:$0xff]  }
 0x660   :  { %v840_v61 = vpack.c.bf16 %v4261_v60, %v4261_v60  ;;  %v1381_v50 = vpack.c.bf16 %v4261_v60, %v4237_v19 }
 0x662   :  { %3306 = vmatmul.mubr.bf16.vlgmr.msra.gmra.mxu1 %v840_v61  ;;  %v3660_v61 = vld [vmem:[#allocation11] sm:$0xff]  }
 0x663   :  { %3345 = vmatprep.mubr.msk.bf16.mxu1 %vm4036_vm0, %v4035_v0  ;;  %3330 = vmatpush3.bf16.msra.mxu1 %v3653_v37 }
 0x664   :  { %3331 = vmatprep.subr.bf16.mxu1 %v4035_v0 }
 0x667   :  { %3332 = vmatpush3.bf16.msra.mxu1 %v3654_v39 }
 0x668   :  { %3333 = vmatprep.subr.bf16.mxu1 %v4035_v0 }
 0x66b   :  { %3334 = vmatpush3.bf16.msra.mxu1 %v3655_v41  ;;  %v3674_v41 = vld [vmem:[#allocation11 + $0x10] sm:$0xff]  }
 0x66c   :  { %3335 = vmatprep.subr.bf16.mxu1 %v4035_v0 }
 0x66f   :  { %3336 = vmatpush3.bf16.msra.mxu1 %v3656_v53 }
 0x670   :  { %3337 = vmatprep.subr.bf16.mxu1 %v4035_v0 }
 0x673   :  { %3338 = vmatpush3.bf16.msra.mxu1 %v3657_v54 }
 0x674   :  { %3339 = vmatprep.subr.bf16.mxu1 %v4035_v0 }
 0x677   :  { %3340 = vmatpush3.bf16.msra.mxu1 %v3658_v56  ;;  %v3678_v56 = vld [vmem:[#allocation14 + $0x30] sm:$0xff]  }
 0x678   :  { %3341 = vmatprep.subr.bf16.mxu1 %v4035_v0 }
 0x67b   :  { %3342 = vmatpush3.bf16.msra.mxu1 %v3659_v59  ;;  %v3681_v59 = vld [vmem:[#allocation14 + $0x18] sm:$0xff]  }
 0x67c   :  { %3343 = vmatprep.subr.bf16.mxu1 %v4035_v0 }
 0x67f   :  { %3344 = vmatpush3.bf16.msra.mxu1 %v3660_v61  ;;  %v3682_v61 = vld [vmem:[#allocation14 + $0x10] sm:$0xff]  }
 0x680   :  { %3369 = vmatprep.subr.bf16.mxu1 %v3661_v62 }
 0x722   :  { %v939_v1 = vpop.f32.mrf.mxu1 }
 0x723   :  { %v945_v2 = vadd.f32 %v939_v1, %v4158_v34  ;;  %v3649_v34 = vld [vmem:[#allocation11 + $0x18] sm:$0xff]  }
 0x724   :  { %v3307_v25 = vpop.f32.mrf.mxu1  ;;  %3318 = vmatpush3.bf16.msra.mxu0 %v3649_v34  ;;  %v3664_v34 = vld [vmem:[#allocation12 + $0x20] sm:$0xff]  }
 0x725   :  { %v946_v3 = vmul.f32 2.0, %v945_v2  ;;  %3319 = vmatprep.subr.bf16.mxu0 %v4035_v0 }
 0x726   :  { %v942_v4 = vpop.f32.mrf.mxu1 }
 0x727   :  { %v947_v5 = vsel %vm4168_vm3, %v946_v3, %v945_v2 }
 0x728   :  { %v2867_v6 = vmul.f32 -1.442695, %v947_v5  ;;  %v3308_v7 = vpop.f32.mrf.mxu1  ;;  %3320 = vmatpush3.bf16.msra.mxu0 %v3650_v16 }
 0x729   :  { %3321 = vmatprep.subr.bf16.mxu0 %v4035_v0 }
 0x72a   :  { %3773 = vpow2.f32 %v2867_v6 }
 0x72c   :  { %3322 = vmatpush3.bf16.msra.mxu0 %v3651_v18  ;;  %v3670_v18 = vld [vmem:[#allocation11 + $0x30] sm:$0xff]  }
 0x72d   :  { %3323 = vmatprep.subr.bf16.mxu0 %v4035_v0 }
 0x730   :  { %3324 = vmatpush3.bf16.msra.mxu0 %v3652_v20  ;;  %v3671_v20 = vld [vmem:[#allocation11 + $0x28] sm:$0xff]  }
 0x731   :  { %3349 = vmatprep.subr.bf16.mxu0 %v4035_v0 }
 0x737   :  { %v3774_v8 = vpop.eup %3773 }
 0x738   :  { %v951_v10 = vadd.f32 1.0, %v3774_v8 }
 0x73a   :  { %3775 = vrcp.f32 %v951_v10  ;;  %v3662_v10 = vld [vmem:[#allocation12 + $0x30] sm:$0xff]  }
 0x747   :  { %v3776_v13 = vpop.eup %3775 }
 0x748   :  { %v954_v14 = vmul.f32 2.0, %v3776_v13 }
 0x74a   :  { %v2868_v15 = vadd.f32 -1.0, %v954_v14  ;;  %v3666_v14 = vld [vmem:[#allocation12 + $0x10] sm:$0xff]  }
 0x74c   :  { %v956_v17 = vsel %vm4168_vm3, %v2868_v15, %v3776_v13  ;;  %v3665_v13 = vld [vmem:[#allocation12 + $0x18] sm:$0xff]   ;;  %v3667_v15 = vld [vmem:[#allocation12 + $0x8] sm:$0xff]  }
 0x74d   :  { %959 = vrot.lane.b32.xlu1 %v956_v17, %s4029_s14  ;;  %957 = vrot.lane.b32.xlu0 %v956_v17, %s4039_s15 }
 0x751   :  { %961 = vrot.lane.b32.xlu0 %v956_v17, %s4038_s3 }
 0x7bf   :  { %v960_v22 = vpop.permute.xlu1 %959  ;;  %v958_v23 = vpop.permute.xlu0 %957 }
 0x7c0   :  { %v964_v24 = vmul.f32 %v960_v22, %v956_v17  ;;  %v963_v26 = vmul.f32 %v958_v23, %v833_v57  ;;  %v3669_v17 = vld [vmem:[#allocation11 + $0x38] sm:$0xff]  }
 0x7c2   :  { %v965_v27 = vadd.f32 %v964_v24, %v963_v26 }
 0x7c3   :  { %v962_v31 = vpop.permute.xlu0 %961 }
 0x7c4   :  { %v966_v29 = vsel %vm129_vm4, %v965_v27, 0.0 }
 0x7c5   :  { %3777 = vtanh.f32 %v966_v29 }
 0x7d2   :  { %v3778_v30 = vpop.eup %3777 }
 0x7d3   :  { %v4285_v33 = vmul.f32 %v3778_v30, %v962_v31 }
 0x7d5   :  { %v973_v35 = vpack.c.bf16 %v4285_v33, %v4285_v33 }
 0x7d7   :  { %3326 = vmatmul.mubr.bf16.vlgmr.msra.gmra.mxu0 %v973_v35  ;;  %v3673_v35 = vld [vmem:[#allocation11 + $0x18] sm:$0xff]  }
 0x7d8   :  { %3365 = vmatprep.mubr.msk.bf16.mxu0 %vm4036_vm0, %v4035_v0  ;;  %3350 = vmatpush3.bf16.msra.mxu0 %v3669_v17 }
 0x7d9   :  { %3351 = vmatprep.subr.bf16.mxu0 %v4035_v0 }
 0x7dc   :  { %3352 = vmatpush3.bf16.msra.mxu0 %v3670_v18  ;;  %v3686_v18 = vld [vmem:[#allocation14 + $0x30] sm:$0xff]  }
 0x7dd   :  { %3353 = vmatprep.subr.bf16.mxu0 %v4035_v0 }
 0x7e0   :  { %3354 = vmatpush3.bf16.msra.mxu0 %v3671_v20 }
 0x7e1   :  { %3355 = vmatprep.subr.bf16.mxu0 %v4035_v0 }
 0x897   :  { %v1072_v42 = vpop.f32.mrf.mxu0 }
 0x898   :  { %v1078_v28 = vadd.f32 %v1072_v42, %v4162_v38 }
 0x899   :  { %v3327_v43 = vpop.f32.mrf.mxu0 }
 0x89a   :  { %v1079_v45 = vmul.f32 2.0, %v1078_v28  ;;  %v3676_v43 = vld [vmem:[#allocation11] sm:$0xff]  }
 0x89b   :  { %v1075_v46 = vpop.f32.mrf.mxu0 }
 0x89c   :  { %v1080_v47 = vsel %vm4168_vm3, %v1079_v45, %v1078_v28  ;;  %v3675_v28 = vld [vmem:[#allocation11 + $0x8] sm:$0xff]  }
 0x89d   :  { %v2877_v48 = vmul.f32 -1.442695, %v1080_v47  ;;  %v3328_v49 = vpop.f32.mrf.mxu0 }
 0x89f   :  { %3779 = vpow2.f32 %v2877_v48 }
 0x8ac   :  { %v3780_v51 = vpop.eup %3779 }
 0x8ad   :  { %v1084_v52 = vadd.f32 1.0, %v3780_v51 }
 0x8af   :  { %3781 = vrcp.f32 %v1084_v52 }
 0x8bc   :  { %v3782_v55 = vpop.eup %3781 }
 0x8bd   :  { %v1087_v38 = vmul.f32 2.0, %v3782_v55 }
 0x8bf   :  { %v2878_v57 = vadd.f32 -1.0, %v1087_v38 }
 0x8c1   :  { %v1089_v58 = vsel %vm4168_vm3, %v2878_v57, %v3782_v55  ;;  %v3677_v55 = vld [vmem:[#allocation14 + $0x38] sm:$0xff]   ;;  %v3679_v57 = vld [vmem:[#allocation14 + $0x28] sm:$0xff]  }
 0x8c2   :  { %1092 = vrot.lane.b32.xlu0 %v1089_v58, %s4029_s14  ;;  %1090 = vrot.lane.b32.xlu1 %v1089_v58, %s4039_s15 }
 0x8c6   :  { %1094 = vrot.lane.b32.xlu1 %v1089_v58, %s4038_s3 }
 0x934   :  { %v1093_v63 = vpop.permute.xlu0 %1092  ;;  %v1091_v1 = vpop.permute.xlu1 %1090 }
 0x935   :  { %v1097_v2 = vmul.f32 %v1093_v63, %v1089_v58  ;;  %v1096_v25 = vmul.f32 %v1091_v1, %v966_v29  ;;  %v3680_v58 = vld [vmem:[#allocation14 + $0x20] sm:$0xff]  }
 0x936   :  { %v3684_v63 = vld [vmem:[#allocation14] sm:$0xff]  }
 0x937   :  { %v1098_v3 = vadd.f32 %v1097_v2, %v1096_v25 }
 0x938   :  { %v1095_v6 = vpop.permute.xlu1 %1094 }
 0x939   :  { %v4308_v4 = vsel %vm129_vm4, %v1098_v3, 0.0 }
 0x93a   :  { %3783 = vtanh.f32 %v4308_v4 }
 0x947   :  { %v3784_v5 = vpop.eup %3783 }
 0x948   :  { %v1101_v7 = vmul.f32 %v3784_v5, %v1095_v6 }
 0x94a   :  { %v1106_v8 = vpack.c.bf16 %v1101_v7, %v1101_v7  ;;  %v1382_v16 = vpack.c.bf16 %v1101_v7, %v4285_v33  ;;  %v3672_v33 = vld [vmem:[#allocation11 + $0x20] sm:$0xff]  }
 0x94b   :  { %3356 = vmatpush3.bf16.msra.mxu0 %v3672_v33 }
 0x94c   :  { %3346 = vmatmul.mubr.bf16.vlgmr.msra.gmra.mxu1 %v1106_v8  ;;  %3357 = vmatprep.subr.bf16.mxu0 %v4035_v0 }
 0x94d   :  { %3370 = vmatpush3.bf16.msra.mxu1 %v3661_v62  ;;  %3385 = vmatprep.mubr.bf16.mxu1 %v1380_v11  ;;  %v3683_v62 = vld [vmem:[#allocation14 + $0x8] sm:$0xff]  }
 0x94e   :  { %3371 = vmatprep.subr.bf16.mxu1 %v3662_v10 }
 0x94f   :  { %3358 = vmatpush3.bf16.msra.mxu0 %v3673_v35 }
 0x950   :  { %3359 = vmatprep.subr.bf16.mxu0 %v4035_v0 }
 0x951   :  { %3372 = vmatpush3.bf16.msra.mxu1 %v3662_v10 }
 0x952   :  { %3373 = vmatprep.subr.bf16.mxu1 %v3663_v12 }
 0x953   :  { %3360 = vmatpush3.bf16.msra.mxu0 %v3674_v41  ;;  %v3692_v41 = vld [vmem:[#allocation14] sm:$0xff]  }
 0x954   :  { %3361 = vmatprep.subr.bf16.mxu0 %v4035_v0 }
 0x955   :  { %3374 = vmatpush3.bf16.msra.mxu1 %v3663_v12  ;;  %v4364_v12 = vld [vmem:[%s4592_s6] ss:$0 sm:$0xff] }
 0x956   :  { %3375 = vmatprep.subr.bf16.mxu1 %v3664_v34 }
 0x957   :  { %3362 = vmatpush3.bf16.msra.mxu0 %v3675_v28 }
 0x958   :  { %3363 = vmatprep.subr.bf16.mxu0 %v4035_v0 }
 0x959   :  { %3376 = vmatpush3.bf16.msra.mxu1 %v3664_v34 }
 0x95a   :  { %3377 = vmatprep.subr.bf16.mxu1 %v3665_v13 }
 0x95b   :  { %3364 = vmatpush3.bf16.msra.mxu0 %v3676_v43 }
 0x95c   :  { %3393 = vmatprep.subr.bf16.mxu0 %v4035_v0 }
 0x95d   :  { %3378 = vmatpush3.bf16.msra.mxu1 %v3665_v13 }
 0x95e   :  { %3379 = vmatprep.subr.bf16.mxu1 %v3666_v14 }
 0x961   :  { %3380 = vmatpush3.bf16.msra.mxu1 %v3666_v14 }
 0x962   :  { %3381 = vmatprep.subr.bf16.mxu1 %v3667_v15 }
 0x965   :  { %3382 = vmatpush3.bf16.msra.mxu1 %v3667_v15 }
 0x966   :  { %3383 = vmatprep.subr.bf16.mxu1 %v3668_v9 }
 0x969   :  { %3384 = vmatpush3.bf16.msra.mxu1 %v3668_v9  ;;  %v3685_v9 = vld [vmem:[#allocation14 + $0x38] sm:$0xff]  }
 0x96a   :  { %3413 = vmatprep.subr.bf16.mxu1 %v4035_v0 }
 0x96c   :  { %3386 = vmatmul.mubr.bf16.vlgmr.msra.gmra.mxu1 %v1381_v50 }
 0x96d   :  { %3389 = vmatprep.mubr.bf16.mxu1 %v1382_v16  ;;  %3414 = vmatpush3.bf16.msra.mxu1 %v3685_v9 }
 0x96e   :  { %3415 = vmatprep.subr.bf16.mxu1 %v4035_v0 }
 0x971   :  { %3416 = vmatpush3.bf16.msra.mxu1 %v3686_v18  ;;  %v3697_v18 = vld [vmem:[#allocation14 + $0x18] sm:$0xff]  }
 0x972   :  { %3417 = vmatprep.subr.bf16.mxu1 %v4035_v0 }
 0xa0c   :  { %v1205_v22 = vpop.f32.mrf.mxu1 }
 0xa0d   :  { %v1211_v19 = vadd.f32 %v1205_v22, %v4156_v32 }
 0xa0e   :  { %v3347_v60 = vpop.f32.mrf.mxu1 }
 0xa0f   :  { %v1212_v23 = vmul.f32 2.0, %v1211_v19 }
 0xa10   :  { %v1208_v24 = vpop.f32.mrf.mxu1 }
 0xa11   :  { %v1213_v26 = vsel %vm4168_vm3, %v1212_v23, %v1211_v19 }
 0xa12   :  { %v2887_v27 = vmul.f32 -1.442695, %v1213_v26  ;;  %v3348_v29 = vpop.f32.mrf.mxu1 }
 0xa13   :  { %v3688_v29 = vld [vmem:[#allocation14 + $0x20] sm:$0xff]  }
 0xa14   :  { %3785 = vpow2.f32 %v2887_v27  ;;  %v3687_v27 = vld [vmem:[#allocation14 + $0x28] sm:$0xff]  }
 0xa15   :  { %3418 = vmatpush3.bf16.msra.mxu1 %v3687_v27 }
 0xa16   :  { %3419 = vmatprep.subr.bf16.mxu1 %v4035_v0 }
 0xa19   :  { %3420 = vmatpush3.bf16.msra.mxu1 %v3688_v29 }
 0xa1a   :  { %3421 = vmatprep.subr.bf16.mxu1 %v4035_v0 }
 0xa21   :  { %v3786_v30 = vpop.eup %3785 }
 0xa22   :  { %v1217_v31 = vadd.f32 1.0, %v3786_v30  ;;  %v3689_v30 = vld [vmem:[#allocation14 + $0x18] sm:$0xff]  }
 0xa23   :  { %3422 = vmatpush3.bf16.msra.mxu1 %v3689_v30 }
 0xa24   :  { %3787 = vrcp.f32 %v1217_v31  ;;  %3423 = vmatprep.subr.bf16.mxu1 %v4035_v0 }
 0xa2c   :  { %v4359_v11 = vpop.f32.mrf.mxu1 }
 0xa31   :  { %v3788_v37 = vpop.eup %3787 }
 0xa32   :  { %v1220_v39 = vmul.f32 2.0, %v3788_v37 }
 0xa34   :  { %v2888_v32 = vadd.f32 -1.0, %v1220_v39 }
 0xa36   :  { %v1222_v42 = vsel %vm4168_vm3, %v2888_v32, %v3788_v37  ;;  %v3690_v37 = vld [vmem:[#allocation14 + $0x10] sm:$0xff]   ;;  %v3691_v32 = vld [vmem:[#allocation14 + $0x8] sm:$0xff]  }
 0xa37   :  { %1225 = vrot.lane.b32.xlu1 %v1222_v42, %s4029_s14  ;;  %1223 = vrot.lane.b32.xlu0 %v1222_v42, %s4039_s15 }
 0xa38   :  { %3424 = vmatpush3.bf16.msra.mxu1 %v3690_v37 }
 0xa39   :  { %3425 = vmatprep.subr.bf16.mxu1 %v4035_v0 }
 0xa3b   :  { %1227 = vrot.lane.b32.xlu0 %v1222_v42, %s4038_s3 }
 0xa3c   :  { %3426 = vmatpush3.bf16.msra.mxu1 %v3691_v32 }
 0xa3d   :  { %3427 = vmatprep.subr.bf16.mxu1 %v4035_v0 }
 0xa40   :  { %3428 = vmatpush3.bf16.msra.mxu1 %v3692_v41 }
 0xa41   :  { %3453 = vmatprep.subr.bf16.mxu1 %v4035_v0 }
 0xaa9   :  { %v1226_v45 = vpop.permute.xlu1 %1225  ;;  %v1224_v46 = vpop.permute.xlu0 %1223 }
 0xaaa   :  { %v1230_v47 = vmul.f32 %v1226_v45, %v1222_v42  ;;  %v1229_v48 = vmul.f32 %v1224_v46, %v4308_v4 }
 0xaac   :  { %v1231_v49 = vadd.f32 %v1230_v47, %v1229_v48 }
 0xaad   :  { %v1228_v53 = vpop.permute.xlu0 %1227 }
 0xaae   :  { %v4336_v51 = vsel %vm129_vm4, %v1231_v49, 0.0 }
 0xaaf   :  { %3789 = vtanh.f32 %v4336_v51 }
 0xabc   :  { %v3790_v52 = vpop.eup %3789 }
 0xabd   :  { %v4339_v54 = vmul.f32 %v3790_v52, %v1228_v53 }
 0xabf   :  { %v1239_v38 = vpack.c.bf16 %v4339_v54, %v4339_v54 }
 0xac1   :  { %3366 = vmatmul.mubr.bf16.vlgmr.msra.gmra.mxu0 %v1239_v38 }
 0xac2   :  { %3394 = vmatpush3.bf16.msra.mxu0 %v3677_v55  ;;  %3409 = vmatprep.mubr.msk.bf16.mxu0 %vm4036_vm0, %v4035_v0 }
 0xac3   :  { %3395 = vmatprep.subr.bf16.mxu0 %v4035_v0 }
 0xac6   :  { %3396 = vmatpush3.bf16.msra.mxu0 %v3678_v56 }
 0xac7   :  { %3397 = vmatprep.subr.bf16.mxu0 %v4035_v0 }
 0xaca   :  { %3398 = vmatpush3.bf16.msra.mxu0 %v3679_v57 }
 0xacb   :  { %3399 = vmatprep.subr.bf16.mxu0 %v4035_v0 }
 0xace   :  { %3400 = vmatpush3.bf16.msra.mxu0 %v3680_v58 }
 0xacf   :  { %3401 = vmatprep.subr.bf16.mxu0 %v4035_v0 }
 0xad2   :  { %3402 = vmatpush3.bf16.msra.mxu0 %v3681_v59 }
 0xad3   :  { %3403 = vmatprep.subr.bf16.mxu0 %v4035_v0 }
 0xad6   :  { %3404 = vmatpush3.bf16.msra.mxu0 %v3682_v61 }
 0xad7   :  { %3405 = vmatprep.subr.bf16.mxu0 %v4035_v0 }
 0xada   :  { %3406 = vmatpush3.bf16.msra.mxu0 %v3683_v62 }
 0xadb   :  { %3407 = vmatprep.subr.bf16.mxu0 %v4035_v0 }
 0xade   :  { %3408 = vmatpush3.bf16.msra.mxu0 %v3684_v63 }
 0xadf   :  { %3433 = vmatprep.subr.bf16.mxu0 %v4035_v0 }
 0xae1   :  { %3410 = vmatmul.mubr.bf16.vlgmr.msra.gmra.mxu0 %v4037_v21  ;;  %v1489_v21 = vpop.f32.mrf.mxu1 }
 0xae2   :  { %3449 = vmatprep.mubr.msk.bf16.mxu0 %vm4036_vm0, %v4035_v0 }
 0xb81   :  { %v1338_v1 = vpop.f32.mrf.mxu0 }
 0xb82   :  { %v1344_v2 = vadd.f32 %v1338_v1, %v4160_v36  ;;  %v1490_v36 = vadd.f32 %v4364_v12, %v1489_v21  ;;  %v3693_v1 = vld [vmem:[#allocation14 + $0x38] sm:$0xff]  }
 0xb83   :  { %v3367_v25 = vpop.f32.mrf.mxu0  ;;  %3434 = vmatpush3.bf16.msra.mxu0 %v3693_v1 }
 0xb84   :  { %v1345_v3 = vmul.f32 2.0, %v1344_v2  ;;  %3435 = vmatprep.subr.bf16.mxu0 %v4035_v0 }
 0xb85   :  { %v1341_v4 = vpop.f32.mrf.mxu0 }
 0xb86   :  { %v1346_v5 = vsel %vm4168_vm3, %v1345_v3, %v1344_v2  ;;  %v3694_v2 = vld [vmem:[#allocation14 + $0x30] sm:$0xff]  }
 0xb87   :  { %v2897_v6 = vmul.f32 -1.442695, %v1346_v5  ;;  %v3368_v7 = vpop.f32.mrf.mxu0  ;;  %3436 = vmatpush3.bf16.msra.mxu0 %v3694_v2  ;;  %v3707_v2 = vld [vmem:[#allocation14 + $0x8] sm:$0xff]  }
 0xb88   :  { %3437 = vmatprep.subr.bf16.mxu0 %v4035_v0 }
 0xb89   :  { %3791 = vpow2.f32 %v2897_v6 }
 0xb96   :  { %v3792_v8 = vpop.eup %3791 }
 0xb97   :  { %v1350_v10 = vadd.f32 1.0, %v3792_v8 }
 0xb99   :  { %3793 = vrcp.f32 %v1350_v10 }
 0xba1   :  { %v1632_v34 = vpop.f32.mrf.mxu0 }
 0xba2   :  { %v1638_v13 = vadd.f32 %v1632_v34, %v1490_v36 }
 0xba3   :  { %v3411_v14 = vpop.f32.mrf.mxu0 }
 0xba4   :  { %v1639_v15 = vmul.f32 2.0, %v1638_v13 }
 0xba5   :  { %v1635_v50 = vpop.f32.mrf.mxu0 }
 0xba6   :  { %v3794_v16 = vpop.eup %3793  ;;  %v1640_v17 = vsel %vm4168_vm3, %v1639_v15, %v1638_v13 }
 0xba7   :  { %v2916_v20 = vmul.f32 -1.442695, %v1640_v17  ;;  %v3412_v22 = vpop.f32.mrf.mxu0  ;;  %v1353_v19 = vmul.f32 2.0, %v3794_v16  ;;  %v3696_v17 = vld [vmem:[#allocation14 + $0x20] sm:$0xff]  }
 0xba9   :  { %3795 = vpow2.f32 %v2916_v20  ;;  %v2898_v60 = vadd.f32 -1.0, %v1353_v19 }
 0xbab   :  { %v1355_v23 = vsel %vm4168_vm3, %v2898_v60, %v3794_v16  ;;  %v3695_v16 = vld [vmem:[#allocation14 + $0x28] sm:$0xff]   ;;  %v3698_v60 = vld [vmem:[#allocation14 + $0x10] sm:$0xff]  }
 0xbac   :  { %1358 = vrot.lane.b32.xlu0 %v1355_v23, %s4029_s14  ;;  %1356 = vrot.lane.b32.xlu1 %v1355_v23, %s4039_s15 }
 0xbad   :  { %3438 = vmatpush3.bf16.msra.mxu0 %v3695_v16  ;;  %v3710_v16 = vld [vmem:[#allocation14 + $0x30] sm:$0xff]  }
 0xbae   :  { %3439 = vmatprep.subr.bf16.mxu0 %v4035_v0 }
 0xbb1   :  { %3440 = vmatpush3.bf16.msra.mxu0 %v3696_v17 }
 0xbb2   :  { %3441 = vmatprep.subr.bf16.mxu0 %v4035_v0 }
 0xbb5   :  { %3442 = vmatpush3.bf16.msra.mxu0 %v3697_v18 }
 0xbb6   :  { %v3796_v24 = vpop.eup %3795  ;;  %3443 = vmatprep.subr.bf16.mxu0 %v4035_v0 }
 0xbb7   :  { %v1644_v26 = vadd.f32 1.0, %v3796_v24  ;;  %v3699_v24 = vld [vmem:[#allocation14 + $0x8] sm:$0xff]  }
 0xbb9   :  { %3797 = vrcp.f32 %v1644_v26  ;;  %3444 = vmatpush3.bf16.msra.mxu0 %v3698_v60  ;;  %v3700_v26 = vld [vmem:[#allocation14] sm:$0xff]  }
 0xbba   :  { %3445 = vmatprep.subr.bf16.mxu0 %v4035_v0 }
 0xbbd   :  { %3446 = vmatpush3.bf16.msra.mxu0 %v3699_v24 }
 0xbbe   :  { %3447 = vmatprep.subr.bf16.mxu0 %v4035_v0 }
 0xbc1   :  { %3448 = vmatpush3.bf16.msra.mxu0 %v3700_v26 }
 0xbc2   :  { %3473 = vmatprep.subr.bf16.mxu0 %v4035_v0 }
 0xbc6   :  { %v3798_v31 = vpop.eup %3797 }
 0xbc7   :  { %v1647_v33 = vmul.f32 2.0, %v3798_v31 }
 0xbc9   :  { %v2917_v35 = vadd.f32 -1.0, %v1647_v33 }
 0xbcb   :  { %v1649_v39 = vsel %vm4168_vm3, %v2917_v35, %v3798_v31 }
 0xbcc   :  { %1652 = vrot.lane.b32.xlu0 %v1649_v39, %s4029_s14  ;;  %1650 = vrot.lane.b32.xlu1 %v1649_v39, %s4039_s15 }
 0xbd0   :  { %1654 = vrot.lane.b32.xlu0 %v1649_v39, %s4038_s3  ;;  %1360 = vrot.lane.b32.xlu1 %v1355_v23, %s4038_s3 }
 0xc1e   :  { %v1359_v42 = vpop.permute.xlu0 %1358  ;;  %v1357_v28 = vpop.permute.xlu1 %1356 }
 0xc1f   :  { %v1363_v43 = vmul.f32 %v1359_v42, %v1355_v23  ;;  %v1362_v45 = vmul.f32 %v1357_v28, %v4336_v51  ;;  %v3701_v42 = vld [vmem:[#allocation14 + $0x38] sm:$0xff]   ;;  %v3702_v28 = vld [vmem:[#allocation14 + $0x30] sm:$0xff]  }
 0xc21   :  { %v1364_v46 = vadd.f32 %v1363_v43, %v1362_v45  ;;  %v1498_v43 = vadd.f32 %v4359_v11, %v4364_v12  ;;  %v3705_v11 = vld [vmem:[#allocation14 + $0x18] sm:$0xff]  }
 0xc23   :  { %v1365_v47 = vsel %vm129_vm4, %v1364_v46, 0.0 }
 0xc24   :  { %3799 = vtanh.f32 %v1365_v47 }
 0xc31   :  { %v3800_v38 = vpop.eup %3799 }
 0xc3e   :  { %v1653_v48 = vpop.permute.xlu0 %1652  ;;  %v1651_v49 = vpop.permute.xlu1 %1650 }
 0xc3f   :  { %v1657_v52 = vmul.f32 %v1653_v48, %v1649_v39  ;;  %v1656_v53 = vmul.f32 0.0, %v1651_v49 }
 0xc41   :  { %v1658_v55 = vadd.f32 %v1657_v52, %v1656_v53 }
 0xc42   :  { %v1361_v56 = vpop.permute.xlu1 %1360  ;;  %v1655_v61 = vpop.permute.xlu0 %1654 }
 0xc43   :  { %v4392_v57 = vsel %vm129_vm4, %v1658_v55, 0.0  ;;  %v1367_v58 = vmul.f32 %v3800_v38, %v1361_v56 }
 0xc44   :  { %3801 = vtanh.f32 %v4392_v57 }
 0xc45   :  { %v1383_v51 = vpack.c.bf16 %v1367_v58, %v4339_v54  ;;  %v4406_v54 = vpop.f32.mrf.mxu1  ;;  %v3704_v58 = vld [vmem:[#allocation14 + $0x20] sm:$0xff]  }
 0xc46   :  { %v1501_v17 = vadd.f32 %v4406_v54, %v4364_v12  ;;  %v3713_v54 = vld [vmem:[#allocation14 + $0x18] sm:$0xff]  }
 0xc47   :  { %3390 = vmatmul.mubr.bf16.gmra.mxu1 %v1383_v51  ;;  %v1492_v25 = vpop.f32.mrf.mxu1 }
 0xc48   :  { %3429 = vmatprep.mubr.msk.bf16.mxu1 %vm4036_vm0, %v4035_v0  ;;  %v1493_v7 = vadd.f32 %v4364_v12, %v1492_v25  ;;  %v3708_v25 = vld [vmem:[#allocation14] sm:$0xff]  }
 0xc51   :  { %v3802_v59 = vpop.eup %3801 }
 0xc52   :  { %v4398_v62 = vmul.f32 %v3802_v59, %v1655_v61 }
 0xc54   :  { %v1664_v63 = vpack.c.bf16 %v4398_v62, %v4398_v62 }
 0xc56   :  { %3430 = vmatmul.mubr.bf16.vlgmr.msra.gmra.mxu1 %v1664_v63  ;;  %v3706_v63 = vld [vmem:[#allocation14 + $0x10] sm:$0xff]  }
 0xc57   :  { %3469 = vmatprep.mubr.msk.bf16.mxu1 %vm4036_vm0, %v4035_v0  ;;  %3454 = vmatpush3.bf16.msra.mxu1 %v3701_v42  ;;  %v3715_v42 = vld [vmem:[#allocation14 + $0x8] sm:$0xff]  }
 0xc58   :  { %3455 = vmatprep.subr.bf16.mxu1 %v4035_v0 }
 0xc5b   :  { %3456 = vmatpush3.bf16.msra.mxu1 %v3702_v28  ;;  %v3716_v28 = vld [vmem:[#allocation14] sm:$0xff]  }
 0xc5c   :  { %3457 = vmatprep.subr.bf16.mxu1 %v4035_v0 }
 0xd07   :  { %v4408_v3 = vpop.f32.mrf.mxu1 }
 0xd09   :  { %v4410_v4 = vpop.f32.mrf.mxu1 }
 0xd0b   :  { %v4412_v5 = vpop.f32.mrf.mxu1 }
 0xd0d   :  { %v4414_v6 = vpop.f32.mrf.mxu1 }
 0xd16   :  { %v1763_v8 = vpop.f32.mrf.mxu1 }
 0xd17   :  { %v1769_v10 = vadd.f32 %v1763_v8, %v1493_v7 }
 0xd18   :  { %v3431_v21 = vpop.f32.mrf.mxu1 }
 0xd19   :  { %v1770_v36 = vmul.f32 2.0, %v1769_v10 }
 0xd1a   :  { %v1766_v34 = vpop.f32.mrf.mxu1 }
 0xd1b   :  { %v1771_v13 = vsel %vm4168_vm3, %v1770_v36, %v1769_v10 }
 0xd1c   :  { %v2926_v14 = vmul.f32 -1.442695, %v1771_v13  ;;  %v3432_v15 = vpop.f32.mrf.mxu1 }
 0xd1e   :  { %3803 = vpow2.f32 %v2926_v14 }
 0xd2b   :  { %v3804_v9 = vpop.eup %3803 }
 0xd2c   :  { %v1775_v50 = vadd.f32 1.0, %v3804_v9 }
 0xd2e   :  { %3805 = vrcp.f32 %v1775_v50  ;;  %v3709_v50 = vld [vmem:[#allocation14 + $0x38] sm:$0xff]  }
 0xd3b   :  { %v3806_v20 = vpop.eup %3805 }
 0xd3c   :  { %v1778_v22 = vmul.f32 2.0, %v3806_v20 }
 0xd3e   :  { %v2927_v19 = vadd.f32 -1.0, %v1778_v22 }
 0xd40   :  { %v1780_v23 = vsel %vm4168_vm3, %v2927_v19, %v3806_v20 }
 0xd41   :  { %1783 = vrot.lane.b32.xlu0 %v1780_v23, %s4029_s14  ;;  %1781 = vrot.lane.b32.xlu1 %v1780_v23, %s4039_s15 }
 0xd45   :  { %1785 = vrot.lane.b32.xlu1 %v1780_v23, %s4038_s3 }
 0xdb3   :  { %v1784_v27 = vpop.permute.xlu0 %1783  ;;  %v1782_v29 = vpop.permute.xlu1 %1781 }
 0xdb4   :  { %v1788_v30 = vmul.f32 %v1784_v27, %v1780_v23  ;;  %v1787_v31 = vmul.f32 %v1782_v29, %v4392_v57  ;;  %v3703_v57 = vld [vmem:[#allocation14 + $0x28] sm:$0xff]  }
 0xdb5   :  { %3458 = vmatpush3.bf16.msra.mxu1 %v3703_v57  ;;  %v3718_v57 = vld [vmem:[#allocation14 + $0x30] sm:$0xff]  }
 0xdb6   :  { %v1789_v33 = vadd.f32 %v1788_v30, %v1787_v31  ;;  %3459 = vmatprep.subr.bf16.mxu1 %v4035_v0  ;;  %v3711_v30 = vld [vmem:[#allocation14 + $0x28] sm:$0xff]   ;;  %v3712_v31 = vld [vmem:[#allocation14 + $0x20] sm:$0xff]  }
 0xdb7   :  { %v1786_v39 = vpop.permute.xlu1 %1785 }
 0xdb8   :  { %v1790_v35 = vsel %vm129_vm4, %v1789_v33, 0.0 }
 0xdb9   :  { %3807 = vtanh.f32 %v1790_v35  ;;  %3460 = vmatpush3.bf16.msra.mxu1 %v3704_v58  ;;  %v1506_v58 = vadd.f32 %v4364_v12, %v4410_v4  ;;  %v3721_v4 = vld [vmem:[#allocation14 + $0x18] sm:$0xff]  }
 0xdba   :  { %3461 = vmatprep.subr.bf16.mxu1 %v4035_v0 }
 0xdbd   :  { %3462 = vmatpush3.bf16.msra.mxu1 %v3705_v11 }
 0xdbe   :  { %3463 = vmatprep.subr.bf16.mxu1 %v4035_v0 }
 0xdc1   :  { %3464 = vmatpush3.bf16.msra.mxu1 %v3706_v63 }
 0xdc2   :  { %3465 = vmatprep.subr.bf16.mxu1 %v4035_v0 }
 0xdc5   :  { %3466 = vmatpush3.bf16.msra.mxu1 %v3707_v2 }
 0xdc6   :  { %v3808_v37 = vpop.eup %3807  ;;  %3467 = vmatprep.subr.bf16.mxu1 %v4035_v0 }
 0xdc7   :  { %v4433_v32 = vmul.f32 %v3808_v37, %v1786_v39  ;;  %v3714_v39 = vld [vmem:[#allocation14 + $0x10] sm:$0xff]  }
 0xdc9   :  { %v1795_v41 = vpack.c.bf16 %v4433_v32, %v4433_v32  ;;  %3468 = vmatpush3.bf16.msra.mxu1 %v3708_v25 }
 0xdca   :  { %3493 = vmatprep.subr.bf16.mxu1 %v4035_v0 }
 0xdcb   :  { %3450 = vmatmul.mubr.bf16.vlgmr.msra.gmra.mxu0 %v1795_v41 }
 0xdcc   :  { %3489 = vmatprep.mubr.msk.bf16.mxu0 %vm4036_vm0, %v4035_v0  ;;  %3474 = vmatpush3.bf16.msra.mxu0 %v3709_v50  ;;  %v3723_v50 = vld [vmem:[#allocation14 + $0x8] sm:$0xff]  }
 0xdcd   :  { %3475 = vmatprep.subr.bf16.mxu0 %v4035_v0 }
 0xdd0   :  { %3476 = vmatpush3.bf16.msra.mxu0 %v3710_v16  ;;  %v3724_v16 = vld [vmem:[#allocation14] sm:$0xff]  }
 0xdd1   :  { %3477 = vmatprep.subr.bf16.mxu0 %v4035_v0 }
 0xdd4   :  { %3478 = vmatpush3.bf16.msra.mxu0 %v3711_v30  ;;  %v3726_v30 = vld [vmem:[#allocation14 + $0x30] sm:$0xff]  }
 0xdd5   :  { %3479 = vmatprep.subr.bf16.mxu0 %v4035_v0 }
 0xdd8   :  { %3480 = vmatpush3.bf16.msra.mxu0 %v3712_v31  ;;  %v3727_v31 = vld [vmem:[#allocation14 + $0x28] sm:$0xff]  }
 0xdd9   :  { %3481 = vmatprep.subr.bf16.mxu0 %v4035_v0 }
 0xddc   :  { %3482 = vmatpush3.bf16.msra.mxu0 %v3713_v54  ;;  %v1509_v54 = vadd.f32 %v4364_v12, %v4414_v6 }
 0xddd   :  { %3483 = vmatprep.subr.bf16.mxu0 %v4035_v0 }
 0xde0   :  { %3484 = vmatpush3.bf16.msra.mxu0 %v3714_v39 }
 0xde1   :  { %3485 = vmatprep.subr.bf16.mxu0 %v4035_v0 }
 0xde4   :  { %3486 = vmatpush3.bf16.msra.mxu0 %v3715_v42 }
 0xde5   :  { %3487 = vmatprep.subr.bf16.mxu0 %v4035_v0 }
 0xde8   :  { %3488 = vmatpush3.bf16.msra.mxu0 %v3716_v28 }
 0xde9   :  { %3513 = vmatprep.subr.bf16.mxu0 %v4035_v0 }
 0xe8b   :  { %v1894_v45 = vpop.f32.mrf.mxu0 }
 0xe8c   :  { %v1900_v46 = vadd.f32 %v1894_v45, %v1498_v43 }
 0xe8d   :  { %v3451_v47 = vpop.f32.mrf.mxu0 }
 0xe8e   :  { %v1901_v48 = vmul.f32 2.0, %v1900_v46 }
 0xe8f   :  { %v1897_v49 = vpop.f32.mrf.mxu0 }
 0xe90   :  { %v1902_v52 = vsel %vm4168_vm3, %v1901_v48, %v1900_v46 }
 0xe91   :  { %v2936_v53 = vmul.f32 -1.442695, %v1902_v52  ;;  %v3452_v55 = vpop.f32.mrf.mxu0 }
 0xe93   :  { %3809 = vpow2.f32 %v2936_v53 }
 0xea0   :  { %v3810_v38 = vpop.eup %3809 }
 0xea1   :  { %v1906_v56 = vadd.f32 1.0, %v3810_v38 }
 0xea3   :  { %3811 = vrcp.f32 %v1906_v56  ;;  %v3717_v56 = vld [vmem:[#allocation14 + $0x38] sm:$0xff]  }
 0xeb0   :  { %v3812_v51 = vpop.eup %3811 }
 0xeb1   :  { %v1909_v59 = vmul.f32 2.0, %v3812_v51 }
 0xeb3   :  { %v2937_v61 = vadd.f32 -1.0, %v1909_v59 }
 0xeb5   :  { %v1911_v1 = vsel %vm4168_vm3, %v2937_v61, %v3812_v51 }
 0xeb6   :  { %1914 = vrot.lane.b32.xlu1 %v1911_v1, %s4029_s14  ;;  %1912 = vrot.lane.b32.xlu0 %v1911_v1, %s4039_s15 }
 0xeba   :  { %1916 = vrot.lane.b32.xlu0 %v1911_v1, %s4038_s3 }
 0xf28   :  { %v1915_v7 = vpop.permute.xlu1 %1914  ;;  %v1913_v8 = vpop.permute.xlu0 %1912 }
 0xf29   :  { %v1919_v10 = vmul.f32 %v1915_v7, %v1911_v1  ;;  %v1918_v21 = vmul.f32 %v1913_v8, %v1790_v35 }
 0xf2b   :  { %v1920_v36 = vadd.f32 %v1919_v10, %v1918_v21  ;;  %v3719_v10 = vld [vmem:[#allocation14 + $0x28] sm:$0xff]   ;;  %v3720_v21 = vld [vmem:[#allocation14 + $0x20] sm:$0xff]  }
 0xf2c   :  { %v1917_v14 = vpop.permute.xlu0 %1916 }
 0xf2d   :  { %v1921_v34 = vsel %vm129_vm4, %v1920_v36, 0.0 }
 0xf2e   :  { %3813 = vtanh.f32 %v1921_v34 }
 0xf3b   :  { %v3814_v13 = vpop.eup %3813 }
 0xf3c   :  { %v4458_v15 = vmul.f32 %v3814_v13, %v1917_v14  ;;  %v3722_v14 = vld [vmem:[#allocation14 + $0x10] sm:$0xff]  }
 0xf3e   :  { %v1926_v9 = vpack.c.bf16 %v4458_v15, %v4458_v15 }
 0xf40   :  { %3470 = vmatmul.mubr.bf16.vlgmr.msra.gmra.mxu1 %v1926_v9 }
 0xf41   :  { %3509 = vmatprep.mubr.msk.bf16.mxu1 %vm4036_vm0, %v4035_v0  ;;  %3494 = vmatpush3.bf16.msra.mxu1 %v3717_v56  ;;  %v3731_v56 = vld [vmem:[#allocation14 + $0x8] sm:$0xff]  }
 0xf42   :  { %3495 = vmatprep.subr.bf16.mxu1 %v4035_v0 }
 0xf45   :  { %3496 = vmatpush3.bf16.msra.mxu1 %v3718_v57  ;;  %v3732_v57 = vld [vmem:[#allocation14] sm:$0xff]  }
 0xf46   :  { %3497 = vmatprep.subr.bf16.mxu1 %v4035_v0 }
 0xf49   :  { %3498 = vmatpush3.bf16.msra.mxu1 %v3719_v10  ;;  %v3734_v10 = vld [vmem:[#allocation15 + $0x30] sm:$0xff]  }
 0xf4a   :  { %3499 = vmatprep.subr.bf16.mxu1 %v4035_v0 }
 0xf4d   :  { %3500 = vmatpush3.bf16.msra.mxu1 %v3720_v21  ;;  %v2590_v21 = vpack.c.bf16 %v4433_v32, %v4398_v62  ;;  %v3740_v62 = vld [vmem:[#allocation15] sm:$0xff]  }
 0xf4e   :  { %3501 = vmatprep.subr.bf16.mxu1 %v4035_v0 }
 0xf51   :  { %3502 = vmatpush3.bf16.msra.mxu1 %v3721_v4  ;;  %v3735_v4 = vld [vmem:[#allocation15 + $0x28] sm:$0xff]  }
 0xf52   :  { %3503 = vmatprep.subr.bf16.mxu1 %v4035_v0 }
 0xf55   :  { %3504 = vmatpush3.bf16.msra.mxu1 %v3722_v14  ;;  %v3739_v14 = vld [vmem:[#allocation15 + $0x8] sm:$0xff]  }
 0xf56   :  { %3505 = vmatprep.subr.bf16.mxu1 %v4035_v0 }
 0xf59   :  { %3506 = vmatpush3.bf16.msra.mxu1 %v3723_v50  ;;  %v3741_v50 = vld [vmem:[#allocation14 + $0x38] sm:$0xff]  }
 0xf5a   :  { %3507 = vmatprep.subr.bf16.mxu1 %v4035_v0 }
 0xf5d   :  { %3508 = vmatpush3.bf16.msra.mxu1 %v3724_v16  ;;  %v3742_v16 = vld [vmem:[#allocation14 + $0x30] sm:$0xff]  }
 0xf5e   :  { %3533 = vmatprep.subr.bf16.mxu1 %v4035_v0 }
0x1000   :  { %v2025_v18 = vpop.f32.mrf.mxu1 }
0x1001   :  { %v2031_v20 = vadd.f32 %v2025_v18, %v1501_v17 }
0x1002   :  { %v3471_v22 = vpop.f32.mrf.mxu1 }
0x1003   :  { %v2032_v19 = vmul.f32 2.0, %v2031_v20 }
0x1004   :  { %v2028_v60 = vpop.f32.mrf.mxu1 }
0x1005   :  { %v2033_v23 = vsel %vm4168_vm3, %v2032_v19, %v2031_v20 }
0x1006   :  { %v2946_v24 = vmul.f32 -1.442695, %v2033_v23  ;;  %v3472_v26 = vpop.f32.mrf.mxu1 }
0x1008   :  { %3815 = vpow2.f32 %v2946_v24 }
0x1015   :  { %v3816_v27 = vpop.eup %3815 }
0x1016   :  { %v2037_v29 = vadd.f32 1.0, %v3816_v27 }
0x1018   :  { %3817 = vrcp.f32 %v2037_v29  ;;  %v3725_v29 = vld [vmem:[#allocation14 + $0x38] sm:$0xff]  }
0x1025   :  { %v3818_v33 = vpop.eup %3817 }
0x1026   :  { %v2040_v35 = vmul.f32 2.0, %v3818_v33 }
0x1028   :  { %v2947_v37 = vadd.f32 -1.0, %v2040_v35 }
0x102a   :  { %v2042_v41 = vsel %vm4168_vm3, %v2947_v37, %v3818_v33 }
0x102b   :  { %2045 = vrot.lane.b32.xlu0 %v2042_v41, %s4029_s14  ;;  %2043 = vrot.lane.b32.xlu1 %v2042_v41, %s4039_s15 }
0x102f   :  { %2047 = vrot.lane.b32.xlu1 %v2042_v41, %s4038_s3 }
0x109d   :  { %v2046_v43 = vpop.permute.xlu0 %2045  ;;  %v2044_v45 = vpop.permute.xlu1 %2043 }
0x109e   :  { %v2050_v46 = vmul.f32 %v2046_v43, %v2042_v41  ;;  %v2049_v47 = vmul.f32 %v2044_v45, %v1921_v34 }
0x10a0   :  { %v2051_v48 = vadd.f32 %v2050_v46, %v2049_v47  ;;  %v3728_v47 = vld [vmem:[#allocation14 + $0x20] sm:$0xff]  }
0x10a1   :  { %v2048_v53 = vpop.permute.xlu1 %2047 }
0x10a2   :  { %v2052_v49 = vsel %vm129_vm4, %v2051_v48, 0.0  ;;  %v3729_v48 = vld [vmem:[#allocation14 + $0x18] sm:$0xff]  }
0x10a3   :  { %3819 = vtanh.f32 %v2052_v49 }
0x10b0   :  { %v3820_v52 = vpop.eup %3819 }
0x10b1   :  { %v4483_v55 = vmul.f32 %v3820_v52, %v2048_v53  ;;  %v3730_v52 = vld [vmem:[#allocation14 + $0x10] sm:$0xff]  }
0x10b3   :  { %v2057_v38 = vpack.c.bf16 %v4483_v55, %v4483_v55  ;;  %v2591_v32 = vpack.c.bf16 %v4483_v55, %v4458_v15 }
0x10b5   :  { %3490 = vmatmul.mubr.bf16.vlgmr.msra.gmra.mxu0 %v2057_v38 }
0x10b6   :  { %3529 = vmatprep.mubr.msk.bf16.mxu0 %vm4036_vm0, %v4035_v0  ;;  %3514 = vmatpush3.bf16.msra.mxu0 %v3725_v29  ;;  %v4549_v29 = vld [vmem:[%s4594_s8] ss:$0 sm:$0xff]  ;;  %s4040_s8 = smov [#allocation17]  }
0x10b7   :  { %3515 = vmatprep.subr.bf16.mxu0 %v4035_v0 }
0x10ba   :  { %3516 = vmatpush3.bf16.msra.mxu0 %v3726_v30 }
0x10bb   :  { %3517 = vmatprep.subr.bf16.mxu0 %v4035_v0 }
0x10be   :  { %3518 = vmatpush3.bf16.msra.mxu0 %v3727_v31  ;;  %v3744_v31 = vld [vmem:[#allocation14 + $0x20] sm:$0xff]  }
0x10bf   :  { %3519 = vmatprep.subr.bf16.mxu0 %v4035_v0 }
0x10c2   :  { %3520 = vmatpush3.bf16.msra.mxu0 %v3728_v47 }
0x10c3   :  { %3521 = vmatprep.subr.bf16.mxu0 %v4035_v0 }
0x10c6   :  { %3522 = vmatpush3.bf16.msra.mxu0 %v3729_v48 }
0x10c7   :  { %3523 = vmatprep.subr.bf16.mxu0 %v4035_v0 }
0x10ca   :  { %3524 = vmatpush3.bf16.msra.mxu0 %v3730_v52 }
0x10cb   :  { %3525 = vmatprep.subr.bf16.mxu0 %v4035_v0 }
0x10ce   :  { %3526 = vmatpush3.bf16.msra.mxu0 %v3731_v56 }
0x10cf   :  { %3527 = vmatprep.subr.bf16.mxu0 %v4035_v0 }
0x10d2   :  { %3528 = vmatpush3.bf16.msra.mxu0 %v3732_v57 }
0x1175   :  { %v2156_v11 = vpop.f32.mrf.mxu0 }
0x1176   :  { %v2162_v51 = vadd.f32 %v2156_v11, %v1506_v58  ;;  %v3733_v58 = vld [vmem:[#allocation15 + $0x38] sm:$0xff]  }
0x1177   :  { %v3491_v59 = vpop.f32.mrf.mxu0  ;;  %3553 = vmatprep.subr.bf16.mxu0 %v3733_v58 }
0x1178   :  { %v2163_v61 = vmul.f32 2.0, %v2162_v51 }
0x1179   :  { %v2159_v63 = vpop.f32.mrf.mxu0 }
0x117a   :  { %v2164_v1 = vsel %vm4168_vm3, %v2163_v61, %v2162_v51 }
0x117b   :  { %v2956_v2 = vmul.f32 -1.442695, %v2164_v1  ;;  %v3492_v25 = vpop.f32.mrf.mxu0 }
0x117d   :  { %3821 = vpow2.f32 %v2956_v2 }
0x118a   :  { %v3822_v7 = vpop.eup %3821 }
0x118b   :  { %v2168_v8 = vadd.f32 1.0, %v3822_v7 }
0x118d   :  { %3823 = vrcp.f32 %v2168_v8 }
0x119a   :  { %v3824_v36 = vpop.eup %3823 }
0x119b   :  { %v2171_v34 = vmul.f32 2.0, %v3824_v36 }
0x119d   :  { %v2957_v13 = vadd.f32 -1.0, %v2171_v34  ;;  %v3737_v34 = vld [vmem:[#allocation15 + $0x18] sm:$0xff]  }
0x119f   :  { %v2173_v9 = vsel %vm4168_vm3, %v2957_v13, %v3824_v36  ;;  %v3736_v36 = vld [vmem:[#allocation15 + $0x20] sm:$0xff]   ;;  %v3738_v13 = vld [vmem:[#allocation15 + $0x10] sm:$0xff]  }
0x11a0   :  { %2176 = vrot.lane.b32.xlu1 %v2173_v9, %s4029_s14  ;;  %2174 = vrot.lane.b32.xlu0 %v2173_v9, %s4039_s15 }
0x11a4   :  { %2178 = vrot.lane.b32.xlu0 %v2173_v9, %s4038_s3 }
0x1212   :  { %v2177_v17 = vpop.permute.xlu1 %2176  ;;  %v2175_v18 = vpop.permute.xlu0 %2174 }
0x1213   :  { %v2181_v20 = vmul.f32 %v2177_v17, %v2173_v9  ;;  %v2180_v22 = vmul.f32 %v2175_v18, %v2052_v49  ;;  %v1514_v17 = vadd.f32 %v4408_v3, %v4364_v12 }
0x1215   :  { %v2182_v19 = vadd.f32 %v2181_v20, %v2180_v22 }
0x1216   :  { %v2179_v24 = vpop.permute.xlu0 %2178 }
0x1217   :  { %v2183_v60 = vsel %vm129_vm4, %v2182_v19, 0.0 }
0x1218   :  { %3825 = vtanh.f32 %v2183_v60 }
0x1225   :  { %v3826_v23 = vpop.eup %3825 }
0x1226   :  { %v4508_v26 = vmul.f32 %v3826_v23, %v2179_v24 }
0x1228   :  { %v2188_v27 = vpack.c.bf16 %v4508_v26, %v4508_v26 }
0x122a   :  { %3510 = vmatmul.mubr.bf16.vlgmr.msra.gmra.mxu1 %v2188_v27  ;;  %v3743_v27 = vld [vmem:[#allocation14 + $0x28] sm:$0xff]  }
0x122b   :  { %3549 = vmatprep.mubr.msk.bf16.mxu1 %vm4036_vm0, %v4035_v0  ;;  %3534 = vmatpush3.bf16.msra.mxu1 %v3741_v50 }
0x122c   :  { %3535 = vmatprep.subr.bf16.mxu1 %v4035_v0 }
0x122f   :  { %3536 = vmatpush3.bf16.msra.mxu1 %v3742_v16 }
0x1230   :  { %3537 = vmatprep.subr.bf16.mxu1 %v4035_v0 }
0x1233   :  { %3538 = vmatpush3.bf16.msra.mxu1 %v3743_v27 }
0x1234   :  { %3539 = vmatprep.subr.bf16.mxu1 %v4035_v0 }
0x1237   :  { %3540 = vmatpush3.bf16.msra.mxu1 %v3744_v31 }
0x1238   :  { %3541 = vmatprep.subr.bf16.mxu1 %v4035_v0 }
0x12ea   :  { %v2287_v33 = vpop.f32.mrf.mxu1 }
0x12eb   :  { %v2293_v35 = vadd.f32 %v2287_v33, %v1509_v54 }
0x12ec   :  { %v3511_v37 = vpop.f32.mrf.mxu1 }
0x12ed   :  { %v2294_v39 = vmul.f32 2.0, %v2293_v35 }
0x12ee   :  { %v2290_v41 = vpop.f32.mrf.mxu1 }
0x12ef   :  { %v2295_v42 = vsel %vm4168_vm3, %v2294_v39, %v2293_v35 }
0x12f0   :  { %v2966_v28 = vmul.f32 -1.442695, %v2295_v42  ;;  %v3512_v43 = vpop.f32.mrf.mxu1 }
0x12f2   :  { %3827 = vpow2.f32 %v2966_v28  ;;  %v3745_v28 = vld [vmem:[#allocation14 + $0x18] sm:$0xff]  }
0x12f3   :  { %3542 = vmatpush3.bf16.msra.mxu1 %v3745_v28 }
0x12f4   :  { %3543 = vmatprep.subr.bf16.mxu1 %v4035_v0 }
0x12ff   :  { %v3828_v45 = vpop.eup %3827 }
0x1300   :  { %v2299_v46 = vadd.f32 1.0, %v3828_v45 }
0x1302   :  { %3829 = vrcp.f32 %v2299_v46 }
0x130f   :  { %v3830_v6 = vpop.eup %3829 }
0x1310   :  { %v2302_v49 = vmul.f32 2.0, %v3830_v6 }
0x1312   :  { %v2967_v53 = vadd.f32 -1.0, %v2302_v49  ;;  %v3746_v49 = vld [vmem:[#allocation14 + $0x10] sm:$0xff]  }
0x1313   :  { %3544 = vmatpush3.bf16.msra.mxu1 %v3746_v49 }
0x1314   :  { %v2304_v38 = vsel %vm4168_vm3, %v2967_v53, %v3830_v6  ;;  %3545 = vmatprep.subr.bf16.mxu1 %v4035_v0  ;;  %v3747_v53 = vld [vmem:[#allocation14 + $0x8] sm:$0xff]  }
0x1315   :  { %2307 = vrot.lane.b32.xlu0 %v2304_v38, %s4029_s14  ;;  %2305 = vrot.lane.b32.xlu1 %v2304_v38, %s4039_s15 }
0x1317   :  { %3546 = vmatpush3.bf16.msra.mxu1 %v3747_v53 }
0x1318   :  { %3547 = vmatprep.subr.bf16.mxu1 %v4035_v0 }
0x1319   :  { %2309 = vrot.lane.b32.xlu1 %v2304_v38, %s4038_s3 }
0x1387   :  { %v2308_v11 = vpop.permute.xlu0 %2307  ;;  %v2306_v51 = vpop.permute.xlu1 %2305 }
0x1388   :  { %v2312_v59 = vmul.f32 %v2308_v11, %v2304_v38  ;;  %v2311_v61 = vmul.f32 %v2306_v51, %v2183_v60  ;;  %v3748_v38 = vld [vmem:[#allocation14] sm:$0xff]  }
0x1389   :  { %3548 = vmatpush3.bf16.msra.mxu1 %v3748_v38 }
0x138a   :  { %v2313_v63 = vadd.f32 %v2312_v59, %v2311_v61 }
0x138b   :  { %v2310_v25 = vpop.permute.xlu1 %2309 }
0x138c   :  { %v4532_v1 = vsel %vm129_vm4, %v2313_v63, 0.0 }
0x138d   :  { %3831 = vtanh.f32 %v4532_v1 }
0x139a   :  { %v3832_v2 = vpop.eup %3831 }
0x139b   :  { %v2316_v7 = vmul.f32 %v3832_v2, %v2310_v25 }
0x139d   :  { %v2319_v8 = vpack.c.bf16 %v2316_v7, %v2316_v7  ;;  %v2592_v9 = vpack.c.bf16 %v2316_v7, %v4508_v26 }
0x139f   :  { %3530 = vmatmul.mubr.bf16.vlgmr.msra.gmra.mxu0 %v2319_v8 }
0x13a0   :  { %3554 = vmatpush3.bf16.msra.mxu0 %v3733_v58  ;;  %3569 = vmatprep.mubr.bf16.mxu0 %v2590_v21 }
0x13a1   :  { %3555 = vmatprep.subr.bf16.mxu0 %v3734_v10 }
0x13a4   :  { %3556 = vmatpush3.bf16.msra.mxu0 %v3734_v10 }
0x13a5   :  { %3557 = vmatprep.subr.bf16.mxu0 %v3735_v4 }
0x13a8   :  { %3558 = vmatpush3.bf16.msra.mxu0 %v3735_v4 }
0x13a9   :  { %3559 = vmatprep.subr.bf16.mxu0 %v3736_v36 }
0x13ac   :  { %3560 = vmatpush3.bf16.msra.mxu0 %v3736_v36 }
0x13ad   :  { %3561 = vmatprep.subr.bf16.mxu0 %v3737_v34 }
0x13b0   :  { %3562 = vmatpush3.bf16.msra.mxu0 %v3737_v34 }
0x13b1   :  { %3563 = vmatprep.subr.bf16.mxu0 %v3738_v13 }
0x13b4   :  { %3564 = vmatpush3.bf16.msra.mxu0 %v3738_v13 }
0x13b5   :  { %3565 = vmatprep.subr.bf16.mxu0 %v3739_v14 }
0x13b8   :  { %3566 = vmatpush3.bf16.msra.mxu0 %v3739_v14 }
0x13b9   :  { %3567 = vmatprep.subr.bf16.mxu0 %v3740_v62 }
0x13bc   :  { %3568 = vmatpush3.bf16.msra.mxu0 %v3740_v62 }
0x13bf   :  { %3570 = vmatmul.mubr.bf16.vlgmr.msra.gmra.mxu0 %v2591_v32 }
0x13c0   :  { %3573 = vmatprep.mubr.bf16.mxu0 %v2592_v9  ;;  %v1517_v9 = vadd.f32 %v4412_v5, %v4364_v12 }
0x145f   :  { %v2418_v18 = vpop.f32.mrf.mxu0 }
0x1460   :  { %v2424_v20 = vadd.f32 %v2418_v18, %v1514_v17 }
0x1461   :  { %v3531_v22 = vpop.f32.mrf.mxu0 }
0x1462   :  { %v2425_v19 = vmul.f32 2.0, %v2424_v20 }
0x1463   :  { %v2421_v15 = vpop.f32.mrf.mxu0 }
0x1464   :  { %v2426_v55 = vsel %vm4168_vm3, %v2425_v19, %v2424_v20 }
0x1465   :  { %v2976_v60 = vmul.f32 -1.442695, %v2426_v55  ;;  %v3532_v23 = vpop.f32.mrf.mxu0 }
0x1467   :  { %3833 = vpow2.f32 %v2976_v60 }
0x1474   :  { %v3834_v24 = vpop.eup %3833 }
0x1475   :  { %v2430_v26 = vadd.f32 1.0, %v3834_v24 }
0x1477   :  { %3835 = vrcp.f32 %v2430_v26 }
0x147f   :  { %v3571_v3 = vpop.f32.mrf.mxu0 }
0x1480   :  { %v2708_v30 = vadd.f32 %v3571_v3, %v4549_v29 }
0x1481   :  { %v2699_v54 = vpop.f32.mrf.mxu0 }
0x1482   :  { %v2999_v33 = vmul.f32 -1.442695, %v2708_v30  ;;  %v2700_v35 = vadd.f32 %v4549_v29, %v2699_v54 }
0x1483   :  { %v3572_v37 = vpop.f32.mrf.mxu0 }
0x1484   :  { %v3836_v39 = vpop.eup %3835  ;;  %3837 = vpow2.f32 %v2999_v33  ;;  %v2997_v41 = vmul.f32 -1.442695, %v2700_v35  ;;  %v2711_v42 = vadd.f32 %v3572_v37, %v4549_v29 }
0x1485   :  { %v2702_v43 = vpop.f32.mrf.mxu0  ;;  %v2433_v45 = vmul.f32 2.0, %v3836_v39 }
0x1486   :  { %3839 = vpow2.f32 %v2997_v41  ;;  %v3000_v46 = vmul.f32 -1.442695, %v2711_v42  ;;  %v2703_v47 = vadd.f32 %v4549_v29, %v2702_v43 }
0x1487   :  { %v2977_v48 = vadd.f32 -1.0, %v2433_v45 }
0x1488   :  { %3841 = vpow2.f32 %v3000_v46  ;;  %v2998_v6 = vmul.f32 -1.442695, %v2703_v47 }
0x1489   :  { %v2435_v52 = vsel %vm4168_vm3, %v2977_v48, %v3836_v39 }
0x148a   :  { %3843 = vpow2.f32 %v2998_v6  ;;  %2438 = vrot.lane.b32.xlu1 %v2435_v52, %s4029_s14  ;;  %2436 = vrot.lane.b32.xlu0 %v2435_v52, %s4039_s15 }
0x148e   :  { %2440 = vrot.lane.b32.xlu0 %v2435_v52, %s4038_s3 }
0x1491   :  { %v3838_v56 = vpop.eup %3837 }
0x1492   :  { %v2756_v57 = vadd.f32 1.0, %v3838_v56 }
0x1493   :  { %v3840_v58 = vpop.eup %3839 }
0x1494   :  { %3845 = vrcp.f32 %v2756_v57  ;;  %v2754_v11 = vadd.f32 1.0, %v3840_v58 }
0x1495   :  { %v3842_v51 = vpop.eup %3841 }
0x1496   :  { %3847 = vrcp.f32 %v2754_v11  ;;  %v2757_v59 = vadd.f32 1.0, %v3842_v51 }
0x1497   :  { %v3844_v61 = vpop.eup %3843 }
0x1498   :  { %3849 = vrcp.f32 %v2757_v59  ;;  %v2755_v63 = vadd.f32 1.0, %v3844_v61 }
0x149a   :  { %3851 = vrcp.f32 %v2755_v63 }
0x14a1   :  { %v3846_v2 = vpop.eup %3845 }
0x14a2   :  { %2780 = vst [vmem:[#allocation17 + $0x10] sm:$0xff] %v3846_v2 }
0x14a3   :  { %v3848_v25 = vpop.eup %3847 }
0x14a4   :  { %2778 = vst [vmem:[#allocation17] sm:$0xff] %v3848_v25 }
0x14a5   :  { %v3850_v7 = vpop.eup %3849 }
0x14a6   :  { %2781 = vst [vmem:[#allocation17 + $0x18] sm:$0xff] %v3850_v7 }
0x14a7   :  { %v3852_v0 = vpop.eup %3851 }
0x14a8   :  { %2779 = vst [vmem:[#allocation17 + $0x8] sm:$0xff] %v3852_v0 }
0x14fc   :  { %v2439_v8 = vpop.permute.xlu1 %2438  ;;  %v2437_v10 = vpop.permute.xlu0 %2436 }
0x14fd   :  { %v2443_v21 = vmul.f32 %v2439_v8, %v2435_v52  ;;  %v2442_v4 = vmul.f32 %v2437_v10, %v4532_v1 }
0x14ff   :  { %v2444_v36 = vadd.f32 %v2443_v21, %v2442_v4 }
0x1500   :  { %v2441_v14 = vpop.permute.xlu0 %2440 }
0x1501   :  { %v2445_v34 = vsel %vm129_vm4, %v2444_v36, 0.0 }
0x1502   :  { %3853 = vtanh.f32 %v2445_v34 }
0x150f   :  { %v3854_v13 = vpop.eup %3853 }
0x1510   :  { %v2447_v62 = vmul.f32 %v3854_v13, %v2441_v14 }
0x1512   :  { %v2450_v32 = vpack.c.bf16 %v2447_v62, %v2447_v62 }
0x1514   :  { %3550 = vmatmul.mubr.bf16.vlgmr.msra.gmra.mxu1 %v2450_v32 }
0x15d4   :  { %v2549_v50 = vpop.f32.mrf.mxu1 }
0x15d5   :  { %v2555_v16 = vadd.f32 %v2549_v50, %v1517_v9 }
0x15d6   :  { %v3551_v17 = vpop.f32.mrf.mxu1 }
0x15d7   :  { %v2556_v18 = vmul.f32 2.0, %v2555_v16 }
0x15d8   :  { %v2552_v20 = vpop.f32.mrf.mxu1 }
0x15d9   :  { %v2557_v1 = vsel %vm4168_vm3, %v2556_v18, %v2555_v16 }
0x15da   :  { %v2986_v22 = vmul.f32 -1.442695, %v2557_v1  ;;  %v3552_v19 = vpop.f32.mrf.mxu1 }
0x15dc   :  { %3855 = vpow2.f32 %v2986_v22 }
0x15e9   :  { %v3856_v15 = vpop.eup %3855 }
0x15ea   :  { %v2561_v55 = vadd.f32 1.0, %v3856_v15 }
0x15ec   :  { %3857 = vrcp.f32 %v2561_v55 }
0x15f9   :  { %v3858_v60 = vpop.eup %3857 }
0x15fa   :  { %v2564_v23 = vmul.f32 2.0, %v3858_v60 }
0x15fc   :  { %v2987_v24 = vadd.f32 -1.0, %v2564_v23 }
0x15fe   :  { %v2566_v12 = vsel %vm4168_vm3, %v2987_v24, %v3858_v60 }
0x15ff   :  { %2569 = vrot.lane.b32.xlu0 %v2566_v12, %s4029_s14  ;;  %2567 = vrot.lane.b32.xlu1 %v2566_v12, %s4039_s15  ;;  %s2791_s14 = sshll.u32 %s4040_s8, 4  ;;  %s2792_s14 = int_to_ptr.vmem [resolvable:$true] %s2791_s14 }
0x1600   :  { %s3997_s21 = scalar_lea.vmem %s2792_s14, 1024  ;;  %p4002_p3 = scmp.lt.s32.totalorder %s2792_s14, %s2792_s14 }
0x1601   :  { %p3998_p2 = scmp.ne.s32.totalorder %s2792_s14, %s3997_s21  ;;  %p4003_p4 = scmp.lt.s32.totalorder %s3997_s21, %s3997_s21 }
0x1603   :  { %2571 = vrot.lane.b32.xlu1 %v2566_v12, %s4038_s3  ;;  %p4004_p5 = por %p4003_p4, %p4002_p3 }
0x1605   :  { %p4005_p6 = pnand %p4004_p5, %p3998_p2 }
0x1671   :  { %v2570_v5 = vpop.permute.xlu0 %2569  ;;  %v2568_v26 = vpop.permute.xlu1 %2567 }
0x1672   :  { %v2574_v27 = vmul.f32 %v2570_v5, %v2566_v12  ;;  %v2573_v3 = vmul.f32 %v2568_v26, %v2445_v34 }
0x1674   :  { %v2575_v30 = vadd.f32 %v2574_v27, %v2573_v3 }
0x1675   :  { %v2572_v33 = vpop.permute.xlu1 %2571 }
0x1676   :  { %v2576_v31 = vsel %vm129_vm4, %v2575_v30, 0.0 }
0x1677   :  { %3859 = vtanh.f32 %v2576_v31 }
0x1684   :  { %v3860_v54 = vpop.eup %3859 }
0x1685   :  { %v2578_v35 = vmul.f32 %v3860_v54, %v2572_v33 }
0x1687   :  { %v2593_v44 = vpack.c.bf16 %v2578_v35, %v2447_v62 }
0x1689   :  { %3574 = vmatmul.mubr.bf16.gmra.mxu0 %v2593_v44 }
0x1749   :  { %v3575_v37 = vpop.f32.mrf.mxu0 }
0x174a   :  { %v2724_v39 = vadd.f32 %v3575_v37, %v4549_v29 }
0x174b   :  { %v2715_v41 = vpop.f32.mrf.mxu0 }
0x174c   :  { %v3003_v42 = vmul.f32 -1.442695, %v2724_v39  ;;  %v2716_v28 = vadd.f32 %v4549_v29, %v2715_v41 }
0x174d   :  { %v3576_v43 = vpop.f32.mrf.mxu0 }
0x174e   :  { %3861 = vpow2.f32 %v3003_v42  ;;  %v3001_v45 = vmul.f32 -1.442695, %v2716_v28  ;;  %v2727_v46 = vadd.f32 %v3576_v43, %v4549_v29 }
0x174f   :  { %v2718_v40 = vpop.f32.mrf.mxu0 }
0x1750   :  { %3863 = vpow2.f32 %v3001_v45  ;;  %v3004_v47 = vmul.f32 -1.442695, %v2727_v46  ;;  %v2719_v48 = vadd.f32 %v4549_v29, %v2718_v40 }
0x1752   :  { %3865 = vpow2.f32 %v3004_v47  ;;  %v3002_v6 = vmul.f32 -1.442695, %v2719_v48 }
0x1754   :  { %3867 = vpow2.f32 %v3002_v6 }
0x175b   :  { %v3862_v49 = vpop.eup %3861 }
0x175c   :  { %v2760_v52 = vadd.f32 1.0, %v3862_v49 }
0x175d   :  { %v3864_v53 = vpop.eup %3863 }
0x175e   :  { %3869 = vrcp.f32 %v2760_v52  ;;  %v2758_v38 = vadd.f32 1.0, %v3864_v53 }
0x175f   :  { %v3866_v56 = vpop.eup %3865 }
0x1760   :  { %3871 = vrcp.f32 %v2758_v38  ;;  %v2761_v57 = vadd.f32 1.0, %v3866_v56 }
0x1761   :  { %v3868_v58 = vpop.eup %3867 }
0x1762   :  { %3873 = vrcp.f32 %v2761_v57  ;;  %v2759_v11 = vadd.f32 1.0, %v3868_v58 }
0x1764   :  { %3875 = vrcp.f32 %v2759_v11 }
0x176b   :  { %v3870_v51 = vpop.eup %3869 }
0x176c   :  { %2784 = vst [vmem:[#allocation17 + $0x30] sm:$0xff] %v3870_v51 }
0x176d   :  { %v3872_v59 = vpop.eup %3871 }
0x176e   :  { %2782 = vst [vmem:[#allocation17 + $0x20] sm:$0xff] %v3872_v59 }
0x176f   :  { %v3874_v29 = vpop.eup %3873 }
0x1770   :  { %2785 = vst [vmem:[#allocation17 + $0x38] sm:$0xff] %v3874_v29 }
0x1771   :  { %v3876_v61 = vpop.eup %3875 }
0x1772   :  { %2783 = vst [vmem:[#allocation17 + $0x28] sm:$0xff] %v3876_v61 }
0x1773   :  { %4008 = shalt.err (!%p4005_p6)
}
0x1774   :  { %s4041_s22 = smov 128   ;;  %s4042_s23 = smov 8  }
0x1775   :  { %2797 = dma.vmem_to_hbm [thread:$0]  %s2792_s14, 1024, %s4595_s9, [#allocation8], %s4041_s22, %s4041_s22, %s4042_s23  }
0x1776   :  { %4025 = dma.done.wait [#allocation8], 1024  }
0x1777   :  { %4026 = vsyncadd [#allocation8], 4294966272 }
0x1778   :  { %2801 = vsyncpa [#allocation7], 1 }
0x1779   :  { %2802 = vsyncpa [#allocation10], 1 }
0x177a   :  { %2803 = vsyncpa [#allocation13], 1 }
0x177b   :  { %2804 = vsyncpa [#allocation16], 1 }
0x177c   :  { %2805 = vsyncpa [#allocation8], 1 }

</bundles_post_ra>
